<compile_context>
chip_gen: v6e
topology: v6e:2x2x1
jax: 0.10.0
libtpu: 0.0.40
codegen_flags: <defaults>
</compile_context>

<pallas_src>
import functools

import jax
import jax.numpy as jnp
from jax.experimental import pallas as pl
from jax.experimental.pallas import tpu as pltpu

K_CAT = 20        # categorical_dim (K)
N_LAT = 3         # latent_dim (N)
NK = N_LAT * K_CAT            # 60 logical logits per row
NK_PAD = 128                  # lane-dense padding for x / gumbel / qy
TEMP = 1.0
HARD = False      # TODO(synk): hard=True straight-through (argmax one-hot) path not implemented

H4, H5 = 256, 512
H6 = 2352         # fc6 output written directly (block last dim == full array dim)


def _round_up(n, m):
    return ((n + m - 1) // m) * m


def decoder_kernel(x_ref, g_ref,
                   w4_ref, b4_ref, w5_ref, b5_ref, w6_ref, b6_ref,
                   out_ref, qy_ref, *, temp):
    bt, nkp = x_ref.shape
    x = x_ref[...]                                       # (bt, NK_PAD) f32
    g = g_ref[...]                                       # gumbel noise, same shape

    # ---- per-group (size-K) softmax, full-width with lane masks ----
    col = jax.lax.broadcasted_iota(jnp.int32, (bt, nkp), 1)
    masks = [(col >= n * K_CAT) & (col < (n + 1) * K_CAT) for n in range(N_LAT)]
    valid = col < NK

    def group_softmax(v):
        gmax = jnp.zeros_like(v)
        for m in masks:
            mx = jnp.max(jnp.where(m, v, -jnp.inf), axis=-1, keepdims=True)
            gmax = jnp.where(m, mx, gmax)
        e = jnp.where(valid, jnp.exp(v - gmax), 0.0)     # padding lanes -> exactly 0
        gsum = jnp.ones_like(v)                          # 1.0 on pad lanes (no div-by-0)
        for m in masks:
            s = jnp.sum(jnp.where(m, e, 0.0), axis=-1, keepdims=True)
            gsum = jnp.where(m, s, gsum)
        return e / gsum

    # softmax(q_y, dim=-1): second output, single lane-dense store (pad lanes are 0)
    qy_ref[...] = group_softmax(x)

    # gumbel-softmax sample (soft path, hard=False)
    z = group_softmax((x + g) * (1.0 / temp))

    # ---- fc4 -> relu -> fc5 -> relu -> fc6 -> sigmoid ----
    # bf16 MXU inputs, f32 accumulation; padded z lanes are 0 and w4 pad rows are 0.
    h4 = jnp.maximum(
        jnp.dot(z.astype(jnp.bfloat16), w4_ref[...],
                preferred_element_type=jnp.float32) + b4_ref[...], 0.0)
    h5 = jnp.maximum(
        jnp.dot(h4.astype(jnp.bfloat16), w5_ref[...],
                preferred_element_type=jnp.float32) + b5_ref[...], 0.0)
    logits6 = jnp.dot(h5.astype(jnp.bfloat16), w6_ref[...],
                      preferred_element_type=jnp.float32) + b6_ref[...]
    # bf16 sigmoid + bf16 store: halves the dominant HBM write stream (and EUP work
    # on v6e/v7x which have bf16 EUP; v5e just upcasts internally).
    out_ref[...] = jax.nn.sigmoid(logits6.astype(jnp.bfloat16))


def prepare_params(params):
    """One-time weight prep (pad / cast / reshape) hoisted out of the forward path."""
    w4, b4, w5, b5, w6, b6 = params
    w4p = jnp.zeros((NK_PAD, H4), jnp.float32).at[:NK].set(w4).astype(jnp.bfloat16)
    return (w4p,
            b4.reshape(1, H4).astype(jnp.float32),
            w5.astype(jnp.bfloat16),
            b5.reshape(1, H5).astype(jnp.float32),
            w6.astype(jnp.bfloat16),
            b6.reshape(1, H6).astype(jnp.float32))


def discrete_decoder_forward(x, prepared_params, key, temp=TEMP, hard=HARD, block_bs=512):
    """Forward pass of DiscreteDecoder.

    Returns:
      out1: (bs, 2352) bf16  = sigmoid(fc6(relu(fc5(relu(fc4(z))))))
      qy  : (bs*N, K)  f32   = softmax(q_y, dim=-1)
    """
    assert not hard, "hard=True path not implemented"  # TODO(synk): straight-through
    bs, nk = x.shape
    assert nk == NK

    w4p, b4p, w5p, b5p, w6p, b6p = prepared_params

    # Batch tiling: keep >=2 grid steps whenever the batch allows it so the
    # "parallel" batch axis shards across both v7x TensorCores.
    bs_p = _round_up(bs, 8)
    if bs_p > block_bs:
        bt = block_bs
    elif bs_p >= 16:
        bt = _round_up((bs_p + 1) // 2, 8)
    else:
        bt = bs_p
    bs_p = _round_up(bs_p, bt)
    grid = (bs_p // bt,)

    # Pad x to (bs_p, 128): lane-dense qy stores and an MXU-aligned fc4 contraction dim.
    x_p = jnp.zeros((bs_p, NK_PAD), jnp.float32).at[:bs, :NK].set(x)

    # Gumbel noise (matches sample_gumbel with eps=1e-10 as used by gumbel_softmax).
    eps = 1e-10
    u = jax.random.uniform(key, (bs_p, NK_PAD), jnp.float32)
    gumbel = -jnp.log(eps - jnp.log(u + eps))

    kernel = functools.partial(decoder_kernel, temp=float(temp))

    out1_p, qy_p = pl.pallas_call(
        kernel,
        out_shape=(
            jax.ShapeDtypeStruct((bs_p, H6), jnp.bfloat16),
            jax.ShapeDtypeStruct((bs_p, NK_PAD), jnp.float32),
        ),
        grid=grid,
        in_specs=[
            pl.BlockSpec((bt, NK_PAD), lambda i: (i, 0)),       # x (batch-tiled)
            pl.BlockSpec((bt, NK_PAD), lambda i: (i, 0)),       # gumbel noise
            pl.BlockSpec((NK_PAD, H4), lambda i: (0, 0)),       # w4 (resident)
            pl.BlockSpec((1, H4), lambda i: (0, 0)),            # b4
            pl.BlockSpec((H4, H5), lambda i: (0, 0)),           # w5
            pl.BlockSpec((1, H5), lambda i: (0, 0)),            # b5
            pl.BlockSpec((H5, H6), lambda i: (0, 0)),           # w6
            pl.BlockSpec((1, H6), lambda i: (0, 0)),            # b6
        ],
        out_specs=(
            pl.BlockSpec((bt, H6), lambda i: (i, 0)),
            pl.BlockSpec((bt, NK_PAD), lambda i: (i, 0)),
        ),
        compiler_params=pltpu.CompilerParams(dimension_semantics=("parallel",)),
    )(x_p, gumbel, w4p, b4p, w5p, b5p, w6p, b6p)

    out1 = out1_p if bs_p == bs else out1_p[:bs]
    # (bs, N*K) -> (bs*N, K): tiny slice + reshape, matches torch .reshape semantics
    qy = qy_p[:bs, :NK].reshape(bs * N_LAT, K_CAT)
    return out1, qy


def init_params(key):
    """Deterministic synthetic params. Weights stored as (in, out)."""
    ks = jax.random.split(key, 6)

    def lin(kw, fan_in, fan_out):
        scale = 1.0 / jnp.sqrt(jnp.float32(fan_in))
        return jax.random.uniform(kw, (fan_in, fan_out), jnp.float32, -scale, scale)

    w4 = lin(ks[0], NK, H4)
    b4 = jax.random.uniform(ks[1], (H4,), jnp.float32, -0.05, 0.05)
    w5 = lin(ks[2], H4, H5)
    b5 = jax.random.uniform(ks[3], (H5,), jnp.float32, -0.05, 0.05)
    w6 = lin(ks[4], H5, H6)
    b6 = jax.random.uniform(ks[5], (H6,), jnp.float32, -0.05, 0.05)
    return (w4, b4, w5, b5, w6, b6)


if __name__ == "__main__":
    key = jax.random.PRNGKey(0)
    k_param, k_x, k_noise = jax.random.split(key, 3)

    bs = 2
    x = jax.random.normal(k_x, (bs, NK), dtype=jnp.float32)
    params = init_params(k_param)
    prepared = prepare_params(params)   # one-time weight prep, outside the forward path

    out1, qy = discrete_decoder_forward(x, prepared, k_noise, temp=TEMP, hard=HARD)
    out1 = jax.block_until_ready(out1)
    qy = jax.block_until_ready(qy)

    assert out1.shape == (bs, H6) and out1.dtype == jnp.bfloat16
    assert qy.shape == (bs * N_LAT, K_CAT)
    # sanity: sigmoid output in [0,1] (bf16 may round to the endpoints), softmax rows sum to 1
    assert bool(jnp.all((out1 >= 0) & (out1 <= 1)))
    assert bool(jnp.all(jnp.abs(jnp.sum(qy, axis=-1) - 1.0) < 1e-5))

    print("KERNEL_OK")
</pallas_src>

<mosaic_0001>
module attributes {stable_mosaic.version = 11 : i64} {
  func.func @decoder_kernel(%arg0: i32, %arg1: memref<8x128xf32, #tpu.memory_space<vmem>>, %arg2: memref<8x128xf32, #tpu.memory_space<vmem>>, %arg3: memref<128x256xbf16, #tpu.memory_space<vmem>>, %arg4: memref<1x256xf32, #tpu.memory_space<vmem>>, %arg5: memref<256x512xbf16, #tpu.memory_space<vmem>>, %arg6: memref<1x512xf32, #tpu.memory_space<vmem>>, %arg7: memref<512x2352xbf16, #tpu.memory_space<vmem>>, %arg8: memref<1x2352xf32, #tpu.memory_space<vmem>>, %arg9: memref<8x2352xbf16, #tpu.memory_space<vmem>>, %arg10: memref<8x128xf32, #tpu.memory_space<vmem>>) attributes {dimension_semantics = [#tpu.dimension_semantics<parallel>], iteration_bounds = array<i64: 1>, scalar_prefetch = 0 : i64, scratch_operands = 0 : i64, tpu.core_type = #tpu.core_type<tc>, window_params = [{transform_indices = @transform_0, window_bounds = array<i64: 8, 128>}, {transform_indices = @transform_1, window_bounds = array<i64: 8, 128>}, {pipeline_mode = #tpu.pipeline_mode<synchronous>, transform_indices = @transform_2, window_bounds = array<i64: 128, 256>}, {pipeline_mode = #tpu.pipeline_mode<synchronous>, transform_indices = @transform_3, window_bounds = array<i64: 1, 256>}, {pipeline_mode = #tpu.pipeline_mode<synchronous>, transform_indices = @transform_4, window_bounds = array<i64: 256, 512>}, {pipeline_mode = #tpu.pipeline_mode<synchronous>, transform_indices = @transform_5, window_bounds = array<i64: 1, 512>}, {pipeline_mode = #tpu.pipeline_mode<synchronous>, transform_indices = @transform_6, window_bounds = array<i64: 512, 2352>}, {pipeline_mode = #tpu.pipeline_mode<synchronous>, transform_indices = @transform_7, window_bounds = array<i64: 1, 2352>}, {transform_indices = @transform_8, window_bounds = array<i64: 8, 2352>}, {transform_indices = @transform_9, window_bounds = array<i64: 8, 128>}]} {
    %c0 = arith.constant 0 : index
    %c0_0 = arith.constant 0 : index
    %0 = vector.load %arg1[%c0, %c0_0] : memref<8x128xf32, #tpu.memory_space<vmem>>, vector<8x128xf32>
    %c0_1 = arith.constant 0 : index
    %c0_2 = arith.constant 0 : index
    %1 = vector.load %arg2[%c0_1, %c0_2] : memref<8x128xf32, #tpu.memory_space<vmem>>, vector<8x128xf32>
    %2 = tpu.iota {dimensions = array<i32: 1>} : vector<8x128xi32>
    %c0_i32 = arith.constant 0 : i32
    %3 = vector.broadcast %c0_i32 : i32 to vector<8x128xi32>
    %4 = arith.cmpi sge, %2, %3 : vector<8x128xi32>
    %c20_i32 = arith.constant 20 : i32
    %5 = vector.broadcast %c20_i32 : i32 to vector<8x128xi32>
    %6 = arith.cmpi slt, %2, %5 : vector<8x128xi32>
    %7 = arith.andi %4, %6 : vector<8x128xi1>
    %c20_i32_3 = arith.constant 20 : i32
    %8 = vector.broadcast %c20_i32_3 : i32 to vector<8x128xi32>
    %9 = arith.cmpi sge, %2, %8 : vector<8x128xi32>
    %c40_i32 = arith.constant 40 : i32
    %10 = vector.broadcast %c40_i32 : i32 to vector<8x128xi32>
    %11 = arith.cmpi slt, %2, %10 : vector<8x128xi32>
    %12 = arith.andi %9, %11 : vector<8x128xi1>
    %c40_i32_4 = arith.constant 40 : i32
    %13 = vector.broadcast %c40_i32_4 : i32 to vector<8x128xi32>
    %14 = arith.cmpi sge, %2, %13 : vector<8x128xi32>
    %c60_i32 = arith.constant 60 : i32
    %15 = vector.broadcast %c60_i32 : i32 to vector<8x128xi32>
    %16 = arith.cmpi slt, %2, %15 : vector<8x128xi32>
    %17 = arith.andi %14, %16 : vector<8x128xi1>
    %c60_i32_5 = arith.constant 60 : i32
    %18 = vector.broadcast %c60_i32_5 : i32 to vector<8x128xi32>
    %19 = arith.cmpi slt, %2, %18 : vector<8x128xi32>
    %cst = arith.constant 0.000000e+00 : f32
    %20 = vector.broadcast %cst : f32 to vector<8x128xf32>
    %cst_6 = arith.constant 0xFF800000 : f32
    %21 = vector.broadcast %cst_6 : f32 to vector<8x128xf32>
    %22 = arith.select %7, %0, %21 : vector<8x128xi1>, vector<8x128xf32>
    %cst_7 = arith.constant dense<0xFF800000> : vector<8xf32>
    %23 = vector.multi_reduction <maximumf>, %22, %cst_7 [1] : vector<8x128xf32> to vector<8xf32>
    %24 = vector.shape_cast %23 : vector<8xf32> to vector<8x1xf32>
    %25 = vector.shape_cast %24 : vector<8x1xf32> to vector<8x1xf32>
    %26 = vector.broadcast %25 : vector<8x1xf32> to vector<8x128xf32>
    %27 = arith.select %7, %26, %20 : vector<8x128xi1>, vector<8x128xf32>
    %cst_8 = arith.constant 0xFF800000 : f32
    %28 = vector.broadcast %cst_8 : f32 to vector<8x128xf32>
    %29 = arith.select %12, %0, %28 : vector<8x128xi1>, vector<8x128xf32>
    %cst_9 = arith.constant dense<0xFF800000> : vector<8xf32>
    %30 = vector.multi_reduction <maximumf>, %29, %cst_9 [1] : vector<8x128xf32> to vector<8xf32>
    %31 = vector.shape_cast %30 : vector<8xf32> to vector<8x1xf32>
    %32 = vector.shape_cast %31 : vector<8x1xf32> to vector<8x1xf32>
    %33 = vector.broadcast %32 : vector<8x1xf32> to vector<8x128xf32>
    %34 = arith.select %12, %33, %27 : vector<8x128xi1>, vector<8x128xf32>
    %cst_10 = arith.constant 0xFF800000 : f32
    %35 = vector.broadcast %cst_10 : f32 to vector<8x128xf32>
    %36 = arith.select %17, %0, %35 : vector<8x128xi1>, vector<8x128xf32>
    %cst_11 = arith.constant dense<0xFF800000> : vector<8xf32>
    %37 = vector.multi_reduction <maximumf>, %36, %cst_11 [1] : vector<8x128xf32> to vector<8xf32>
    %38 = vector.shape_cast %37 : vector<8xf32> to vector<8x1xf32>
    %39 = vector.shape_cast %38 : vector<8x1xf32> to vector<8x1xf32>
    %40 = vector.broadcast %39 : vector<8x1xf32> to vector<8x128xf32>
    %41 = arith.select %17, %40, %34 : vector<8x128xi1>, vector<8x128xf32>
    %42 = arith.subf %0, %41 : vector<8x128xf32>
    %43 = math.exp %42 : vector<8x128xf32>
    %cst_12 = arith.constant 0.000000e+00 : f32
    %44 = vector.broadcast %cst_12 : f32 to vector<8x128xf32>
    %45 = arith.select %19, %43, %44 : vector<8x128xi1>, vector<8x128xf32>
    %cst_13 = arith.constant 1.000000e+00 : f32
    %46 = vector.broadcast %cst_13 : f32 to vector<8x128xf32>
    %cst_14 = arith.constant 0.000000e+00 : f32
    %47 = vector.broadcast %cst_14 : f32 to vector<8x128xf32>
    %48 = arith.select %7, %45, %47 : vector<8x128xi1>, vector<8x128xf32>
    %cst_15 = arith.constant dense<0.000000e+00> : vector<8xf32>
    %49 = vector.multi_reduction <add>, %48, %cst_15 [1] : vector<8x128xf32> to vector<8xf32>
    %50 = vector.shape_cast %49 : vector<8xf32> to vector<8x1xf32>
    %51 = vector.shape_cast %50 : vector<8x1xf32> to vector<8x1xf32>
    %52 = vector.broadcast %51 : vector<8x1xf32> to vector<8x128xf32>
    %53 = arith.select %7, %52, %46 : vector<8x128xi1>, vector<8x128xf32>
    %cst_16 = arith.constant 0.000000e+00 : f32
    %54 = vector.broadcast %cst_16 : f32 to vector<8x128xf32>
    %55 = arith.select %12, %45, %54 : vector<8x128xi1>, vector<8x128xf32>
    %cst_17 = arith.constant dense<0.000000e+00> : vector<8xf32>
    %56 = vector.multi_reduction <add>, %55, %cst_17 [1] : vector<8x128xf32> to vector<8xf32>
    %57 = vector.shape_cast %56 : vector<8xf32> to vector<8x1xf32>
    %58 = vector.shape_cast %57 : vector<8x1xf32> to vector<8x1xf32>
    %59 = vector.broadcast %58 : vector<8x1xf32> to vector<8x128xf32>
    %60 = arith.select %12, %59, %53 : vector<8x128xi1>, vector<8x128xf32>
    %cst_18 = arith.constant 0.000000e+00 : f32
    %61 = vector.broadcast %cst_18 : f32 to vector<8x128xf32>
    %62 = arith.select %17, %45, %61 : vector<8x128xi1>, vector<8x128xf32>
    %cst_19 = arith.constant dense<0.000000e+00> : vector<8xf32>
    %63 = vector.multi_reduction <add>, %62, %cst_19 [1] : vector<8x128xf32> to vector<8xf32>
    %64 = vector.shape_cast %63 : vector<8xf32> to vector<8x1xf32>
    %65 = vector.shape_cast %64 : vector<8x1xf32> to vector<8x1xf32>
    %66 = vector.broadcast %65 : vector<8x1xf32> to vector<8x128xf32>
    %67 = arith.select %17, %66, %60 : vector<8x128xi1>, vector<8x128xf32>
    %68 = arith.divf %45, %67 : vector<8x128xf32>
    %c0_20 = arith.constant 0 : index
    %c0_21 = arith.constant 0 : index
    %69 = vector.load %arg10[%c0_20, %c0_21] : memref<8x128xf32, #tpu.memory_space<vmem>>, vector<8x128xf32>
    tpu.vector_store %arg10[%c0_20, %c0_21], %68 {strides = array<i32>} : memref<8x128xf32, #tpu.memory_space<vmem>>, vector<8x128xf32>,
    %70 = arith.addf %0, %1 : vector<8x128xf32>
    %cst_22 = arith.constant 1.000000e+00 : f32
    %71 = vector.broadcast %cst_22 : f32 to vector<8x128xf32>
    %72 = arith.mulf %70, %71 : vector<8x128xf32>
    %cst_23 = arith.constant 0.000000e+00 : f32
    %73 = vector.broadcast %cst_23 : f32 to vector<8x128xf32>
    %cst_24 = arith.constant 0xFF800000 : f32
    %74 = vector.broadcast %cst_24 : f32 to vector<8x128xf32>
    %75 = arith.select %7, %72, %74 : vector<8x128xi1>, vector<8x128xf32>
    %cst_25 = arith.constant dense<0xFF800000> : vector<8xf32>
    %76 = vector.multi_reduction <maximumf>, %75, %cst_25 [1] : vector<8x128xf32> to vector<8xf32>
    %77 = vector.shape_cast %76 : vector<8xf32> to vector<8x1xf32>
    %78 = vector.shape_cast %77 : vector<8x1xf32> to vector<8x1xf32>
    %79 = vector.broadcast %78 : vector<8x1xf32> to vector<8x128xf32>
    %80 = arith.select %7, %79, %73 : vector<8x128xi1>, vector<8x128xf32>
    %cst_26 = arith.constant 0xFF800000 : f32
    %81 = vector.broadcast %cst_26 : f32 to vector<8x128xf32>
    %82 = arith.select %12, %72, %81 : vector<8x128xi1>, vector<8x128xf32>
    %cst_27 = arith.constant dense<0xFF800000> : vector<8xf32>
    %83 = vector.multi_reduction <maximumf>, %82, %cst_27 [1] : vector<8x128xf32> to vector<8xf32>
    %84 = vector.shape_cast %83 : vector<8xf32> to vector<8x1xf32>
    %85 = vector.shape_cast %84 : vector<8x1xf32> to vector<8x1xf32>
    %86 = vector.broadcast %85 : vector<8x1xf32> to vector<8x128xf32>
    %87 = arith.select %12, %86, %80 : vector<8x128xi1>, vector<8x128xf32>
    %cst_28 = arith.constant 0xFF800000 : f32
    %88 = vector.broadcast %cst_28 : f32 to vector<8x128xf32>
    %89 = arith.select %17, %72, %88 : vector<8x128xi1>, vector<8x128xf32>
    %cst_29 = arith.constant dense<0xFF800000> : vector<8xf32>
    %90 = vector.multi_reduction <maximumf>, %89, %cst_29 [1] : vector<8x128xf32> to vector<8xf32>
    %91 = vector.shape_cast %90 : vector<8xf32> to vector<8x1xf32>
    %92 = vector.shape_cast %91 : vector<8x1xf32> to vector<8x1xf32>
    %93 = vector.broadcast %92 : vector<8x1xf32> to vector<8x128xf32>
    %94 = arith.select %17, %93, %87 : vector<8x128xi1>, vector<8x128xf32>
    %95 = arith.subf %72, %94 : vector<8x128xf32>
    %96 = math.exp %95 : vector<8x128xf32>
    %cst_30 = arith.constant 0.000000e+00 : f32
    %97 = vector.broadcast %cst_30 : f32 to vector<8x128xf32>
    %98 = arith.select %19, %96, %97 : vector<8x128xi1>, vector<8x128xf32>
    %cst_31 = arith.constant 1.000000e+00 : f32
    %99 = vector.broadcast %cst_31 : f32 to vector<8x128xf32>
    %cst_32 = arith.constant 0.000000e+00 : f32
    %100 = vector.broadcast %cst_32 : f32 to vector<8x128xf32>
    %101 = arith.select %7, %98, %100 : vector<8x128xi1>, vector<8x128xf32>
    %cst_33 = arith.constant dense<0.000000e+00> : vector<8xf32>
    %102 = vector.multi_reduction <add>, %101, %cst_33 [1] : vector<8x128xf32> to vector<8xf32>
    %103 = vector.shape_cast %102 : vector<8xf32> to vector<8x1xf32>
    %104 = vector.shape_cast %103 : vector<8x1xf32> to vector<8x1xf32>
    %105 = vector.broadcast %104 : vector<8x1xf32> to vector<8x128xf32>
    %106 = arith.select %7, %105, %99 : vector<8x128xi1>, vector<8x128xf32>
    %cst_34 = arith.constant 0.000000e+00 : f32
    %107 = vector.broadcast %cst_34 : f32 to vector<8x128xf32>
    %108 = arith.select %12, %98, %107 : vector<8x128xi1>, vector<8x128xf32>
    %cst_35 = arith.constant dense<0.000000e+00> : vector<8xf32>
    %109 = vector.multi_reduction <add>, %108, %cst_35 [1] : vector<8x128xf32> to vector<8xf32>
    %110 = vector.shape_cast %109 : vector<8xf32> to vector<8x1xf32>
    %111 = vector.shape_cast %110 : vector<8x1xf32> to vector<8x1xf32>
    %112 = vector.broadcast %111 : vector<8x1xf32> to vector<8x128xf32>
    %113 = arith.select %12, %112, %106 : vector<8x128xi1>, vector<8x128xf32>
    %cst_36 = arith.constant 0.000000e+00 : f32
    %114 = vector.broadcast %cst_36 : f32 to vector<8x128xf32>
    %115 = arith.select %17, %98, %114 : vector<8x128xi1>, vector<8x128xf32>
    %cst_37 = arith.constant dense<0.000000e+00> : vector<8xf32>
    %116 = vector.multi_reduction <add>, %115, %cst_37 [1] : vector<8x128xf32> to vector<8xf32>
    %117 = vector.shape_cast %116 : vector<8xf32> to vector<8x1xf32>
    %118 = vector.shape_cast %117 : vector<8x1xf32> to vector<8x1xf32>
    %119 = vector.broadcast %118 : vector<8x1xf32> to vector<8x128xf32>
    %120 = arith.select %17, %119, %113 : vector<8x128xi1>, vector<8x128xf32>
    %121 = arith.divf %98, %120 : vector<8x128xf32>
    %122 = arith.truncf %121 : vector<8x128xf32> to vector<8x128xbf16>
    %c0_38 = arith.constant 0 : index
    %c0_39 = arith.constant 0 : index
    %123 = vector.load %arg3[%c0_38, %c0_39] : memref<128x256xbf16, #tpu.memory_space<vmem>>, vector<128x256xbf16>
    %cst_40 = arith.constant dense<0.000000e+00> : vector<8x256xf32>
    %124 = tpu.matmul %122, %123, %cst_40 {dimension_numbers = #tpu.dot_dimension_numbers<[1], [0], [0], [1], [0, 0, 1, 1], [], []>} : vector<8x128xbf16>, vector<128x256xbf16>, vector<8x256xf32> -> vector<8x256xf32>
    %c0_41 = arith.constant 0 : index
    %c0_42 = arith.constant 0 : index
    %125 = vector.load %arg4[%c0_41, %c0_42] : memref<1x256xf32, #tpu.memory_space<vmem>>, vector<1x256xf32>
    %126 = vector.broadcast %125 : vector<1x256xf32> to vector<8x256xf32>
    %127 = arith.addf %124, %126 : vector<8x256xf32>
    %cst_43 = arith.constant 0.000000e+00 : f32
    %128 = vector.broadcast %cst_43 : f32 to vector<8x256xf32>
    %129 = arith.maximumf %127, %128 : vector<8x256xf32>
    %130 = arith.truncf %129 : vector<8x256xf32> to vector<8x256xbf16>
    %c0_44 = arith.constant 0 : index
    %c0_45 = arith.constant 0 : index
    %131 = vector.load %arg5[%c0_44, %c0_45] : memref<256x512xbf16, #tpu.memory_space<vmem>>, vector<256x512xbf16>
    %cst_46 = arith.constant dense<0.000000e+00> : vector<8x512xf32>
    %132 = tpu.matmul %130, %131, %cst_46 {dimension_numbers = #tpu.dot_dimension_numbers<[1], [0], [0], [1], [0, 0, 1, 1], [], []>} : vector<8x256xbf16>, vector<256x512xbf16>, vector<8x512xf32> -> vector<8x512xf32>
    %c0_47 = arith.constant 0 : index
    %c0_48 = arith.constant 0 : index
    %133 = vector.load %arg6[%c0_47, %c0_48] : memref<1x512xf32, #tpu.memory_space<vmem>>, vector<1x512xf32>
    %134 = vector.broadcast %133 : vector<1x512xf32> to vector<8x512xf32>
    %135 = arith.addf %132, %134 : vector<8x512xf32>
    %cst_49 = arith.constant 0.000000e+00 : f32
    %136 = vector.broadcast %cst_49 : f32 to vector<8x512xf32>
    %137 = arith.maximumf %135, %136 : vector<8x512xf32>
    %138 = arith.truncf %137 : vector<8x512xf32> to vector<8x512xbf16>
    %c0_50 = arith.constant 0 : index
    %c0_51 = arith.constant 0 : index
    %139 = vector.load %arg7[%c0_50, %c0_51] : memref<512x2352xbf16, #tpu.memory_space<vmem>>, vector<512x2352xbf16>
    %cst_52 = arith.constant dense<0.000000e+00> : vector<8x2352xf32>
    %140 = tpu.matmul %138, %139, %cst_52 {dimension_numbers = #tpu.dot_dimension_numbers<[1], [0], [0], [1], [0, 0, 1, 1], [], []>} : vector<8x512xbf16>, vector<512x2352xbf16>, vector<8x2352xf32> -> vector<8x2352xf32>
    %c0_53 = arith.constant 0 : index
    %c0_54 = arith.constant 0 : index
    %141 = vector.load %arg8[%c0_53, %c0_54] : memref<1x2352xf32, #tpu.memory_space<vmem>>, vector<1x2352xf32>
    %142 = vector.broadcast %141 : vector<1x2352xf32> to vector<8x2352xf32>
    %143 = arith.addf %140, %142 : vector<8x2352xf32>
    %144 = arith.truncf %143 : vector<8x2352xf32> to vector<8x2352xbf16>
    %145 = arith.negf %144 : vector<8x2352xbf16>
    %146 = math.exp %145 : vector<8x2352xbf16>
    %cst_55 = arith.constant 1.000000e+00 : bf16
    %147 = vector.broadcast %cst_55 : bf16 to vector<8x2352xbf16>
    %148 = arith.addf %147, %146 : vector<8x2352xbf16>
    %149 = arith.divf %147, %148 : vector<8x2352xbf16>
    %c0_56 = arith.constant 0 : index
    %c0_57 = arith.constant 0 : index
    %150 = vector.load %arg9[%c0_56, %c0_57] : memref<8x2352xbf16, #tpu.memory_space<vmem>>, vector<8x2352xbf16>
    tpu.vector_store %arg9[%c0_56, %c0_57], %149 {strides = array<i32>} : memref<8x2352xbf16, #tpu.memory_space<vmem>>, vector<8x2352xbf16>,
    return
  }
  func.func @transform_0(%arg0: i32) -> (i32, i32) {
    %c0_i32 = arith.constant 0 : i32
    %c0_i32_0 = arith.constant 0 : i32
    return %arg0, %c0_i32 : i32, i32
  }
  func.func @transform_1(%arg0: i32) -> (i32, i32) {
    %c0_i32 = arith.constant 0 : i32
    %c0_i32_0 = arith.constant 0 : i32
    return %arg0, %c0_i32 : i32, i32
  }
  func.func @transform_2(%arg0: i32) -> (i32, i32) {
    %c0_i32 = arith.constant 0 : i32
    %c0_i32_0 = arith.constant 0 : i32
    %c0_i32_1 = arith.constant 0 : i32
    return %c0_i32, %c0_i32_0 : i32, i32
  }
  func.func @transform_3(%arg0: i32) -> (i32, i32) {
    %c0_i32 = arith.constant 0 : i32
    %c0_i32_0 = arith.constant 0 : i32
    %c0_i32_1 = arith.constant 0 : i32
    return %c0_i32, %c0_i32_0 : i32, i32
  }
  func.func @transform_4(%arg0: i32) -> (i32, i32) {
    %c0_i32 = arith.constant 0 : i32
    %c0_i32_0 = arith.constant 0 : i32
    %c0_i32_1 = arith.constant 0 : i32
    return %c0_i32, %c0_i32_0 : i32, i32
  }
  func.func @transform_5(%arg0: i32) -> (i32, i32) {
    %c0_i32 = arith.constant 0 : i32
    %c0_i32_0 = arith.constant 0 : i32
    %c0_i32_1 = arith.constant 0 : i32
    return %c0_i32, %c0_i32_0 : i32, i32
  }
  func.func @transform_6(%arg0: i32) -> (i32, i32) {
    %c0_i32 = arith.constant 0 : i32
    %c0_i32_0 = arith.constant 0 : i32
    %c0_i32_1 = arith.constant 0 : i32
    return %c0_i32, %c0_i32_0 : i32, i32
  }
  func.func @transform_7(%arg0: i32) -> (i32, i32) {
    %c0_i32 = arith.constant 0 : i32
    %c0_i32_0 = arith.constant 0 : i32
    %c0_i32_1 = arith.constant 0 : i32
    return %c0_i32, %c0_i32_0 : i32, i32
  }
  func.func @transform_8(%arg0: i32) -> (i32, i32) {
    %c0_i32 = arith.constant 0 : i32
    %c0_i32_0 = arith.constant 0 : i32
    return %arg0, %c0_i32 : i32, i32
  }
  func.func @transform_9(%arg0: i32) -> (i32, i32) {
    %c0_i32 = arith.constant 0 : i32
    %c0_i32_0 = arith.constant 0 : i32
    return %arg0, %c0_i32 : i32, i32
  }
}

</mosaic_0001>

<bundles_post_ra>
// kernel: tpu_custom_call.1
= control target key start
LH: loop header
LB: loop body
LE: loop exit
PB: predicated region body
PF: predicated region fallthrough
CT: control target
= control target key end

     0   :  { %15 = vsyncpa [#allocation3], 0  ;;  %v37_v2 = vlaneseq  ;;  %v7550_v36 = vmov 0   ;;  %s9906_s0 = inlined_call_operand.vmem [shape: f32[8,128], index: 0, kind: input, shape index: {}]   ;;  %s9907_s1 = inlined_call_operand.vmem [shape: f32[8,128], index: 1, kind: input, shape index: {}]   ;;  %s9908_s2 = inlined_call_operand.vmem [shape: bf16[128,256], index: 2, kind: input, shape index: {}]   ;;  %s9909_s3 = inlined_call_operand.vmem [shape: f32[1,256], index: 3, kind: input, shape index: {}]   ;;  %s9910_s4 = inlined_call_operand.vmem [shape: bf16[256,512], index: 4, kind: input, shape index: {}]   ;;  %s9911_s5 = inlined_call_operand.vmem [shape: f32[1,512], index: 5, kind: input, shape index: {}]   ;;  %s9912_s6 = inlined_call_operand.vmem [shape: bf16[512,2352], index: 6, kind: input, shape index: {}]   ;;  %s9913_s7 = inlined_call_operand.vmem [shape: f32[1,2352], index: 7, kind: input, shape index: {}]   ;;  %s9914_s8 = inlined_call_operand.hbm [shape: bf16[8,2352], index: 8, kind: output, shape index: {0}]   ;;  %s9915_s9 = inlined_call_operand.hbm [shape: f32[8,128], index: 9, kind: output, shape index: {1}]  }
   0x1   :  { %v35_v0 = vld [vmem:[%s9906_s0] sm:$0xff]  ;;  %v6404_v10 = vld [vmem:[%s9908_s2 + $0x74] ss:$8 sps:$4 sm:$0xff]   ;;  %v6406_v11 = vld [vmem:[%s9908_s2 + $0x70] ss:$8 sps:$4 sm:$0xff]   ;;  %251 = vmatprep.mubr.bf16.mxu0 %v7550_v36 }
   0x2   :  { %v36_v1 = vld [vmem:[%s9907_s1] sm:$0xff]  ;;  %v7610_v4 = vand.u32 127, %v37_v2  ;;  %219 = vmatprep.subr.bf16.mxu0 %v6404_v10  ;;  %v6410_v14 = vld [vmem:[%s9908_s2 + $0x54] ss:$8 sps:$4 sm:$0xff]   ;;  %v6412_v28 = vld [vmem:[%s9908_s2 + $0x50] ss:$8 sps:$4 sm:$0xff]  }
   0x3   :  { %v79_v3 = vadd.f32 %v36_v1, %v35_v0  ;;  %v6407_v12 = vld [vmem:[%s9908_s2 + $0x64] ss:$8 sps:$4 sm:$0xff]   ;;  %v6409_v13 = vld [vmem:[%s9908_s2 + $0x60] ss:$8 sps:$4 sm:$0xff]   ;;  %220 = vmatpush1.bf16.msra.mxu0 %v6406_v11  ;;  %v6416_v31 = vld [vmem:[%s9908_s2 + $0x34] ss:$8 sps:$4 sm:$0xff]  }
   0x4   :  { %vm40_vm0 = vcmp.lt.s32.totalorder %v7610_v4, 20  ;;  %vm42_vm1 = vcmp.ge.s32.totalorder %v7610_v4, 20  ;;  %vm43_vm2 = vcmp.lt.s32.totalorder %v7610_v4, 40  ;;  %vm45_vm3 = vcmp.ge.s32.totalorder %v7610_v4, 40  ;;  %221 = vmatprep.subr.bf16.mxu0 %v6407_v12  ;;  %v6413_v29 = vld [vmem:[%s9908_s2 + $0x44] ss:$8 sps:$4 sm:$0xff]  }
   0x5   :  { %v80_v5 = vsel %vm40_vm0, %v79_v3, -inf  ;;  %vm7618_vm4 = vmand %vm42_vm1, %vm43_vm2  ;;  %vm46_vm5 = vcmp.lt.s32.totalorder %v7610_v4, 60  ;;  %v6415_v30 = vld [vmem:[%s9908_s2 + $0x40] ss:$8 sps:$4 sm:$0xff]   ;;  %v6418_v32 = vld [vmem:[%s9908_s2 + $0x30] ss:$8 sps:$4 sm:$0xff]  }
   0x6   :  { %81 = vmax.xlane.f32.xlu0 %v80_v5  ;;  %vm7625_vm6 = vmand %vm45_vm3, %vm46_vm5  ;;  %v84_v8 = vsel %vm7618_vm4, %v79_v3, -inf  ;;  %v6419_v33 = vld [vmem:[%s9908_s2 + $0x24] ss:$8 sps:$4 sm:$0xff]   ;;  %v6421_v34 = vld [vmem:[%s9908_s2 + $0x20] ss:$8 sps:$4 sm:$0xff]  }
   0x7   :  { %v88_v9 = vsel %vm7625_vm6, %v79_v3, -inf  ;;  %222 = vmatpush1.bf16.msra.mxu0 %v6409_v13  ;;  %v6422_v35 = vld [vmem:[%s9908_s2 + $0x14] ss:$8 sps:$4 sm:$0xff]   ;;  %v6424_v37 = vld [vmem:[%s9908_s2 + $0x10] ss:$8 sps:$4 sm:$0xff]  }
   0x8   :  { %89 = vmax.xlane.f32.xlu1 %v88_v9  ;;  %223 = vmatprep.subr.bf16.mxu0 %v6410_v14  ;;  %v6425_v38 = vld [vmem:[%s9908_s2 + $0x4] ss:$8 sps:$4 sm:$0xff]   ;;  %v6427_v39 = vld [vmem:[%s9908_s2] ss:$8 sps:$4 sm:$0xff]  }
   0x9   :  { %v6428_v40 = vld [vmem:[%s9910_s4 + $0xe4] ss:$16 sps:$4 sm:$0xff]   ;;  %v6432_v41 = vld [vmem:[%s9910_s4 + $0xec] ss:$16 sps:$4 sm:$0xff]   ;;  %v6433_v42 = vld [vmem:[%s9910_s4 + $0xe0] ss:$16 sps:$4 sm:$0xff]  }
   0xa   :  { %85 = vmax.xlane.f32.xlu0 %v84_v8  ;;  %v6434_v43 = vld [vmem:[%s9910_s4 + $0xc4] ss:$16 sps:$4 sm:$0xff]   ;;  %670 = vmatprep.subr.bf16.mxu1 %v6428_v40  ;;  %v6439_v44 = vld [vmem:[%s9910_s4 + $0xc0] ss:$16 sps:$4 sm:$0xff]  }
   0xb   :  { %224 = vmatpush1.bf16.msra.mxu0 %v6412_v28  ;;  %671 = vmatpush1.bf16.msra.mxu1 %v6433_v42  ;;  %v6440_v45 = vld [vmem:[%s9910_s4 + $0xa4] ss:$16 sps:$4 sm:$0xff]   ;;  %v6445_v46 = vld [vmem:[%s9910_s4 + $0xa0] ss:$16 sps:$4 sm:$0xff]  }
   0xc   :  { %225 = vmatprep.subr.bf16.mxu0 %v6413_v29  ;;  %672 = vmatprep.subr.bf16.mxu1 %v6434_v43  ;;  %v6446_v47 = vld [vmem:[%s9910_s4 + $0x84] ss:$16 sps:$4 sm:$0xff]   ;;  %v6451_v48 = vld [vmem:[%s9910_s4 + $0x80] ss:$16 sps:$4 sm:$0xff]  }
   0xd   :  { %v6452_v49 = vld [vmem:[%s9910_s4 + $0x64] ss:$16 sps:$4 sm:$0xff]   ;;  %v6457_v50 = vld [vmem:[%s9910_s4 + $0x60] ss:$16 sps:$4 sm:$0xff]  }
   0xe   :  { %v6458_v51 = vld [vmem:[%s9910_s4 + $0x44] ss:$16 sps:$4 sm:$0xff]   ;;  %v6463_v52 = vld [vmem:[%s9910_s4 + $0x40] ss:$16 sps:$4 sm:$0xff]  }
   0xf   :  { %226 = vmatpush1.bf16.msra.mxu0 %v6415_v30  ;;  %673 = vmatpush1.bf16.msra.mxu1 %v6439_v44  ;;  %v6464_v53 = vld [vmem:[%s9910_s4 + $0x24] ss:$16 sps:$4 sm:$0xff]   ;;  %v6469_v54 = vld [vmem:[%s9910_s4 + $0x20] ss:$16 sps:$4 sm:$0xff]  }
  0x10   :  { %227 = vmatprep.subr.bf16.mxu0 %v6416_v31  ;;  %674 = vmatprep.subr.bf16.mxu1 %v6440_v45  ;;  %v6470_v55 = vld [vmem:[%s9910_s4 + $0x4] ss:$16 sps:$4 sm:$0xff]   ;;  %v6475_v56 = vld [vmem:[%s9910_s4] ss:$16 sps:$4 sm:$0xff]  }
  0x11   :  { %v6476_v57 = vld [vmem:[%s9910_s4 + $0x1e4] ss:$16 sps:$4 sm:$0xff]   ;;  %v6481_v58 = vld [vmem:[%s9910_s4 + $0x1e0] ss:$16 sps:$4 sm:$0xff]  }
  0x12   :  { %v6482_v59 = vld [vmem:[%s9910_s4 + $0x1c4] ss:$16 sps:$4 sm:$0xff]   ;;  %v6487_v60 = vld [vmem:[%s9910_s4 + $0x1c0] ss:$16 sps:$4 sm:$0xff]  }
  0x13   :  { %228 = vmatpush1.bf16.msra.mxu0 %v6418_v32  ;;  %675 = vmatpush1.bf16.msra.mxu1 %v6445_v46  ;;  %v6488_v61 = vld [vmem:[%s9910_s4 + $0x1a4] ss:$16 sps:$4 sm:$0xff]   ;;  %v6493_v62 = vld [vmem:[%s9910_s4 + $0x1a0] ss:$16 sps:$4 sm:$0xff]  }
  0x14   :  { %229 = vmatprep.subr.bf16.mxu0 %v6419_v33  ;;  %676 = vmatprep.subr.bf16.mxu1 %v6446_v47  ;;  %v6494_v63 = vld [vmem:[%s9910_s4 + $0x184] ss:$16 sps:$4 sm:$0xff]   ;;  %v6499_v0 = vld [vmem:[%s9910_s4 + $0x180] ss:$16 sps:$4 sm:$0xff]  }
  0x15   :  { %v6500_v1 = vld [vmem:[%s9910_s4 + $0x164] ss:$16 sps:$4 sm:$0xff]   ;;  %v6511_v8 = vld [vmem:[%s9910_s4 + $0x140] ss:$16 sps:$4 sm:$0xff]  }
  0x16   :  { %v6506_v5 = vld [vmem:[%s9910_s4 + $0x144] ss:$16 sps:$4 sm:$0xff]  }
  0x17   :  { %230 = vmatpush1.bf16.msra.mxu0 %v6421_v34  ;;  %677 = vmatpush1.bf16.msra.mxu1 %v6451_v48 }
  0x18   :  { %231 = vmatprep.subr.bf16.mxu0 %v6422_v35  ;;  %678 = vmatprep.subr.bf16.mxu1 %v6452_v49 }
  0x1b   :  { %232 = vmatpush1.bf16.msra.mxu0 %v6424_v37  ;;  %679 = vmatpush1.bf16.msra.mxu1 %v6457_v50 }
  0x1c   :  { %233 = vmatprep.subr.bf16.mxu0 %v6425_v38  ;;  %680 = vmatprep.subr.bf16.mxu1 %v6458_v51 }
  0x1f   :  { %234 = vmatpush1.bf16.msra.mxu0 %v6427_v39  ;;  %681 = vmatpush1.bf16.msra.mxu1 %v6463_v52 }
  0x20   :  { %711 = vmatprep.subr.bf16.mxu0 %v6432_v41  ;;  %682 = vmatprep.subr.bf16.mxu1 %v6464_v53 }
  0x23   :  { %683 = vmatpush1.bf16.msra.mxu1 %v6469_v54 }
  0x24   :  { %684 = vmatprep.subr.bf16.mxu1 %v6470_v55 }
  0x27   :  { %685 = vmatpush1.bf16.msra.mxu1 %v6475_v56 }
  0x28   :  { %686 = vmatprep.subr.bf16.mxu1 %v6476_v57 }
  0x2b   :  { %687 = vmatpush2.bf16.msra.mxu1 %v6481_v58 }
  0x2c   :  { %688 = vmatprep.subr.bf16.mxu1 %v6482_v59 }
  0x2f   :  { %689 = vmatpush2.bf16.msra.mxu1 %v6487_v60 }
  0x30   :  { %690 = vmatprep.subr.bf16.mxu1 %v6488_v61 }
  0x33   :  { %691 = vmatpush2.bf16.msra.mxu1 %v6493_v62 }
  0x34   :  { %692 = vmatprep.subr.bf16.mxu1 %v6494_v63 }
  0x37   :  { %693 = vmatpush2.bf16.msra.mxu1 %v6499_v0 }
  0x38   :  { %694 = vmatprep.subr.bf16.mxu1 %v6500_v1 }
  0x8f   :  { %v82_v15 = vpop.xlane.xlu0 %81 }
  0x90   :  { %v83_v17 = vsel %vm40_vm0, %v82_v15, 0.0 }
  0x91   :  { %v90_v16 = vpop.xlane.xlu1 %89 }
  0x93   :  { %v86_v18 = vpop.xlane.xlu0 %85 }
  0x94   :  { %v87_v19 = vsel %vm7618_vm4, %v86_v18, %v83_v17 }
  0x95   :  { %v91_v20 = vsel %vm7625_vm6, %v90_v16, %v87_v19 }
  0x96   :  { %v92_v21 = vsub.f32 %v79_v3, %v91_v20  ;;  %v6505_v3 = vld [vmem:[%s9910_s4 + $0x160] ss:$16 sps:$4 sm:$0xff]  }
  0x97   :  { %695 = vmatpush2.bf16.msra.mxu1 %v6505_v3 }
  0x98   :  { %v93_v22 = vmul.f32 1.442695, %v92_v21  ;;  %696 = vmatprep.subr.bf16.mxu1 %v6506_v5 }
  0x9a   :  { %7420 = vpow2.f32 %v93_v22 }
  0x9b   :  { %697 = vmatpush2.bf16.msra.mxu1 %v6511_v8 }
  0xa7   :  { %v7421_v23 = vpop.eup %7420 }
  0xa8   :  { %v7656_v24 = vsel %vm46_vm5, %v7421_v23, 0.0 }
  0xa9   :  { %v100_v25 = vsel %vm7618_vm4, %v7656_v24, 0.0  ;;  %v96_v26 = vsel %vm40_vm0, %v7656_v24, 0.0  ;;  %v104_v27 = vsel %vm7625_vm6, %v7656_v24, 0.0 }
  0xaa   :  { %101 = vadd.xlane.f32.xlu0 %v100_v25  ;;  %97 = vadd.xlane.f32.xlu1 %v96_v26 }
  0xae   :  { %105 = vadd.xlane.f32.xlu1 %v104_v27 }
  0xaf   :  { %16 = vsyncpa [#allocation5], 0  ;;  %v6430_v17 = vld [vmem:[%s9910_s4 + $0xe8] ss:$16 sps:$4 sm:$0xff]   ;;  %v6438_v19 = vld [vmem:[%s9910_s4 + $0xcc] ss:$16 sps:$4 sm:$0xff]  }
  0xb0   :  { %v6436_v20 = vld [vmem:[%s9910_s4 + $0xc8] ss:$16 sps:$4 sm:$0xff]   ;;  %v6444_v21 = vld [vmem:[%s9910_s4 + $0xac] ss:$16 sps:$4 sm:$0xff]   ;;  %v6512_v45 = vld [vmem:[%s9910_s4 + $0x124] ss:$16 sps:$4 sm:$0xff]  }
  0xb1   :  { %v6442_v22 = vld [vmem:[%s9910_s4 + $0xa8] ss:$16 sps:$4 sm:$0xff]   ;;  %v6450_v23 = vld [vmem:[%s9910_s4 + $0x8c] ss:$16 sps:$4 sm:$0xff]   ;;  %v6517_v48 = vld [vmem:[%s9910_s4 + $0x120] ss:$16 sps:$4 sm:$0xff]   ;;  %698 = vmatprep.subr.bf16.mxu1 %v6512_v45 }
  0xb2   :  { %v6456_v25 = vld [vmem:[%s9910_s4 + $0x6c] ss:$16 sps:$4 sm:$0xff]   ;;  %v6454_v26 = vld [vmem:[%s9910_s4 + $0x68] ss:$16 sps:$4 sm:$0xff]   ;;  %699 = vmatpush2.bf16.msra.mxu1 %v6517_v48  ;;  %v6518_v49 = vld [vmem:[%s9910_s4 + $0x104] ss:$16 sps:$4 sm:$0xff]  }
  0xb3   :  { %v6462_v27 = vld [vmem:[%s9910_s4 + $0x4c] ss:$16 sps:$4 sm:$0xff]   ;;  %v6460_v28 = vld [vmem:[%s9910_s4 + $0x48] ss:$16 sps:$4 sm:$0xff]   ;;  %v6523_v52 = vld [vmem:[%s9910_s4 + $0x100] ss:$16 sps:$4 sm:$0xff]   ;;  %700 = vmatprep.subr.bf16.mxu1 %v6518_v49 }
  0xb4   :  { %v6468_v29 = vld [vmem:[%s9910_s4 + $0x2c] ss:$16 sps:$4 sm:$0xff]   ;;  %v6466_v30 = vld [vmem:[%s9910_s4 + $0x28] ss:$16 sps:$4 sm:$0xff]   ;;  %v7906_v55 = vshrl.u32 %v37_v2, 7 }
  0xb5   :  { %v6474_v31 = vld [vmem:[%s9910_s4 + $0xc] ss:$16 sps:$4 sm:$0xff]   ;;  %v6472_v32 = vld [vmem:[%s9910_s4 + $0x8] ss:$16 sps:$4 sm:$0xff]   ;;  %v127_v57 = vld [vmem:[%s9909_s3] sm:$0x3] }
  0xb6   :  { %v6480_v33 = vld [vmem:[%s9910_s4 + $0x1ec] ss:$16 sps:$4 sm:$0xff]   ;;  %v6478_v34 = vld [vmem:[%s9910_s4 + $0x1e8] ss:$16 sps:$4 sm:$0xff]   ;;  %701 = vmatpush2.bf16.msra.mxu1 %v6523_v52  ;;  %v7909_v56 = vsub.s32 0, %v7906_v55  ;;  %v7915_v58 = vsub.s32 1, %v7906_v55 }
  0xb7   :  { %v6486_v35 = vld [vmem:[%s9910_s4 + $0x1cc] ss:$16 sps:$4 sm:$0xff]   ;;  %v6484_v36 = vld [vmem:[%s9910_s4 + $0x1c8] ss:$16 sps:$4 sm:$0xff]   ;;  %v6583_v45 = vld [vmem:[%s9912_s6 + $0x11d4] ss:$76 sps:$4 sm:$0xff]  }
  0xb8   :  { %v6492_v37 = vld [vmem:[%s9910_s4 + $0x1ac] ss:$16 sps:$4 sm:$0xff]   ;;  %v6490_v38 = vld [vmem:[%s9910_s4 + $0x1a8] ss:$16 sps:$4 sm:$0xff]   ;;  %v132_v59 = vrot.slane %v127_v57, %v7909_v56  ;;  %v136_v60 = vrot.slane %v127_v57, %v7915_v58  ;;  %v6592_v52 = vld [vmem:[%s9912_s6 + $0x724] ss:$76 sps:$4 sm:$0xff]  }
  0xb9   :  { %v6498_v39 = vld [vmem:[%s9910_s4 + $0x18c] ss:$16 sps:$4 sm:$0xff]   ;;  %v6496_v40 = vld [vmem:[%s9910_s4 + $0x188] ss:$16 sps:$4 sm:$0xff]   ;;  %v7360_v7 = vld [vmem:[%s9912_s6 + $0x764] ss:$76 sps:$4 sm:$0xff]  }
  0xba   :  { %v6504_v41 = vld [vmem:[%s9910_s4 + $0x16c] ss:$16 sps:$4 sm:$0xff]   ;;  %v6502_v42 = vld [vmem:[%s9910_s4 + $0x168] ss:$16 sps:$4 sm:$0xff]  }
  0xbb   :  { %v6510_v43 = vld [vmem:[%s9910_s4 + $0x14c] ss:$16 sps:$4 sm:$0xff]   ;;  %v6508_v44 = vld [vmem:[%s9910_s4 + $0x148] ss:$16 sps:$4 sm:$0xff]  }
  0xbc   :  { %v6516_v46 = vld [vmem:[%s9910_s4 + $0x12c] ss:$16 sps:$4 sm:$0xff]   ;;  %v6514_v47 = vld [vmem:[%s9910_s4 + $0x128] ss:$16 sps:$4 sm:$0xff]  }
  0xbd   :  { %v6522_v50 = vld [vmem:[%s9910_s4 + $0x10c] ss:$16 sps:$4 sm:$0xff]   ;;  %v6520_v51 = vld [vmem:[%s9910_s4 + $0x108] ss:$16 sps:$4 sm:$0xff]  }
  0xbe   :  { %v6526_v53 = vld [vmem:[%s9912_s6 + $0x42c] ss:$76 sps:$4 sm:$0xff]   ;;  %v6586_v48 = vld [vmem:[%s9912_s6 + $0x7bc] ss:$76 sps:$4 sm:$0xff]  }
  0xbf   :  { %v6529_v54 = vld [vmem:[%s9912_s6 + $0xdac] ss:$76 sps:$4 sm:$0xff]   ;;  %4573 = vmatprep.subr.bf16.mxu1 %v6526_v53  ;;  %v6589_v49 = vld [vmem:[%s9912_s6 + $0x113c] ss:$76 sps:$4 sm:$0xff]   ;;  %v6595_v53 = vld [vmem:[%s9912_s6 + $0x10a4] ss:$76 sps:$4 sm:$0xff]  }
  0xc0   :  { %v6593_v57 = vld [vmem:[%s9912_s6 + $0x10a0] ss:$76 sps:$4 sm:$0xff]   ;;  %v7354_v4 = vld [vmem:[%s9912_s6 + $0x7fc] ss:$76 sps:$4 sm:$0xff]  }
  0xc1   :  { %v7357_v6 = vld [vmem:[%s9912_s6 + $0x117c] ss:$76 sps:$4 sm:$0xff]  }
 0x133   :  { %v98_v9 = vpop.xlane.xlu1 %97  ;;  %v102_v10 = vpop.xlane.xlu0 %101 }
 0x134   :  { %v99_v11 = vsel %vm40_vm0, %v98_v9, 1.0  ;;  %v6524_v9 = vld [vmem:[%s9912_s6 + $0x428] ss:$76 sps:$4 sm:$0xff]  }
 0x135   :  { %v103_v12 = vsel %vm7618_vm4, %v102_v10, %v99_v11  ;;  %v6527_v10 = vld [vmem:[%s9912_s6 + $0xda8] ss:$76 sps:$4 sm:$0xff]  }
 0x137   :  { %v106_v13 = vpop.xlane.xlu1 %105 }
 0x138   :  { %v107_v14 = vsel %vm7625_vm6, %v106_v13, %v103_v12  ;;  %v6532_v12 = vld [vmem:[%s9912_s6 + $0x394] ss:$76 sps:$4 sm:$0xff]  }
 0x139   :  { %7422 = vrcp.f32 %v107_v14  ;;  %v6535_v13 = vld [vmem:[%s9912_s6 + $0xd14] ss:$76 sps:$4 sm:$0xff]   ;;  %v6530_v14 = vld [vmem:[%s9912_s6 + $0x390] ss:$76 sps:$4 sm:$0xff]  }
 0x146   :  { %v7423_v15 = vpop.eup %7422 }
 0x147   :  { %v109_v16 = vmul.f32 %v7423_v15, %v7656_v24  ;;  %v6448_v24 = vld [vmem:[%s9910_s4 + $0x88] ss:$16 sps:$4 sm:$0xff]   ;;  %v6533_v15 = vld [vmem:[%s9912_s6 + $0xd10] ss:$76 sps:$4 sm:$0xff]  }
 0x149   :  { %v110_v18 = vpack.c.bf16 %v109_v16, %v109_v16  ;;  %v6538_v16 = vld [vmem:[%s9912_s6 + $0x2fc] ss:$76 sps:$4 sm:$0xff]  }
 0x14b   :  { %252 = vmatmul.mubr.bf16.vlgmr.msra.gmra.mxu0 %v110_v18  ;;  %v6536_v18 = vld [vmem:[%s9912_s6 + $0x2f8] ss:$76 sps:$4 sm:$0xff]  }
 0x14c   :  { %712 = vmatpush1.bf16.msra.mxu0 %v6430_v17  ;;  %v6541_v17 = vld [vmem:[%s9912_s6 + $0xc7c] ss:$76 sps:$4 sm:$0xff]  }
 0x14d   :  { %713 = vmatprep.subr.bf16.mxu0 %v6438_v19  ;;  %v6539_v19 = vld [vmem:[%s9912_s6 + $0xc78] ss:$76 sps:$4 sm:$0xff]  }
 0x150   :  { %714 = vmatpush1.bf16.msra.mxu0 %v6436_v20  ;;  %v6544_v20 = vld [vmem:[%s9912_s6 + $0x264] ss:$76 sps:$4 sm:$0xff]  }
 0x151   :  { %715 = vmatprep.subr.bf16.mxu0 %v6444_v21  ;;  %v6547_v21 = vld [vmem:[%s9912_s6 + $0xbe4] ss:$76 sps:$4 sm:$0xff]  }
 0x154   :  { %716 = vmatpush1.bf16.msra.mxu0 %v6442_v22  ;;  %v6542_v22 = vld [vmem:[%s9912_s6 + $0x260] ss:$76 sps:$4 sm:$0xff]  }
 0x155   :  { %717 = vmatprep.subr.bf16.mxu0 %v6450_v23  ;;  %v6545_v23 = vld [vmem:[%s9912_s6 + $0xbe0] ss:$76 sps:$4 sm:$0xff]  }
 0x158   :  { %718 = vmatpush1.bf16.msra.mxu0 %v6448_v24  ;;  %v6550_v24 = vld [vmem:[%s9912_s6 + $0x1cc] ss:$76 sps:$4 sm:$0xff]  }
 0x159   :  { %719 = vmatprep.subr.bf16.mxu0 %v6456_v25  ;;  %v6553_v25 = vld [vmem:[%s9912_s6 + $0xb4c] ss:$76 sps:$4 sm:$0xff]  }
 0x15c   :  { %720 = vmatpush1.bf16.msra.mxu0 %v6454_v26  ;;  %v6548_v26 = vld [vmem:[%s9912_s6 + $0x1c8] ss:$76 sps:$4 sm:$0xff]  }
 0x15d   :  { %721 = vmatprep.subr.bf16.mxu0 %v6462_v27  ;;  %v6551_v27 = vld [vmem:[%s9912_s6 + $0xb48] ss:$76 sps:$4 sm:$0xff]  }
 0x160   :  { %722 = vmatpush1.bf16.msra.mxu0 %v6460_v28  ;;  %v6556_v28 = vld [vmem:[%s9912_s6 + $0x134] ss:$76 sps:$4 sm:$0xff]  }
 0x161   :  { %723 = vmatprep.subr.bf16.mxu0 %v6468_v29  ;;  %v6559_v29 = vld [vmem:[%s9912_s6 + $0xab4] ss:$76 sps:$4 sm:$0xff]  }
 0x164   :  { %724 = vmatpush1.bf16.msra.mxu0 %v6466_v30  ;;  %v6554_v30 = vld [vmem:[%s9912_s6 + $0x130] ss:$76 sps:$4 sm:$0xff]  }
 0x165   :  { %725 = vmatprep.subr.bf16.mxu0 %v6474_v31  ;;  %v6557_v31 = vld [vmem:[%s9912_s6 + $0xab0] ss:$76 sps:$4 sm:$0xff]  }
 0x168   :  { %726 = vmatpush1.bf16.msra.mxu0 %v6472_v32  ;;  %v6562_v32 = vld [vmem:[%s9912_s6 + $0x9c] ss:$76 sps:$4 sm:$0xff]  }
 0x169   :  { %727 = vmatprep.subr.bf16.mxu0 %v6480_v33  ;;  %v6565_v33 = vld [vmem:[%s9912_s6 + $0xa1c] ss:$76 sps:$4 sm:$0xff]  }
 0x16c   :  { %728 = vmatpush2.bf16.msra.mxu0 %v6478_v34  ;;  %v6560_v34 = vld [vmem:[%s9912_s6 + $0x98] ss:$76 sps:$4 sm:$0xff]  }
 0x16d   :  { %729 = vmatprep.subr.bf16.mxu0 %v6486_v35  ;;  %v6563_v35 = vld [vmem:[%s9912_s6 + $0xa18] ss:$76 sps:$4 sm:$0xff]  }
 0x170   :  { %730 = vmatpush2.bf16.msra.mxu0 %v6484_v36  ;;  %v6568_v36 = vld [vmem:[%s9912_s6 + $0x4] ss:$76 sps:$4 sm:$0xff]  }
 0x171   :  { %731 = vmatprep.subr.bf16.mxu0 %v6492_v37  ;;  %v6571_v37 = vld [vmem:[%s9912_s6 + $0x984] ss:$76 sps:$4 sm:$0xff]  }
 0x174   :  { %732 = vmatpush2.bf16.msra.mxu0 %v6490_v38  ;;  %v6566_v38 = vld [vmem:[%s9912_s6] ss:$76 sps:$4 sm:$0xff]  }
 0x175   :  { %733 = vmatprep.subr.bf16.mxu0 %v6498_v39  ;;  %v6569_v39 = vld [vmem:[%s9912_s6 + $0x980] ss:$76 sps:$4 sm:$0xff]  }
 0x178   :  { %734 = vmatpush2.bf16.msra.mxu0 %v6496_v40  ;;  %v6574_v40 = vld [vmem:[%s9912_s6 + $0x8ec] ss:$76 sps:$4 sm:$0xff]  }
 0x179   :  { %735 = vmatprep.subr.bf16.mxu0 %v6504_v41  ;;  %v6577_v41 = vld [vmem:[%s9912_s6 + $0x126c] ss:$76 sps:$4 sm:$0xff]  }
 0x17c   :  { %736 = vmatpush2.bf16.msra.mxu0 %v6502_v42  ;;  %v6572_v42 = vld [vmem:[%s9912_s6 + $0x8e8] ss:$76 sps:$4 sm:$0xff]  }
 0x17d   :  { %737 = vmatprep.subr.bf16.mxu0 %v6510_v43  ;;  %v6575_v43 = vld [vmem:[%s9912_s6 + $0x1268] ss:$76 sps:$4 sm:$0xff]  }
 0x180   :  { %738 = vmatpush2.bf16.msra.mxu0 %v6508_v44  ;;  %v6580_v44 = vld [vmem:[%s9912_s6 + $0x854] ss:$76 sps:$4 sm:$0xff]  }
 0x181   :  { %739 = vmatprep.subr.bf16.mxu0 %v6516_v46  ;;  %v6578_v46 = vld [vmem:[%s9912_s6 + $0x850] ss:$76 sps:$4 sm:$0xff]  }
 0x184   :  { %740 = vmatpush2.bf16.msra.mxu0 %v6514_v47  ;;  %v6581_v47 = vld [vmem:[%s9912_s6 + $0x11d0] ss:$76 sps:$4 sm:$0xff]  }
 0x185   :  { %741 = vmatprep.subr.bf16.mxu0 %v6522_v50  ;;  %v6584_v50 = vld [vmem:[%s9912_s6 + $0x7b8] ss:$76 sps:$4 sm:$0xff]  }
 0x188   :  { %742 = vmatpush2.bf16.msra.mxu0 %v6520_v51  ;;  %v6587_v51 = vld [vmem:[%s9912_s6 + $0x1138] ss:$76 sps:$4 sm:$0xff]  }
 0x189   :  { %4614 = vmatprep.subr.bf16.mxu0 %v6529_v54  ;;  %v6590_v54 = vld [vmem:[%s9912_s6 + $0x720] ss:$76 sps:$4 sm:$0xff]  }
 0x20b   :  { %v253_v61 = vpop.f32.mrf.mxu0 }
 0x20c   :  { %v254_v62 = vadd.f32 %v253_v61, %v132_v59  ;;  %v6598_v59 = vld [vmem:[%s9912_s6 + $0x68c] ss:$76 sps:$4 sm:$0xff]   ;;  %v6596_v61 = vld [vmem:[%s9912_s6 + $0x688] ss:$76 sps:$4 sm:$0xff]  }
 0x20d   :  { %v255_v63 = vpop.f32.mrf.mxu0 }
 0x20e   :  { %v256_v0 = vadd.f32 %v255_v63, %v136_v60  ;;  %v260_v2 = vmax.f32 %v254_v62, 0.0  ;;  %v6601_v60 = vld [vmem:[%s9912_s6 + $0x100c] ss:$76 sps:$4 sm:$0xff]   ;;  %v6599_v62 = vld [vmem:[%s9912_s6 + $0x1008] ss:$76 sps:$4 sm:$0xff]  }
 0x20f   :  { %v257_v1 = vpop.f32.mrf.mxu0  ;;  %v6604_v63 = vld [vmem:[%s9912_s6 + $0x5f4] ss:$76 sps:$4 sm:$0xff]  }
 0x210   :  { %v261_v3 = vmax.f32 %v256_v0, 0.0  ;;  %v262_v11 = vpack.c.bf16 %v260_v2, %v260_v2  ;;  %v6607_v0 = vld [vmem:[%s9912_s6 + $0xf74] ss:$76 sps:$4 sm:$0xff]   ;;  %v6602_v2 = vld [vmem:[%s9912_s6 + $0x5f0] ss:$76 sps:$4 sm:$0xff]  }
 0x211   :  { %v258_v5 = vpop.f32.mrf.mxu0  ;;  %v6605_v1 = vld [vmem:[%s9912_s6 + $0xf70] ss:$76 sps:$4 sm:$0xff]  }
 0x212   :  { %v263_v8 = vpack.c.bf16 %v261_v3, %v261_v3  ;;  %v6610_v3 = vld [vmem:[%s9912_s6 + $0x55c] ss:$76 sps:$4 sm:$0xff]  }
 0x213   :  { %v6613_v5 = vld [vmem:[%s9912_s6 + $0xedc] ss:$76 sps:$4 sm:$0xff]  }
 0x214   :  { %702 = vmatprep.mubr.bf16.mxu1 %v263_v8  ;;  %743 = vmatprep.mubr.bf16.mxu0 %v263_v8  ;;  %v6608_v8 = vld [vmem:[%s9912_s6 + $0x558] ss:$76 sps:$4 sm:$0xff]  }
 0x215   :  { %703 = vmatmul.mubr.bf16.vlgmr.msra.gmra.mxu1 %v262_v11  ;;  %744 = vmatmul.mubr.bf16.vlgmr.msra.gmra.mxu0 %v262_v11  ;;  %v6619_v11 = vld [vmem:[%s9912_s6 + $0xe44] ss:$76 sps:$4 sm:$0xff]  }
 0x216   :  { %4574 = vmatpush1.bf16.msra.mxu1 %v6524_v9  ;;  %4615 = vmatpush1.bf16.msra.mxu0 %v6527_v10  ;;  %v6611_v9 = vld [vmem:[%s9912_s6 + $0xed8] ss:$76 sps:$4 sm:$0xff]  }
 0x217   :  { %4575 = vmatprep.subr.bf16.mxu1 %v6532_v12  ;;  %4616 = vmatprep.subr.bf16.mxu0 %v6535_v13  ;;  %v6616_v10 = vld [vmem:[%s9912_s6 + $0x4c4] ss:$76 sps:$4 sm:$0xff]   ;;  %v6614_v12 = vld [vmem:[%s9912_s6 + $0x4c0] ss:$76 sps:$4 sm:$0xff]  }
 0x218   :  { %v6617_v13 = vld [vmem:[%s9912_s6 + $0xe40] ss:$76 sps:$4 sm:$0xff]  }
 0x21a   :  { %4576 = vmatpush1.bf16.msra.mxu1 %v6530_v14  ;;  %4617 = vmatpush1.bf16.msra.mxu0 %v6533_v15  ;;  %v6622_v14 = vld [vmem:[%s9912_s6 + $0x434] ss:$76 sps:$4 sm:$0xff]  }
 0x21b   :  { %4577 = vmatprep.subr.bf16.mxu1 %v6538_v16  ;;  %4618 = vmatprep.subr.bf16.mxu0 %v6541_v17  ;;  %v6625_v15 = vld [vmem:[%s9912_s6 + $0xdb4] ss:$76 sps:$4 sm:$0xff]   ;;  %v8112_v16 = vsub.s32 2, %v7906_v55 }
 0x21c   :  { %v328_v17 = vld [vmem:[%s9911_s5] sm:$0xf] }
 0x21e   :  { %4578 = vmatpush1.bf16.msra.mxu1 %v6536_v18  ;;  %4619 = vmatpush1.bf16.msra.mxu0 %v6539_v19  ;;  %v8118_v18 = vsub.s32 3, %v7906_v55  ;;  %v333_v19 = vrot.slane %v328_v17, %v7909_v56 }
 0x21f   :  { %4579 = vmatprep.subr.bf16.mxu1 %v6544_v20  ;;  %4620 = vmatprep.subr.bf16.mxu0 %v6547_v21  ;;  %v341_v20 = vrot.slane %v328_v17, %v8112_v16  ;;  %v337_v21 = vrot.slane %v328_v17, %v7915_v58 }
 0x222   :  { %4580 = vmatpush1.bf16.msra.mxu1 %v6542_v22  ;;  %4621 = vmatpush1.bf16.msra.mxu0 %v6545_v23  ;;  %v345_v22 = vrot.slane %v328_v17, %v8118_v18  ;;  %v6673_v17 = vld [vmem:[%s9912_s6 + $0x1274] ss:$76 sps:$4 sm:$0xff]  }
 0x223   :  { %4581 = vmatprep.subr.bf16.mxu1 %v6550_v24  ;;  %4622 = vmatprep.subr.bf16.mxu0 %v6553_v25 }
 0x226   :  { %4582 = vmatpush1.bf16.msra.mxu1 %v6548_v26  ;;  %4623 = vmatpush1.bf16.msra.mxu0 %v6551_v27 }
 0x227   :  { %4583 = vmatprep.subr.bf16.mxu1 %v6556_v28  ;;  %4624 = vmatprep.subr.bf16.mxu0 %v6559_v29 }
 0x22a   :  { %4584 = vmatpush1.bf16.msra.mxu1 %v6554_v30  ;;  %4625 = vmatpush1.bf16.msra.mxu0 %v6557_v31 }
 0x22b   :  { %4585 = vmatprep.subr.bf16.mxu1 %v6562_v32  ;;  %4626 = vmatprep.subr.bf16.mxu0 %v6565_v33 }
 0x22e   :  { %4586 = vmatpush1.bf16.msra.mxu1 %v6560_v34  ;;  %4627 = vmatpush1.bf16.msra.mxu0 %v6563_v35 }
 0x22f   :  { %4587 = vmatprep.subr.bf16.mxu1 %v6568_v36  ;;  %4628 = vmatprep.subr.bf16.mxu0 %v6571_v37 }
 0x232   :  { %4588 = vmatpush1.bf16.msra.mxu1 %v6566_v38  ;;  %4629 = vmatpush1.bf16.msra.mxu0 %v6569_v39 }
 0x233   :  { %4589 = vmatprep.subr.bf16.mxu1 %v6574_v40  ;;  %4630 = vmatprep.subr.bf16.mxu0 %v6577_v41  ;;  %v6620_v41 = vld [vmem:[%s9912_s6 + $0x430] ss:$76 sps:$4 sm:$0xff]  }
 0x236   :  { %4590 = vmatpush2.bf16.msra.mxu1 %v6572_v42  ;;  %4631 = vmatpush2.bf16.msra.mxu0 %v6575_v43  ;;  %v6623_v42 = vld [vmem:[%s9912_s6 + $0xdb0] ss:$76 sps:$4 sm:$0xff]  }
 0x237   :  { %4591 = vmatprep.subr.bf16.mxu1 %v6580_v44  ;;  %4632 = vmatprep.subr.bf16.mxu0 %v6583_v45  ;;  %v6628_v45 = vld [vmem:[%s9912_s6 + $0x39c] ss:$76 sps:$4 sm:$0xff]  }
 0x23a   :  { %4592 = vmatpush2.bf16.msra.mxu1 %v6578_v46  ;;  %4633 = vmatpush2.bf16.msra.mxu0 %v6581_v47  ;;  %v6631_v46 = vld [vmem:[%s9912_s6 + $0xd1c] ss:$76 sps:$4 sm:$0xff]   ;;  %v6626_v47 = vld [vmem:[%s9912_s6 + $0x398] ss:$76 sps:$4 sm:$0xff]  }
 0x23b   :  { %4593 = vmatprep.subr.bf16.mxu1 %v6586_v48  ;;  %4634 = vmatprep.subr.bf16.mxu0 %v6589_v49  ;;  %v6629_v48 = vld [vmem:[%s9912_s6 + $0xd18] ss:$76 sps:$4 sm:$0xff]  }
 0x23c   :  { %v6634_v49 = vld [vmem:[%s9912_s6 + $0x304] ss:$76 sps:$4 sm:$0xff]  }
 0x23e   :  { %4594 = vmatpush2.bf16.msra.mxu1 %v6584_v50  ;;  %4635 = vmatpush2.bf16.msra.mxu0 %v6587_v51  ;;  %v6637_v50 = vld [vmem:[%s9912_s6 + $0xc84] ss:$76 sps:$4 sm:$0xff]   ;;  %v6632_v51 = vld [vmem:[%s9912_s6 + $0x300] ss:$76 sps:$4 sm:$0xff]  }
 0x23f   :  { %4595 = vmatprep.subr.bf16.mxu1 %v6592_v52  ;;  %4636 = vmatprep.subr.bf16.mxu0 %v6595_v53  ;;  %v6635_v52 = vld [vmem:[%s9912_s6 + $0xc80] ss:$76 sps:$4 sm:$0xff]  }
 0x240   :  { %v6640_v53 = vld [vmem:[%s9912_s6 + $0x26c] ss:$76 sps:$4 sm:$0xff]  }
 0x242   :  { %4596 = vmatpush2.bf16.msra.mxu1 %v6590_v54  ;;  %4637 = vmatpush2.bf16.msra.mxu0 %v6593_v57  ;;  %v6643_v54 = vld [vmem:[%s9912_s6 + $0xbec] ss:$76 sps:$4 sm:$0xff]   ;;  %v6638_v57 = vld [vmem:[%s9912_s6 + $0x268] ss:$76 sps:$4 sm:$0xff]  }
 0x243   :  { %4597 = vmatprep.subr.bf16.mxu1 %v6598_v59  ;;  %4638 = vmatprep.subr.bf16.mxu0 %v6601_v60  ;;  %v6641_v59 = vld [vmem:[%s9912_s6 + $0xbe8] ss:$76 sps:$4 sm:$0xff]  }
 0x244   :  { %v6646_v60 = vld [vmem:[%s9912_s6 + $0x1d4] ss:$76 sps:$4 sm:$0xff]  }
 0x246   :  { %4598 = vmatpush2.bf16.msra.mxu1 %v6596_v61  ;;  %4639 = vmatpush2.bf16.msra.mxu0 %v6599_v62  ;;  %v6649_v61 = vld [vmem:[%s9912_s6 + $0xb54] ss:$76 sps:$4 sm:$0xff]   ;;  %v6644_v62 = vld [vmem:[%s9912_s6 + $0x1d0] ss:$76 sps:$4 sm:$0xff]  }
 0x247   :  { %4599 = vmatprep.subr.bf16.mxu1 %v6604_v63  ;;  %4640 = vmatprep.subr.bf16.mxu0 %v6607_v0  ;;  %v6647_v63 = vld [vmem:[%s9912_s6 + $0xb50] ss:$76 sps:$4 sm:$0xff]  }
 0x248   :  { %v6652_v0 = vld [vmem:[%s9912_s6 + $0x13c] ss:$76 sps:$4 sm:$0xff]  }
 0x24a   :  { %4600 = vmatpush2.bf16.msra.mxu1 %v6602_v2  ;;  %4641 = vmatpush2.bf16.msra.mxu0 %v6605_v1  ;;  %v6655_v2 = vld [vmem:[%s9912_s6 + $0xabc] ss:$76 sps:$4 sm:$0xff]   ;;  %v6650_v1 = vld [vmem:[%s9912_s6 + $0x138] ss:$76 sps:$4 sm:$0xff]  }
 0x24b   :  { %4601 = vmatprep.subr.bf16.mxu1 %v6610_v3  ;;  %4642 = vmatprep.subr.bf16.mxu0 %v6613_v5  ;;  %v6653_v3 = vld [vmem:[%s9912_s6 + $0xab8] ss:$76 sps:$4 sm:$0xff]  }
 0x24c   :  { %v6658_v5 = vld [vmem:[%s9912_s6 + $0xa4] ss:$76 sps:$4 sm:$0xff]  }
 0x24e   :  { %4602 = vmatpush2.bf16.msra.mxu1 %v6608_v8  ;;  %4643 = vmatpush2.bf16.msra.mxu0 %v6611_v9  ;;  %v6661_v8 = vld [vmem:[%s9912_s6 + $0xa24] ss:$76 sps:$4 sm:$0xff]   ;;  %v6656_v9 = vld [vmem:[%s9912_s6 + $0xa0] ss:$76 sps:$4 sm:$0xff]  }
 0x24f   :  { %4603 = vmatprep.subr.bf16.mxu1 %v6616_v10  ;;  %4644 = vmatprep.subr.bf16.mxu0 %v6619_v11  ;;  %v6659_v10 = vld [vmem:[%s9912_s6 + $0xa20] ss:$76 sps:$4 sm:$0xff]  }
 0x250   :  { %v6664_v11 = vld [vmem:[%s9912_s6 + $0xc] ss:$76 sps:$4 sm:$0xff]  }
 0x252   :  { %4604 = vmatpush2.bf16.msra.mxu1 %v6614_v12  ;;  %4645 = vmatpush2.bf16.msra.mxu0 %v6617_v13  ;;  %v6667_v12 = vld [vmem:[%s9912_s6 + $0x98c] ss:$76 sps:$4 sm:$0xff]   ;;  %v6662_v13 = vld [vmem:[%s9912_s6 + $0x8] ss:$76 sps:$4 sm:$0xff]  }
 0x253   :  { %4655 = vmatprep.subr.bf16.mxu1 %v6622_v14  ;;  %4696 = vmatprep.subr.bf16.mxu0 %v6625_v15  ;;  %v6665_v14 = vld [vmem:[%s9912_s6 + $0x988] ss:$76 sps:$4 sm:$0xff]  }
 0x254   :  { %v6670_v15 = vld [vmem:[%s9912_s6 + $0x8f4] ss:$76 sps:$4 sm:$0xff]  }
 0x2d5   :  { %v704_v23 = vpop.f32.mrf.mxu1  ;;  %v745_v24 = vpop.f32.mrf.mxu0 }
 0x2d6   :  { %v705_v25 = vadd.f32 %v704_v23, %v333_v19  ;;  %v746_v26 = vadd.f32 %v745_v24, %v341_v20  ;;  %v6668_v19 = vld [vmem:[%s9912_s6 + $0x8f0] ss:$76 sps:$4 sm:$0xff]   ;;  %v6674_v23 = vld [vmem:[%s9912_s6 + $0x858] ss:$76 sps:$4 sm:$0xff]  }
 0x2d7   :  { %v706_v27 = vpop.f32.mrf.mxu1  ;;  %v747_v28 = vpop.f32.mrf.mxu0  ;;  %v6671_v20 = vld [vmem:[%s9912_s6 + $0x1270] ss:$76 sps:$4 sm:$0xff]   ;;  %v6677_v24 = vld [vmem:[%s9912_s6 + $0x11d8] ss:$76 sps:$4 sm:$0xff]  }
 0x2d8   :  { %v707_v29 = vadd.f32 %v706_v27, %v337_v21  ;;  %v748_v30 = vadd.f32 %v747_v28, %v345_v22  ;;  %v752_v31 = vmax.f32 %v705_v25, 0.0  ;;  %v754_v32 = vmax.f32 %v746_v26, 0.0  ;;  %v6676_v21 = vld [vmem:[%s9912_s6 + $0x85c] ss:$76 sps:$4 sm:$0xff]   ;;  %v6682_v25 = vld [vmem:[%s9912_s6 + $0x7c4] ss:$76 sps:$4 sm:$0xff]  }
 0x2d9   :  { %v708_v33 = vpop.f32.mrf.mxu1  ;;  %v749_v34 = vpop.f32.mrf.mxu0  ;;  %v6679_v22 = vld [vmem:[%s9912_s6 + $0x11dc] ss:$76 sps:$4 sm:$0xff]   ;;  %v6685_v26 = vld [vmem:[%s9912_s6 + $0x1144] ss:$76 sps:$4 sm:$0xff]   ;;  %v6680_v27 = vld [vmem:[%s9912_s6 + $0x7c0] ss:$76 sps:$4 sm:$0xff]  }
 0x2da   :  { %v753_v35 = vmax.f32 %v707_v29, 0.0  ;;  %v755_v36 = vmax.f32 %v748_v30, 0.0  ;;  %v8134_v43 = vpack.c.bf16 %v752_v31, %v752_v31  ;;  %v8136_v44 = vpack.c.bf16 %v754_v32, %v754_v32  ;;  %v6683_v28 = vld [vmem:[%s9912_s6 + $0x1140] ss:$76 sps:$4 sm:$0xff]   ;;  %v6686_v31 = vld [vmem:[%s9912_s6 + $0x728] ss:$76 sps:$4 sm:$0xff]  }
 0x2db   :  { %v709_v37 = vpop.f32.mrf.mxu1  ;;  %v750_v38 = vpop.f32.mrf.mxu0  ;;  %v6688_v29 = vld [vmem:[%s9912_s6 + $0x72c] ss:$76 sps:$4 sm:$0xff]   ;;  %v6689_v32 = vld [vmem:[%s9912_s6 + $0x10a8] ss:$76 sps:$4 sm:$0xff]  }
 0x2dc   :  { %v8124_v39 = vpack.c.bf16 %v753_v35, %v753_v35  ;;  %v8126_v40 = vpack.c.bf16 %v755_v36, %v755_v36  ;;  %v6691_v30 = vld [vmem:[%s9912_s6 + $0x10ac] ss:$76 sps:$4 sm:$0xff]   ;;  %v6694_v33 = vld [vmem:[%s9912_s6 + $0x694] ss:$76 sps:$4 sm:$0xff]   ;;  %v6692_v35 = vld [vmem:[%s9912_s6 + $0x690] ss:$76 sps:$4 sm:$0xff]  }
 0x2dd   :  { %v6697_v34 = vld [vmem:[%s9912_s6 + $0x1014] ss:$76 sps:$4 sm:$0xff]   ;;  %v6695_v36 = vld [vmem:[%s9912_s6 + $0x1010] ss:$76 sps:$4 sm:$0xff]  }
 0x2de   :  { %4605 = vmatprep.mubr.bf16.mxu1 %v8124_v39  ;;  %4646 = vmatprep.mubr.bf16.mxu0 %v8126_v40  ;;  %v6700_v37 = vld [vmem:[%s9912_s6 + $0x5fc] ss:$76 sps:$4 sm:$0xff]  }
 0x2df   :  { %4606 = vmatmul.mubr.bf16.vlgmr.msra.gmra.mxu1 %v8134_v43  ;;  %4647 = vmatmul.mubr.bf16.vlgmr.msra.gmra.mxu0 %v8136_v44  ;;  %v6703_v38 = vld [vmem:[%s9912_s6 + $0xf7c] ss:$76 sps:$4 sm:$0xff]  }
 0x2e0   :  { %4656 = vmatpush1.bf16.msra.mxu1 %v6620_v41  ;;  %4697 = vmatpush1.bf16.msra.mxu0 %v6623_v42  ;;  %v6698_v41 = vld [vmem:[%s9912_s6 + $0x5f8] ss:$76 sps:$4 sm:$0xff]  }
 0x2e1   :  { %4687 = vmatprep.mubr.bf16.mxu1 %v8124_v39  ;;  %4728 = vmatprep.mubr.bf16.mxu0 %v8126_v40  ;;  %v6701_v42 = vld [vmem:[%s9912_s6 + $0xf78] ss:$76 sps:$4 sm:$0xff]  }
 0x2e2   :  { %4657 = vmatprep.subr.bf16.mxu1 %v6628_v45  ;;  %4698 = vmatprep.subr.bf16.mxu0 %v6631_v46  ;;  %v6706_v45 = vld [vmem:[%s9912_s6 + $0x564] ss:$76 sps:$4 sm:$0xff]  }
 0x2e3   :  { %v6709_v46 = vld [vmem:[%s9912_s6 + $0xee4] ss:$76 sps:$4 sm:$0xff]  }
 0x2e4   :  { %4658 = vmatpush1.bf16.msra.mxu1 %v6626_v47  ;;  %4699 = vmatpush1.bf16.msra.mxu0 %v6629_v48  ;;  %v6704_v47 = vld [vmem:[%s9912_s6 + $0x560] ss:$76 sps:$4 sm:$0xff]  }
 0x2e5   :  { %4659 = vmatprep.subr.bf16.mxu1 %v6634_v49  ;;  %4700 = vmatprep.subr.bf16.mxu0 %v6637_v50  ;;  %v6707_v48 = vld [vmem:[%s9912_s6 + $0xee0] ss:$76 sps:$4 sm:$0xff]  }
 0x2e6   :  { %v6712_v49 = vld [vmem:[%s9912_s6 + $0x4cc] ss:$76 sps:$4 sm:$0xff]  }
 0x2e7   :  { %v6715_v50 = vld [vmem:[%s9912_s6 + $0xe4c] ss:$76 sps:$4 sm:$0xff]  }
 0x2e8   :  { %4660 = vmatpush1.bf16.msra.mxu1 %v6632_v51  ;;  %4701 = vmatpush1.bf16.msra.mxu0 %v6635_v52  ;;  %v6710_v51 = vld [vmem:[%s9912_s6 + $0x4c8] ss:$76 sps:$4 sm:$0xff]  }
 0x2e9   :  { %4661 = vmatprep.subr.bf16.mxu1 %v6640_v53  ;;  %4702 = vmatprep.subr.bf16.mxu0 %v6643_v54  ;;  %v6713_v52 = vld [vmem:[%s9912_s6 + $0xe48] ss:$76 sps:$4 sm:$0xff]  }
 0x2ea   :  { %v6718_v53 = vld [vmem:[%s9912_s6 + $0x43c] ss:$76 sps:$4 sm:$0xff]  }
 0x2eb   :  { %v6721_v54 = vld [vmem:[%s9912_s6 + $0xdbc] ss:$76 sps:$4 sm:$0xff]  }
 0x2ec   :  { %4662 = vmatpush1.bf16.msra.mxu1 %v6638_v57  ;;  %4703 = vmatpush1.bf16.msra.mxu0 %v6641_v59  ;;  %v6716_v57 = vld [vmem:[%s9912_s6 + $0x438] ss:$76 sps:$4 sm:$0xff]  }
 0x2ed   :  { %4663 = vmatprep.subr.bf16.mxu1 %v6646_v60  ;;  %4704 = vmatprep.subr.bf16.mxu0 %v6649_v61  ;;  %v6719_v59 = vld [vmem:[%s9912_s6 + $0xdb8] ss:$76 sps:$4 sm:$0xff]  }
 0x2ee   :  { %v6724_v60 = vld [vmem:[%s9912_s6 + $0x3a4] ss:$76 sps:$4 sm:$0xff]  }
 0x2ef   :  { %v6727_v61 = vld [vmem:[%s9912_s6 + $0xd24] ss:$76 sps:$4 sm:$0xff]  }
 0x2f0   :  { %4664 = vmatpush1.bf16.msra.mxu1 %v6644_v62  ;;  %4705 = vmatpush1.bf16.msra.mxu0 %v6647_v63  ;;  %v6722_v62 = vld [vmem:[%s9912_s6 + $0x3a0] ss:$76 sps:$4 sm:$0xff]  }
 0x2f1   :  { %4665 = vmatprep.subr.bf16.mxu1 %v6652_v0  ;;  %4706 = vmatprep.subr.bf16.mxu0 %v6655_v2  ;;  %v6725_v63 = vld [vmem:[%s9912_s6 + $0xd20] ss:$76 sps:$4 sm:$0xff]  }
 0x2f2   :  { %v6730_v0 = vld [vmem:[%s9912_s6 + $0x30c] ss:$76 sps:$4 sm:$0xff]  }
 0x2f3   :  { %v6733_v2 = vld [vmem:[%s9912_s6 + $0xc8c] ss:$76 sps:$4 sm:$0xff]  }
 0x2f4   :  { %4666 = vmatpush1.bf16.msra.mxu1 %v6650_v1  ;;  %4707 = vmatpush1.bf16.msra.mxu0 %v6653_v3  ;;  %v6728_v1 = vld [vmem:[%s9912_s6 + $0x308] ss:$76 sps:$4 sm:$0xff]  }
 0x2f5   :  { %4667 = vmatprep.subr.bf16.mxu1 %v6658_v5  ;;  %4708 = vmatprep.subr.bf16.mxu0 %v6661_v8  ;;  %v6731_v3 = vld [vmem:[%s9912_s6 + $0xc88] ss:$76 sps:$4 sm:$0xff]  }
 0x2f6   :  { %v6736_v5 = vld [vmem:[%s9912_s6 + $0x274] ss:$76 sps:$4 sm:$0xff]  }
 0x2f7   :  { %v6739_v8 = vld [vmem:[%s9912_s6 + $0xbf4] ss:$76 sps:$4 sm:$0xff]  }
 0x2f8   :  { %4668 = vmatpush1.bf16.msra.mxu1 %v6656_v9  ;;  %4709 = vmatpush1.bf16.msra.mxu0 %v6659_v10  ;;  %v6734_v9 = vld [vmem:[%s9912_s6 + $0x270] ss:$76 sps:$4 sm:$0xff]  }
 0x2f9   :  { %4669 = vmatprep.subr.bf16.mxu1 %v6664_v11  ;;  %4710 = vmatprep.subr.bf16.mxu0 %v6667_v12  ;;  %v6737_v10 = vld [vmem:[%s9912_s6 + $0xbf0] ss:$76 sps:$4 sm:$0xff]  }
 0x2fa   :  { %v6742_v11 = vld [vmem:[%s9912_s6 + $0x1dc] ss:$76 sps:$4 sm:$0xff]  }
 0x2fb   :  { %v6745_v12 = vld [vmem:[%s9912_s6 + $0xb5c] ss:$76 sps:$4 sm:$0xff]  }
 0x2fc   :  { %4670 = vmatpush1.bf16.msra.mxu1 %v6662_v13  ;;  %4711 = vmatpush1.bf16.msra.mxu0 %v6665_v14  ;;  %v6740_v13 = vld [vmem:[%s9912_s6 + $0x1d8] ss:$76 sps:$4 sm:$0xff]  }
 0x2fd   :  { %4671 = vmatprep.subr.bf16.mxu1 %v6670_v15  ;;  %4712 = vmatprep.subr.bf16.mxu0 %v6673_v17  ;;  %v6743_v14 = vld [vmem:[%s9912_s6 + $0xb58] ss:$76 sps:$4 sm:$0xff]  }
 0x2fe   :  { %v6748_v15 = vld [vmem:[%s9912_s6 + $0x144] ss:$76 sps:$4 sm:$0xff]  }
 0x2ff   :  { %v6751_v17 = vld [vmem:[%s9912_s6 + $0xac4] ss:$76 sps:$4 sm:$0xff]  }
 0x300   :  { %4672 = vmatpush2.bf16.msra.mxu1 %v6668_v19  ;;  %4713 = vmatpush2.bf16.msra.mxu0 %v6671_v20  ;;  %v6746_v19 = vld [vmem:[%s9912_s6 + $0x140] ss:$76 sps:$4 sm:$0xff]  }
 0x301   :  { %4673 = vmatprep.subr.bf16.mxu1 %v6676_v21  ;;  %4714 = vmatprep.subr.bf16.mxu0 %v6679_v22  ;;  %v6749_v20 = vld [vmem:[%s9912_s6 + $0xac0] ss:$76 sps:$4 sm:$0xff]  }
 0x302   :  { %v6754_v21 = vld [vmem:[%s9912_s6 + $0xac] ss:$76 sps:$4 sm:$0xff]  }
 0x303   :  { %v6757_v22 = vld [vmem:[%s9912_s6 + $0xa2c] ss:$76 sps:$4 sm:$0xff]  }
 0x304   :  { %4674 = vmatpush2.bf16.msra.mxu1 %v6674_v23  ;;  %4715 = vmatpush2.bf16.msra.mxu0 %v6677_v24  ;;  %v6752_v23 = vld [vmem:[%s9912_s6 + $0xa8] ss:$76 sps:$4 sm:$0xff]  }
 0x305   :  { %4675 = vmatprep.subr.bf16.mxu1 %v6682_v25  ;;  %4716 = vmatprep.subr.bf16.mxu0 %v6685_v26  ;;  %v6755_v24 = vld [vmem:[%s9912_s6 + $0xa28] ss:$76 sps:$4 sm:$0xff]  }
 0x306   :  { %v6760_v25 = vld [vmem:[%s9912_s6 + $0x14] ss:$76 sps:$4 sm:$0xff]  }
 0x307   :  { %v6763_v26 = vld [vmem:[%s9912_s6 + $0x994] ss:$76 sps:$4 sm:$0xff]  }
 0x308   :  { %4676 = vmatpush2.bf16.msra.mxu1 %v6680_v27  ;;  %4717 = vmatpush2.bf16.msra.mxu0 %v6683_v28  ;;  %v6758_v27 = vld [vmem:[%s9912_s6 + $0x10] ss:$76 sps:$4 sm:$0xff]  }
 0x309   :  { %4677 = vmatprep.subr.bf16.mxu1 %v6688_v29  ;;  %4718 = vmatprep.subr.bf16.mxu0 %v6691_v30  ;;  %v6761_v28 = vld [vmem:[%s9912_s6 + $0x990] ss:$76 sps:$4 sm:$0xff]  }
 0x30a   :  { %v6766_v29 = vld [vmem:[%s9912_s6 + $0x8fc] ss:$76 sps:$4 sm:$0xff]  }
 0x30b   :  { %v6769_v30 = vld [vmem:[%s9912_s6 + $0x127c] ss:$76 sps:$4 sm:$0xff]  }
 0x30c   :  { %4678 = vmatpush2.bf16.msra.mxu1 %v6686_v31  ;;  %4719 = vmatpush2.bf16.msra.mxu0 %v6689_v32  ;;  %v6764_v31 = vld [vmem:[%s9912_s6 + $0x8f8] ss:$76 sps:$4 sm:$0xff]  }
 0x30d   :  { %4679 = vmatprep.subr.bf16.mxu1 %v6694_v33  ;;  %4720 = vmatprep.subr.bf16.mxu0 %v6697_v34  ;;  %v6767_v32 = vld [vmem:[%s9912_s6 + $0x1278] ss:$76 sps:$4 sm:$0xff]  }
 0x30e   :  { %v6772_v33 = vld [vmem:[%s9912_s6 + $0x864] ss:$76 sps:$4 sm:$0xff]  }
 0x30f   :  { %v6775_v34 = vld [vmem:[%s9912_s6 + $0x11e4] ss:$76 sps:$4 sm:$0xff]  }
 0x310   :  { %4680 = vmatpush2.bf16.msra.mxu1 %v6692_v35  ;;  %4721 = vmatpush2.bf16.msra.mxu0 %v6695_v36  ;;  %v6770_v35 = vld [vmem:[%s9912_s6 + $0x860] ss:$76 sps:$4 sm:$0xff]  }
 0x311   :  { %4681 = vmatprep.subr.bf16.mxu1 %v6700_v37  ;;  %4722 = vmatprep.subr.bf16.mxu0 %v6703_v38  ;;  %v6773_v36 = vld [vmem:[%s9912_s6 + $0x11e0] ss:$76 sps:$4 sm:$0xff]  }
 0x312   :  { %v6778_v37 = vld [vmem:[%s9912_s6 + $0x7cc] ss:$76 sps:$4 sm:$0xff]  }
 0x313   :  { %v6781_v38 = vld [vmem:[%s9912_s6 + $0x114c] ss:$76 sps:$4 sm:$0xff]  }
 0x314   :  { %4682 = vmatpush2.bf16.msra.mxu1 %v6698_v41  ;;  %4723 = vmatpush2.bf16.msra.mxu0 %v6701_v42  ;;  %v6776_v41 = vld [vmem:[%s9912_s6 + $0x7c8] ss:$76 sps:$4 sm:$0xff]  }
 0x315   :  { %4683 = vmatprep.subr.bf16.mxu1 %v6706_v45  ;;  %4724 = vmatprep.subr.bf16.mxu0 %v6709_v46  ;;  %v6779_v42 = vld [vmem:[%s9912_s6 + $0x1148] ss:$76 sps:$4 sm:$0xff]  }
 0x316   :  { %v6784_v45 = vld [vmem:[%s9912_s6 + $0x734] ss:$76 sps:$4 sm:$0xff]  }
 0x317   :  { %v6787_v46 = vld [vmem:[%s9912_s6 + $0x10b4] ss:$76 sps:$4 sm:$0xff]  }
 0x318   :  { %4684 = vmatpush2.bf16.msra.mxu1 %v6704_v47  ;;  %4725 = vmatpush2.bf16.msra.mxu0 %v6707_v48  ;;  %v6782_v47 = vld [vmem:[%s9912_s6 + $0x730] ss:$76 sps:$4 sm:$0xff]  }
 0x319   :  { %4685 = vmatprep.subr.bf16.mxu1 %v6712_v49  ;;  %4726 = vmatprep.subr.bf16.mxu0 %v6715_v50  ;;  %v6785_v48 = vld [vmem:[%s9912_s6 + $0x10b0] ss:$76 sps:$4 sm:$0xff]  }
 0x31a   :  { %v6790_v49 = vld [vmem:[%s9912_s6 + $0x69c] ss:$76 sps:$4 sm:$0xff]  }
 0x31b   :  { %v6793_v50 = vld [vmem:[%s9912_s6 + $0x101c] ss:$76 sps:$4 sm:$0xff]  }
 0x31c   :  { %4686 = vmatpush2.bf16.msra.mxu1 %v6710_v51  ;;  %4727 = vmatpush2.bf16.msra.mxu0 %v6713_v52  ;;  %v6788_v51 = vld [vmem:[%s9912_s6 + $0x698] ss:$76 sps:$4 sm:$0xff]  }
 0x31d   :  { %4737 = vmatprep.subr.bf16.mxu1 %v6718_v53  ;;  %4778 = vmatprep.subr.bf16.mxu0 %v6721_v54  ;;  %v6791_v52 = vld [vmem:[%s9912_s6 + $0x1018] ss:$76 sps:$4 sm:$0xff]  }
 0x31e   :  { %v6796_v53 = vld [vmem:[%s9912_s6 + $0x604] ss:$76 sps:$4 sm:$0xff]  }
 0x31f   :  { %4688 = vmatmul.mubr.bf16.vlgmr.msra.gmra.mxu1 %v8134_v43  ;;  %4729 = vmatmul.mubr.bf16.vlgmr.msra.gmra.mxu0 %v8136_v44  ;;  %v6799_v54 = vld [vmem:[%s9912_s6 + $0xf84] ss:$76 sps:$4 sm:$0xff]  }
 0x320   :  { %4738 = vmatpush1.bf16.msra.mxu1 %v6716_v57  ;;  %4769 = vmatprep.mubr.bf16.mxu1 %v8124_v39  ;;  %v6794_v57 = vld [vmem:[%s9912_s6 + $0x600] ss:$76 sps:$4 sm:$0xff]  }
 0x321   :  { %4779 = vmatpush1.bf16.msra.mxu0 %v6719_v59  ;;  %4810 = vmatprep.mubr.bf16.mxu0 %v8126_v40  ;;  %v6797_v59 = vld [vmem:[%s9912_s6 + $0xf80] ss:$76 sps:$4 sm:$0xff]  }
 0x322   :  { %4739 = vmatprep.subr.bf16.mxu1 %v6724_v60  ;;  %4780 = vmatprep.subr.bf16.mxu0 %v6727_v61  ;;  %v6802_v60 = vld [vmem:[%s9912_s6 + $0x56c] ss:$76 sps:$4 sm:$0xff]  }
 0x323   :  { %v6805_v61 = vld [vmem:[%s9912_s6 + $0xeec] ss:$76 sps:$4 sm:$0xff]  }
 0x324   :  { %4740 = vmatpush1.bf16.msra.mxu1 %v6722_v62  ;;  %v6800_v62 = vld [vmem:[%s9912_s6 + $0x568] ss:$76 sps:$4 sm:$0xff]  }
 0x325   :  { %4781 = vmatpush1.bf16.msra.mxu0 %v6725_v63  ;;  %4741 = vmatprep.subr.bf16.mxu1 %v6730_v0  ;;  %v6803_v63 = vld [vmem:[%s9912_s6 + $0xee8] ss:$76 sps:$4 sm:$0xff]  }
 0x326   :  { %4782 = vmatprep.subr.bf16.mxu0 %v6733_v2  ;;  %v6808_v0 = vld [vmem:[%s9912_s6 + $0x4d4] ss:$76 sps:$4 sm:$0xff]  }
 0x327   :  { %v6811_v2 = vld [vmem:[%s9912_s6 + $0xe54] ss:$76 sps:$4 sm:$0xff]  }
 0x328   :  { %4742 = vmatpush1.bf16.msra.mxu1 %v6728_v1  ;;  %v6806_v1 = vld [vmem:[%s9912_s6 + $0x4d0] ss:$76 sps:$4 sm:$0xff]  }
 0x329   :  { %4783 = vmatpush1.bf16.msra.mxu0 %v6731_v3  ;;  %4743 = vmatprep.subr.bf16.mxu1 %v6736_v5  ;;  %v6809_v3 = vld [vmem:[%s9912_s6 + $0xe50] ss:$76 sps:$4 sm:$0xff]  }
 0x32a   :  { %4784 = vmatprep.subr.bf16.mxu0 %v6739_v8  ;;  %v6814_v5 = vld [vmem:[%s9912_s6 + $0x444] ss:$76 sps:$4 sm:$0xff]  }
 0x32b   :  { %v6817_v8 = vld [vmem:[%s9912_s6 + $0xdc4] ss:$76 sps:$4 sm:$0xff]  }
 0x32c   :  { %4744 = vmatpush1.bf16.msra.mxu1 %v6734_v9  ;;  %v6812_v9 = vld [vmem:[%s9912_s6 + $0x440] ss:$76 sps:$4 sm:$0xff]  }
 0x32d   :  { %4785 = vmatpush1.bf16.msra.mxu0 %v6737_v10  ;;  %4745 = vmatprep.subr.bf16.mxu1 %v6742_v11  ;;  %v6815_v10 = vld [vmem:[%s9912_s6 + $0xdc0] ss:$76 sps:$4 sm:$0xff]  }
 0x32e   :  { %4786 = vmatprep.subr.bf16.mxu0 %v6745_v12  ;;  %v6820_v11 = vld [vmem:[%s9912_s6 + $0x3ac] ss:$76 sps:$4 sm:$0xff]  }
 0x32f   :  { %v6823_v12 = vld [vmem:[%s9912_s6 + $0xd2c] ss:$76 sps:$4 sm:$0xff]  }
 0x330   :  { %4746 = vmatpush1.bf16.msra.mxu1 %v6740_v13  ;;  %v6818_v13 = vld [vmem:[%s9912_s6 + $0x3a8] ss:$76 sps:$4 sm:$0xff]  }
 0x331   :  { %4787 = vmatpush1.bf16.msra.mxu0 %v6743_v14  ;;  %4747 = vmatprep.subr.bf16.mxu1 %v6748_v15  ;;  %v6821_v14 = vld [vmem:[%s9912_s6 + $0xd28] ss:$76 sps:$4 sm:$0xff]  }
 0x332   :  { %4788 = vmatprep.subr.bf16.mxu0 %v6751_v17  ;;  %v6826_v15 = vld [vmem:[%s9912_s6 + $0x314] ss:$76 sps:$4 sm:$0xff]  }
 0x333   :  { %v6829_v17 = vld [vmem:[%s9912_s6 + $0xc94] ss:$76 sps:$4 sm:$0xff]  }
 0x334   :  { %4748 = vmatpush1.bf16.msra.mxu1 %v6746_v19  ;;  %v6824_v19 = vld [vmem:[%s9912_s6 + $0x310] ss:$76 sps:$4 sm:$0xff]  }
 0x335   :  { %4789 = vmatpush1.bf16.msra.mxu0 %v6749_v20  ;;  %4749 = vmatprep.subr.bf16.mxu1 %v6754_v21  ;;  %v6827_v20 = vld [vmem:[%s9912_s6 + $0xc90] ss:$76 sps:$4 sm:$0xff]  }
 0x336   :  { %4790 = vmatprep.subr.bf16.mxu0 %v6757_v22  ;;  %v6832_v21 = vld [vmem:[%s9912_s6 + $0x27c] ss:$76 sps:$4 sm:$0xff]  }
 0x337   :  { %v6835_v22 = vld [vmem:[%s9912_s6 + $0xbfc] ss:$76 sps:$4 sm:$0xff]  }
 0x338   :  { %4750 = vmatpush1.bf16.msra.mxu1 %v6752_v23  ;;  %v6830_v23 = vld [vmem:[%s9912_s6 + $0x278] ss:$76 sps:$4 sm:$0xff]  }
 0x339   :  { %4791 = vmatpush1.bf16.msra.mxu0 %v6755_v24  ;;  %4751 = vmatprep.subr.bf16.mxu1 %v6760_v25  ;;  %v6833_v24 = vld [vmem:[%s9912_s6 + $0xbf8] ss:$76 sps:$4 sm:$0xff]  }
 0x33a   :  { %4792 = vmatprep.subr.bf16.mxu0 %v6763_v26  ;;  %v6838_v25 = vld [vmem:[%s9912_s6 + $0x1e4] ss:$76 sps:$4 sm:$0xff]  }
 0x33b   :  { %v6841_v26 = vld [vmem:[%s9912_s6 + $0xb64] ss:$76 sps:$4 sm:$0xff]  }
 0x33c   :  { %4752 = vmatpush1.bf16.msra.mxu1 %v6758_v27  ;;  %v6836_v27 = vld [vmem:[%s9912_s6 + $0x1e0] ss:$76 sps:$4 sm:$0xff]  }
 0x33d   :  { %4793 = vmatpush1.bf16.msra.mxu0 %v6761_v28  ;;  %4753 = vmatprep.subr.bf16.mxu1 %v6766_v29  ;;  %v6839_v28 = vld [vmem:[%s9912_s6 + $0xb60] ss:$76 sps:$4 sm:$0xff]  }
 0x33e   :  { %4794 = vmatprep.subr.bf16.mxu0 %v6769_v30  ;;  %v6844_v29 = vld [vmem:[%s9912_s6 + $0x14c] ss:$76 sps:$4 sm:$0xff]  }
 0x33f   :  { %v6847_v30 = vld [vmem:[%s9912_s6 + $0xacc] ss:$76 sps:$4 sm:$0xff]  }
 0x340   :  { %4754 = vmatpush2.bf16.msra.mxu1 %v6764_v31  ;;  %v6842_v31 = vld [vmem:[%s9912_s6 + $0x148] ss:$76 sps:$4 sm:$0xff]  }
 0x341   :  { %4795 = vmatpush2.bf16.msra.mxu0 %v6767_v32  ;;  %4755 = vmatprep.subr.bf16.mxu1 %v6772_v33  ;;  %v6845_v32 = vld [vmem:[%s9912_s6 + $0xac8] ss:$76 sps:$4 sm:$0xff]  }
 0x342   :  { %4796 = vmatprep.subr.bf16.mxu0 %v6775_v34  ;;  %v6850_v33 = vld [vmem:[%s9912_s6 + $0xb4] ss:$76 sps:$4 sm:$0xff]  }
 0x343   :  { %v6853_v34 = vld [vmem:[%s9912_s6 + $0xa34] ss:$76 sps:$4 sm:$0xff]  }
 0x344   :  { %4756 = vmatpush2.bf16.msra.mxu1 %v6770_v35  ;;  %v6848_v35 = vld [vmem:[%s9912_s6 + $0xb0] ss:$76 sps:$4 sm:$0xff]  }
 0x345   :  { %4797 = vmatpush2.bf16.msra.mxu0 %v6773_v36  ;;  %4757 = vmatprep.subr.bf16.mxu1 %v6778_v37  ;;  %v6851_v36 = vld [vmem:[%s9912_s6 + $0xa30] ss:$76 sps:$4 sm:$0xff]  }
 0x346   :  { %4798 = vmatprep.subr.bf16.mxu0 %v6781_v38  ;;  %v6856_v37 = vld [vmem:[%s9912_s6 + $0x1c] ss:$76 sps:$4 sm:$0xff]  }
 0x347   :  { %v6859_v38 = vld [vmem:[%s9912_s6 + $0x99c] ss:$76 sps:$4 sm:$0xff]  }
 0x348   :  { %4758 = vmatpush2.bf16.msra.mxu1 %v6776_v41  ;;  %v6854_v41 = vld [vmem:[%s9912_s6 + $0x18] ss:$76 sps:$4 sm:$0xff]  }
 0x349   :  { %4799 = vmatpush2.bf16.msra.mxu0 %v6779_v42  ;;  %4759 = vmatprep.subr.bf16.mxu1 %v6784_v45  ;;  %v6857_v42 = vld [vmem:[%s9912_s6 + $0x998] ss:$76 sps:$4 sm:$0xff]  }
 0x34a   :  { %4800 = vmatprep.subr.bf16.mxu0 %v6787_v46  ;;  %v6862_v45 = vld [vmem:[%s9912_s6 + $0x904] ss:$76 sps:$4 sm:$0xff]  }
 0x34b   :  { %v6865_v46 = vld [vmem:[%s9912_s6 + $0x1284] ss:$76 sps:$4 sm:$0xff]  }
 0x34c   :  { %4760 = vmatpush2.bf16.msra.mxu1 %v6782_v47  ;;  %v6860_v47 = vld [vmem:[%s9912_s6 + $0x900] ss:$76 sps:$4 sm:$0xff]  }
 0x34d   :  { %4801 = vmatpush2.bf16.msra.mxu0 %v6785_v48  ;;  %4761 = vmatprep.subr.bf16.mxu1 %v6790_v49  ;;  %v6863_v48 = vld [vmem:[%s9912_s6 + $0x1280] ss:$76 sps:$4 sm:$0xff]  }
 0x34e   :  { %4802 = vmatprep.subr.bf16.mxu0 %v6793_v50  ;;  %v6868_v49 = vld [vmem:[%s9912_s6 + $0x86c] ss:$76 sps:$4 sm:$0xff]  }
 0x34f   :  { %v6871_v50 = vld [vmem:[%s9912_s6 + $0x11ec] ss:$76 sps:$4 sm:$0xff]  }
 0x350   :  { %4762 = vmatpush2.bf16.msra.mxu1 %v6788_v51  ;;  %v6866_v51 = vld [vmem:[%s9912_s6 + $0x868] ss:$76 sps:$4 sm:$0xff]  }
 0x351   :  { %4803 = vmatpush2.bf16.msra.mxu0 %v6791_v52  ;;  %4763 = vmatprep.subr.bf16.mxu1 %v6796_v53  ;;  %v6869_v52 = vld [vmem:[%s9912_s6 + $0x11e8] ss:$76 sps:$4 sm:$0xff]  }
 0x352   :  { %4804 = vmatprep.subr.bf16.mxu0 %v6799_v54  ;;  %v6874_v53 = vld [vmem:[%s9912_s6 + $0x7d4] ss:$76 sps:$4 sm:$0xff]  }
 0x353   :  { %v6877_v54 = vld [vmem:[%s9912_s6 + $0x1154] ss:$76 sps:$4 sm:$0xff]  }
 0x354   :  { %4764 = vmatpush2.bf16.msra.mxu1 %v6794_v57  ;;  %v6872_v57 = vld [vmem:[%s9912_s6 + $0x7d0] ss:$76 sps:$4 sm:$0xff]  }
 0x355   :  { %4805 = vmatpush2.bf16.msra.mxu0 %v6797_v59  ;;  %4765 = vmatprep.subr.bf16.mxu1 %v6802_v60  ;;  %v6875_v59 = vld [vmem:[%s9912_s6 + $0x1150] ss:$76 sps:$4 sm:$0xff]  }
 0x356   :  { %4806 = vmatprep.subr.bf16.mxu0 %v6805_v61  ;;  %v6880_v60 = vld [vmem:[%s9912_s6 + $0x73c] ss:$76 sps:$4 sm:$0xff]  }
 0x357   :  { %v6883_v61 = vld [vmem:[%s9912_s6 + $0x10bc] ss:$76 sps:$4 sm:$0xff]  }
 0x358   :  { %4766 = vmatpush2.bf16.msra.mxu1 %v6800_v62  ;;  %v6878_v62 = vld [vmem:[%s9912_s6 + $0x738] ss:$76 sps:$4 sm:$0xff]  }
 0x359   :  { %4807 = vmatpush2.bf16.msra.mxu0 %v6803_v63  ;;  %4767 = vmatprep.subr.bf16.mxu1 %v6808_v0  ;;  %v6881_v63 = vld [vmem:[%s9912_s6 + $0x10b8] ss:$76 sps:$4 sm:$0xff]  }
 0x35a   :  { %4808 = vmatprep.subr.bf16.mxu0 %v6811_v2  ;;  %v6886_v0 = vld [vmem:[%s9912_s6 + $0x6a4] ss:$76 sps:$4 sm:$0xff]  }
 0x35b   :  { %v6889_v2 = vld [vmem:[%s9912_s6 + $0x1024] ss:$76 sps:$4 sm:$0xff]  }
 0x35c   :  { %4768 = vmatpush2.bf16.msra.mxu1 %v6806_v1  ;;  %v6884_v1 = vld [vmem:[%s9912_s6 + $0x6a0] ss:$76 sps:$4 sm:$0xff]  }
 0x35d   :  { %4809 = vmatpush2.bf16.msra.mxu0 %v6809_v3  ;;  %4819 = vmatprep.subr.bf16.mxu1 %v6814_v5  ;;  %v6887_v3 = vld [vmem:[%s9912_s6 + $0x1020] ss:$76 sps:$4 sm:$0xff]  }
 0x35e   :  { %4860 = vmatprep.subr.bf16.mxu0 %v6817_v8  ;;  %v6892_v5 = vld [vmem:[%s9912_s6 + $0x60c] ss:$76 sps:$4 sm:$0xff]  }
 0x35f   :  { %4770 = vmatmul.mubr.bf16.vlgmr.msra.gmra.mxu1 %v8134_v43  ;;  %v6895_v8 = vld [vmem:[%s9912_s6 + $0xf8c] ss:$76 sps:$4 sm:$0xff]  }
 0x360   :  { %4811 = vmatmul.mubr.bf16.vlgmr.msra.gmra.mxu0 %v8136_v44  ;;  %4820 = vmatpush1.bf16.msra.mxu1 %v6812_v9  ;;  %v8689_v9 = vld [vmem:[%s9906_s0] sm:$0xff] }
 0x361   :  { %4851 = vmatprep.mubr.bf16.mxu1 %v8124_v39  ;;  %4861 = vmatpush1.bf16.msra.mxu0 %v6815_v10  ;;  %v48_v10 = vsel %vm40_vm0, %v8689_v9, -inf }
 0x362   :  { %4892 = vmatprep.mubr.bf16.mxu0 %v8126_v40  ;;  %4821 = vmatprep.subr.bf16.mxu1 %v6820_v11  ;;  %v6890_v11 = vld [vmem:[%s9912_s6 + $0x608] ss:$76 sps:$4 sm:$0xff]  }
 0x363   :  { %4862 = vmatprep.subr.bf16.mxu0 %v6823_v12  ;;  %49 = vmax.xlane.f32.xlu0 %v48_v10  ;;  %v6893_v12 = vld [vmem:[%s9912_s6 + $0xf88] ss:$76 sps:$4 sm:$0xff]  }
 0x364   :  { %4822 = vmatpush1.bf16.msra.mxu1 %v6818_v13  ;;  %v6898_v13 = vld [vmem:[%s9912_s6 + $0x574] ss:$76 sps:$4 sm:$0xff]  }
 0x365   :  { %4863 = vmatpush1.bf16.msra.mxu0 %v6821_v14  ;;  %4823 = vmatprep.subr.bf16.mxu1 %v6826_v15  ;;  %v52_v14 = vsel %vm7618_vm4, %v8689_v9, -inf  ;;  %v56_v15 = vsel %vm7625_vm6, %v8689_v9, -inf  ;;  %v6935_v10 = vld [vmem:[%s9912_s6 + $0xb68] ss:$76 sps:$4 sm:$0xff]  }
 0x366   :  { %4864 = vmatprep.subr.bf16.mxu0 %v6829_v17  ;;  %v6901_v17 = vld [vmem:[%s9912_s6 + $0xef4] ss:$76 sps:$4 sm:$0xff]   ;;  %53 = vmax.xlane.f32.xlu1 %v52_v14  ;;  %v6941_v14 = vld [vmem:[%s9912_s6 + $0xad0] ss:$76 sps:$4 sm:$0xff]  }
 0x367   :  { %57 = vmax.xlane.f32.xlu0 %v56_v15  ;;  %v6946_v15 = vld [vmem:[%s9912_s6 + $0xbc] ss:$76 sps:$4 sm:$0xff]  }
 0x368   :  { %4824 = vmatpush1.bf16.msra.mxu1 %v6824_v19  ;;  %v6896_v19 = vld [vmem:[%s9912_s6 + $0x570] ss:$76 sps:$4 sm:$0xff]  }
 0x369   :  { %4865 = vmatpush1.bf16.msra.mxu0 %v6827_v20  ;;  %4825 = vmatprep.subr.bf16.mxu1 %v6832_v21  ;;  %v6899_v20 = vld [vmem:[%s9912_s6 + $0xef0] ss:$76 sps:$4 sm:$0xff]  }
 0x36a   :  { %4866 = vmatprep.subr.bf16.mxu0 %v6835_v22  ;;  %v6904_v21 = vld [vmem:[%s9912_s6 + $0x4dc] ss:$76 sps:$4 sm:$0xff]  }
 0x36b   :  { %v6907_v22 = vld [vmem:[%s9912_s6 + $0xe5c] ss:$76 sps:$4 sm:$0xff]  }
 0x36c   :  { %4826 = vmatpush1.bf16.msra.mxu1 %v6830_v23  ;;  %v6902_v23 = vld [vmem:[%s9912_s6 + $0x4d8] ss:$76 sps:$4 sm:$0xff]  }
 0x36d   :  { %4867 = vmatpush1.bf16.msra.mxu0 %v6833_v24  ;;  %4827 = vmatprep.subr.bf16.mxu1 %v6838_v25  ;;  %v6905_v24 = vld [vmem:[%s9912_s6 + $0xe58] ss:$76 sps:$4 sm:$0xff]  }
 0x36e   :  { %4868 = vmatprep.subr.bf16.mxu0 %v6841_v26  ;;  %v6910_v25 = vld [vmem:[%s9912_s6 + $0x44c] ss:$76 sps:$4 sm:$0xff]   ;;  %v8736_v26 = vld [vmem:[%s9913_s7] sm:$0xff] }
 0x370   :  { %4828 = vmatpush1.bf16.msra.mxu1 %v6836_v27  ;;  %v6913_v27 = vld [vmem:[%s9912_s6 + $0xdcc] ss:$76 sps:$4 sm:$0xff]  }
 0x371   :  { %4869 = vmatpush1.bf16.msra.mxu0 %v6839_v28  ;;  %4829 = vmatprep.subr.bf16.mxu1 %v6844_v29  ;;  %v6908_v28 = vld [vmem:[%s9912_s6 + $0x448] ss:$76 sps:$4 sm:$0xff]   ;;  %v1409_v29 = vrot.slane %v8736_v26, %v7909_v56 }
 0x372   :  { %4870 = vmatprep.subr.bf16.mxu0 %v6847_v30  ;;  %v6911_v30 = vld [vmem:[%s9912_s6 + $0xdc8] ss:$76 sps:$4 sm:$0xff]  }
 0x374   :  { %4830 = vmatpush1.bf16.msra.mxu1 %v6842_v31  ;;  %v1413_v31 = vrot.slane %v8736_v26, %v7915_v58 }
 0x375   :  { %4871 = vmatpush1.bf16.msra.mxu0 %v6845_v32  ;;  %4831 = vmatprep.subr.bf16.mxu1 %v6850_v33  ;;  %v6916_v32 = vld [vmem:[%s9912_s6 + $0x3b4] ss:$76 sps:$4 sm:$0xff]  }
 0x376   :  { %4872 = vmatprep.subr.bf16.mxu0 %v6853_v34 }
 0x378   :  { %4832 = vmatpush1.bf16.msra.mxu1 %v6848_v35  ;;  %v6919_v35 = vld [vmem:[%s9912_s6 + $0xd34] ss:$76 sps:$4 sm:$0xff]  }
 0x379   :  { %4873 = vmatpush1.bf16.msra.mxu0 %v6851_v36  ;;  %4833 = vmatprep.subr.bf16.mxu1 %v6856_v37  ;;  %v6914_v37 = vld [vmem:[%s9912_s6 + $0x3b0] ss:$76 sps:$4 sm:$0xff]  }
 0x37a   :  { %4874 = vmatprep.subr.bf16.mxu0 %v6859_v38 }
 0x37c   :  { %4834 = vmatpush1.bf16.msra.mxu1 %v6854_v41 }
 0x37d   :  { %4875 = vmatpush1.bf16.msra.mxu0 %v6857_v42  ;;  %4835 = vmatprep.subr.bf16.mxu1 %v6862_v45  ;;  %v6917_v42 = vld [vmem:[%s9912_s6 + $0xd30] ss:$76 sps:$4 sm:$0xff]  }
 0x37e   :  { %4876 = vmatprep.subr.bf16.mxu0 %v6865_v46  ;;  %v6922_v45 = vld [vmem:[%s9912_s6 + $0x31c] ss:$76 sps:$4 sm:$0xff]  }
 0x380   :  { %4836 = vmatpush2.bf16.msra.mxu1 %v6860_v47 }
 0x381   :  { %4877 = vmatpush2.bf16.msra.mxu0 %v6863_v48  ;;  %4837 = vmatprep.subr.bf16.mxu1 %v6868_v49  ;;  %v6925_v48 = vld [vmem:[%s9912_s6 + $0xc9c] ss:$76 sps:$4 sm:$0xff]  }
 0x382   :  { %4878 = vmatprep.subr.bf16.mxu0 %v6871_v50 }
 0x384   :  { %4838 = vmatpush2.bf16.msra.mxu1 %v6866_v51 }
 0x385   :  { %4879 = vmatpush2.bf16.msra.mxu0 %v6869_v52  ;;  %4839 = vmatprep.subr.bf16.mxu1 %v6874_v53  ;;  %v6920_v53 = vld [vmem:[%s9912_s6 + $0x318] ss:$76 sps:$4 sm:$0xff]  }
 0x386   :  { %4880 = vmatprep.subr.bf16.mxu0 %v6877_v54 }
 0x388   :  { %4840 = vmatpush2.bf16.msra.mxu1 %v6872_v57 }
 0x389   :  { %4881 = vmatpush2.bf16.msra.mxu0 %v6875_v59  ;;  %4841 = vmatprep.subr.bf16.mxu1 %v6880_v60  ;;  %v6923_v59 = vld [vmem:[%s9912_s6 + $0xc98] ss:$76 sps:$4 sm:$0xff]  }
 0x38a   :  { %4882 = vmatprep.subr.bf16.mxu0 %v6883_v61  ;;  %v6928_v60 = vld [vmem:[%s9912_s6 + $0x284] ss:$76 sps:$4 sm:$0xff]  }
 0x38c   :  { %4842 = vmatpush2.bf16.msra.mxu1 %v6878_v62 }
 0x38d   :  { %4883 = vmatpush2.bf16.msra.mxu0 %v6881_v63  ;;  %4843 = vmatprep.subr.bf16.mxu1 %v6886_v0  ;;  %v6931_v63 = vld [vmem:[%s9912_s6 + $0xc04] ss:$76 sps:$4 sm:$0xff]  }
 0x38e   :  { %4884 = vmatprep.subr.bf16.mxu0 %v6889_v2  ;;  %v6926_v2 = vld [vmem:[%s9912_s6 + $0x280] ss:$76 sps:$4 sm:$0xff]  }
 0x390   :  { %4844 = vmatpush2.bf16.msra.mxu1 %v6884_v1  ;;  %v6929_v1 = vld [vmem:[%s9912_s6 + $0xc00] ss:$76 sps:$4 sm:$0xff]  }
 0x391   :  { %4885 = vmatpush2.bf16.msra.mxu0 %v6887_v3  ;;  %4845 = vmatprep.subr.bf16.mxu1 %v6892_v5  ;;  %v6934_v3 = vld [vmem:[%s9912_s6 + $0x1ec] ss:$76 sps:$4 sm:$0xff]  }
 0x392   :  { %4886 = vmatprep.subr.bf16.mxu0 %v6895_v8  ;;  %v6937_v5 = vld [vmem:[%s9912_s6 + $0xb6c] ss:$76 sps:$4 sm:$0xff]   ;;  %v6932_v8 = vld [vmem:[%s9912_s6 + $0x1e8] ss:$76 sps:$4 sm:$0xff]  }
 0x394   :  { %4846 = vmatpush2.bf16.msra.mxu1 %v6890_v11  ;;  %v6940_v11 = vld [vmem:[%s9912_s6 + $0x154] ss:$76 sps:$4 sm:$0xff]  }
 0x395   :  { %4887 = vmatpush2.bf16.msra.mxu0 %v6893_v12  ;;  %4847 = vmatprep.subr.bf16.mxu1 %v6898_v13  ;;  %v6943_v12 = vld [vmem:[%s9912_s6 + $0xad4] ss:$76 sps:$4 sm:$0xff]   ;;  %v6938_v13 = vld [vmem:[%s9912_s6 + $0x150] ss:$76 sps:$4 sm:$0xff]  }
 0x396   :  { %4888 = vmatprep.subr.bf16.mxu0 %v6901_v17  ;;  %v6949_v17 = vld [vmem:[%s9912_s6 + $0xa3c] ss:$76 sps:$4 sm:$0xff]  }
 0x398   :  { %4848 = vmatpush2.bf16.msra.mxu1 %v6896_v19  ;;  %v6944_v19 = vld [vmem:[%s9912_s6 + $0xb8] ss:$76 sps:$4 sm:$0xff]  }
 0x399   :  { %4889 = vmatpush2.bf16.msra.mxu0 %v6899_v20  ;;  %4849 = vmatprep.subr.bf16.mxu1 %v6904_v21  ;;  %v6947_v20 = vld [vmem:[%s9912_s6 + $0xa38] ss:$76 sps:$4 sm:$0xff]  }
 0x39a   :  { %4890 = vmatprep.subr.bf16.mxu0 %v6907_v22  ;;  %v6952_v21 = vld [vmem:[%s9912_s6 + $0x24] ss:$76 sps:$4 sm:$0xff]  }
 0x39c   :  { %4850 = vmatpush2.bf16.msra.mxu1 %v6902_v23  ;;  %v6955_v23 = vld [vmem:[%s9912_s6 + $0x9a4] ss:$76 sps:$4 sm:$0xff]  }
 0x39d   :  { %4891 = vmatpush2.bf16.msra.mxu0 %v6905_v24  ;;  %4901 = vmatprep.subr.bf16.mxu1 %v6910_v25 }
 0x39e   :  { %4942 = vmatprep.subr.bf16.mxu0 %v6913_v27  ;;  %v6950_v27 = vld [vmem:[%s9912_s6 + $0x20] ss:$76 sps:$4 sm:$0xff]  }
 0x39f   :  { %4852 = vmatmul.mubr.bf16.vlgmr.msra.gmra.mxu1 %v8134_v43  ;;  %v4607_v33 = vpop.f32.mrf.mxu1  ;;  %v4648_v34 = vpop.f32.mrf.mxu0 }
 0x3a0   :  { %4893 = vmatmul.mubr.bf16.vlgmr.msra.gmra.mxu0 %v8136_v44  ;;  %v4608_v36 = vadd.f32 %v4607_v33, %v1409_v29  ;;  %4902 = vmatpush1.bf16.msra.mxu1 %v6908_v28  ;;  %v6953_v29 = vld [vmem:[%s9912_s6 + $0x9a0] ss:$76 sps:$4 sm:$0xff]   ;;  %v6959_v33 = vld [vmem:[%s9912_s6 + $0x1288] ss:$76 sps:$4 sm:$0xff]  }
 0x3a1   :  { %4933 = vmatprep.mubr.bf16.mxu1 %v8124_v39  ;;  %4943 = vmatpush1.bf16.msra.mxu0 %v6911_v30  ;;  %v4609_v38 = vpop.f32.mrf.mxu1  ;;  %v4650_v41 = vpop.f32.mrf.mxu0  ;;  %v6958_v30 = vld [vmem:[%s9912_s6 + $0x90c] ss:$76 sps:$4 sm:$0xff]  }
 0x3a2   :  { %v4649_v46 = vadd.f32 %v4648_v34, %v4608_v36  ;;  %4974 = vmatprep.mubr.bf16.mxu0 %v8126_v40  ;;  %v4610_v47 = vadd.f32 %v4609_v38, %v1413_v31  ;;  %4903 = vmatprep.subr.bf16.mxu1 %v6916_v32  ;;  %v6961_v31 = vld [vmem:[%s9912_s6 + $0x128c] ss:$76 sps:$4 sm:$0xff]   ;;  %v6956_v32 = vld [vmem:[%s9912_s6 + $0x908] ss:$76 sps:$4 sm:$0xff]   ;;  %v6962_v36 = vld [vmem:[%s9912_s6 + $0x870] ss:$76 sps:$4 sm:$0xff]  }
 0x3a3   :  { %4944 = vmatprep.subr.bf16.mxu0 %v6919_v35  ;;  %v4611_v49 = vpop.f32.mrf.mxu1  ;;  %v4652_v50 = vpop.f32.mrf.mxu0  ;;  %v6964_v34 = vld [vmem:[%s9912_s6 + $0x874] ss:$76 sps:$4 sm:$0xff]   ;;  %v6970_v38 = vld [vmem:[%s9912_s6 + $0x7dc] ss:$76 sps:$4 sm:$0xff]  }
 0x3a4   :  { %v5391_v51 = vpack.c.bf16 %v4649_v46, %v4649_v46  ;;  %v4651_v52 = vadd.f32 %v4650_v41, %v4610_v47  ;;  %4904 = vmatpush1.bf16.msra.mxu1 %v6914_v37  ;;  %v6967_v35 = vld [vmem:[%s9912_s6 + $0x11f4] ss:$76 sps:$4 sm:$0xff]   ;;  %v6965_v37 = vld [vmem:[%s9912_s6 + $0x11f0] ss:$76 sps:$4 sm:$0xff]  }
 0x3a5   :  { %4945 = vmatpush1.bf16.msra.mxu0 %v6917_v42  ;;  %v4612_v54 = vpop.f32.mrf.mxu1  ;;  %v4653_v57 = vpop.f32.mrf.mxu0  ;;  %4905 = vmatprep.subr.bf16.mxu1 %v6922_v45  ;;  %v6973_v41 = vld [vmem:[%s9912_s6 + $0x115c] ss:$76 sps:$4 sm:$0xff]   ;;  %v6968_v42 = vld [vmem:[%s9912_s6 + $0x7d8] ss:$76 sps:$4 sm:$0xff]   ;;  %v6974_v49 = vld [vmem:[%s9912_s6 + $0x740] ss:$76 sps:$4 sm:$0xff]  }
 0x3a6   :  { %v6328_v61 = vmul.bf16 3216621497, %v5391_v51  ;;  %v5392_v62 = vpack.c.bf16 %v4651_v52, %v4651_v52  ;;  %4946 = vmatprep.subr.bf16.mxu0 %v6925_v48  ;;  %v6971_v45 = vld [vmem:[%s9912_s6 + $0x1158] ss:$76 sps:$4 sm:$0xff]   ;;  %v6977_v51 = vld [vmem:[%s9912_s6 + $0x10c0] ss:$76 sps:$4 sm:$0xff]  }
 0x3a7   :  { %v6976_v46 = vld [vmem:[%s9912_s6 + $0x744] ss:$76 sps:$4 sm:$0xff]   ;;  %v6982_v52 = vld [vmem:[%s9912_s6 + $0x6ac] ss:$76 sps:$4 sm:$0xff]  }
 0x3a8   :  { %7424 = vpow.bf16 %v6328_v61  ;;  %v6329_v0 = vmul.bf16 3216621497, %v5392_v62  ;;  %4906 = vmatpush1.bf16.msra.mxu1 %v6920_v53  ;;  %v6979_v47 = vld [vmem:[%s9912_s6 + $0x10c4] ss:$76 sps:$4 sm:$0xff]   ;;  %v6985_v57 = vld [vmem:[%s9912_s6 + $0x102c] ss:$76 sps:$4 sm:$0xff]  }
 0x3a9   :  { %4947 = vmatpush1.bf16.msra.mxu0 %v6923_v59  ;;  %4907 = vmatprep.subr.bf16.mxu1 %v6928_v60  ;;  %v6980_v60 = vld [vmem:[%s9912_s6 + $0x6a8] ss:$76 sps:$4 sm:$0xff]  }
 0x3aa   :  { %7426 = vpow.bf16 %v6329_v0  ;;  %4948 = vmatprep.subr.bf16.mxu0 %v6931_v63  ;;  %v6983_v61 = vld [vmem:[%s9912_s6 + $0x1028] ss:$76 sps:$4 sm:$0xff]   ;;  %v6986_v0 = vld [vmem:[%s9912_s6 + $0x610] ss:$76 sps:$4 sm:$0xff]  }
 0x3ab   :  { %v6988_v62 = vld [vmem:[%s9912_s6 + $0x614] ss:$76 sps:$4 sm:$0xff]  }
 0x3ac   :  { %4908 = vmatpush1.bf16.msra.mxu1 %v6926_v2  ;;  %v6991_v63 = vld [vmem:[%s9912_s6 + $0xf94] ss:$76 sps:$4 sm:$0xff]   ;;  %v6989_v2 = vld [vmem:[%s9912_s6 + $0xf90] ss:$76 sps:$4 sm:$0xff]  }
 0x3ad   :  { %4949 = vmatpush1.bf16.msra.mxu0 %v6929_v1  ;;  %4909 = vmatprep.subr.bf16.mxu1 %v6934_v3  ;;  %v6994_v1 = vld [vmem:[%s9912_s6 + $0x57c] ss:$76 sps:$4 sm:$0xff]  }
 0x3ae   :  { %4950 = vmatprep.subr.bf16.mxu0 %v6937_v5  ;;  %v6997_v3 = vld [vmem:[%s9912_s6 + $0xefc] ss:$76 sps:$4 sm:$0xff]   ;;  %v6992_v5 = vld [vmem:[%s9912_s6 + $0x578] ss:$76 sps:$4 sm:$0xff]  }
 0x3b0   :  { %4910 = vmatpush1.bf16.msra.mxu1 %v6932_v8  ;;  %v6995_v8 = vld [vmem:[%s9912_s6 + $0xef8] ss:$76 sps:$4 sm:$0xff]  }
 0x3b1   :  { %4951 = vmatpush1.bf16.msra.mxu0 %v6935_v10  ;;  %4911 = vmatprep.subr.bf16.mxu1 %v6940_v11  ;;  %v7000_v10 = vld [vmem:[%s9912_s6 + $0x4e4] ss:$76 sps:$4 sm:$0xff]  }
 0x3b2   :  { %4952 = vmatprep.subr.bf16.mxu0 %v6943_v12  ;;  %v7003_v11 = vld [vmem:[%s9912_s6 + $0xe64] ss:$76 sps:$4 sm:$0xff]   ;;  %v6998_v12 = vld [vmem:[%s9912_s6 + $0x4e0] ss:$76 sps:$4 sm:$0xff]  }
 0x3b4   :  { %4912 = vmatpush1.bf16.msra.mxu1 %v6938_v13  ;;  %v7001_v13 = vld [vmem:[%s9912_s6 + $0xe60] ss:$76 sps:$4 sm:$0xff]  }
 0x3b5   :  { %4953 = vmatpush1.bf16.msra.mxu0 %v6941_v14  ;;  %4913 = vmatprep.subr.bf16.mxu1 %v6946_v15  ;;  %v7006_v14 = vld [vmem:[%s9912_s6 + $0x454] ss:$76 sps:$4 sm:$0xff]  }
 0x3b6   :  { %v7425_v22 = vpop.eup %7424  ;;  %4954 = vmatprep.subr.bf16.mxu0 %v6949_v17  ;;  %v7009_v15 = vld [vmem:[%s9912_s6 + $0xdd4] ss:$76 sps:$4 sm:$0xff]   ;;  %v1417_v17 = vrot.slane %v8736_v26, %v8112_v16 }
 0x3b7   :  { %v5486_v24 = vadd.bf16 1065369472, %v7425_v22  ;;  %v7012_v22 = vld [vmem:[%s9912_s6 + $0x3bc] ss:$76 sps:$4 sm:$0xff]  }
 0x3b8   :  { %v7427_v25 = vpop.eup %7426  ;;  %4914 = vmatpush1.bf16.msra.mxu1 %v6944_v19  ;;  %v7004_v19 = vld [vmem:[%s9912_s6 + $0x450] ss:$76 sps:$4 sm:$0xff]  }
 0x3b9   :  { %7428 = vrcp.bf16 %v5486_v24  ;;  %v5487_v28 = vadd.bf16 1065369472, %v7427_v25  ;;  %4955 = vmatpush1.bf16.msra.mxu0 %v6947_v20  ;;  %4915 = vmatprep.subr.bf16.mxu1 %v6952_v21  ;;  %v7007_v20 = vld [vmem:[%s9912_s6 + $0xdd0] ss:$76 sps:$4 sm:$0xff]   ;;  %v1421_v21 = vrot.slane %v8736_v26, %v8118_v18 }
 0x3ba   :  { %4956 = vmatprep.subr.bf16.mxu0 %v6955_v23  ;;  %v7015_v25 = vld [vmem:[%s9912_s6 + $0xd3c] ss:$76 sps:$4 sm:$0xff]  }
 0x3bb   :  { %7430 = vrcp.bf16 %v5487_v28  ;;  %v7010_v28 = vld [vmem:[%s9912_s6 + $0x3b8] ss:$76 sps:$4 sm:$0xff]  }
 0x3bc   :  { %4916 = vmatpush1.bf16.msra.mxu1 %v6950_v27 }
 0x3bd   :  { %4957 = vmatpush1.bf16.msra.mxu0 %v6953_v29  ;;  %4917 = vmatprep.subr.bf16.mxu1 %v6958_v30 }
 0x3be   :  { %4958 = vmatprep.subr.bf16.mxu0 %v6961_v31  ;;  %v7013_v31 = vld [vmem:[%s9912_s6 + $0xd38] ss:$76 sps:$4 sm:$0xff]  }
 0x3c0   :  { %4918 = vmatpush2.bf16.msra.mxu1 %v6956_v32  ;;  %v7018_v32 = vld [vmem:[%s9912_s6 + $0x324] ss:$76 sps:$4 sm:$0xff]  }
 0x3c1   :  { %4959 = vmatpush2.bf16.msra.mxu0 %v6959_v33  ;;  %4919 = vmatprep.subr.bf16.mxu1 %v6964_v34 }
 0x3c2   :  { %4960 = vmatprep.subr.bf16.mxu0 %v6967_v35  ;;  %v7021_v35 = vld [vmem:[%s9912_s6 + $0xca4] ss:$76 sps:$4 sm:$0xff]  }
 0x3c4   :  { %4920 = vmatpush2.bf16.msra.mxu1 %v6962_v36 }
 0x3c5   :  { %4961 = vmatpush2.bf16.msra.mxu0 %v6965_v37  ;;  %4921 = vmatprep.subr.bf16.mxu1 %v6970_v38 }
 0x3c6   :  { %4962 = vmatprep.subr.bf16.mxu0 %v6973_v41 }
 0x3c7   :  { %v7429_v48 = vpop.eup %7428 }
 0x3c8   :  { %4922 = vmatpush2.bf16.msra.mxu1 %v6968_v42  ;;  %v5506_v53 = vmul.bf16 1065369472, %v7429_v48  ;;  %v7016_v42 = vld [vmem:[%s9912_s6 + $0x320] ss:$76 sps:$4 sm:$0xff]  }
 0x3c9   :  { %v7431_v50 = vpop.eup %7430  ;;  %4963 = vmatpush2.bf16.msra.mxu0 %v6971_v45  ;;  %4923 = vmatprep.subr.bf16.mxu1 %v6976_v46  ;;  %v7024_v48 = vld [vmem:[%s9912_s6 + $0x28c] ss:$76 sps:$4 sm:$0xff]  }
 0x3ca   :  { %v5508_v54 = vmul.bf16 1065369472, %v7431_v50  ;;  %4964 = vmatprep.subr.bf16.mxu0 %v6979_v47  ;;  %v7019_v47 = vld [vmem:[%s9912_s6 + $0xca0] ss:$76 sps:$4 sm:$0xff]  }
 0x3cc   :  { %v6347_v59 = vcombine.low %v5506_v53, %v5508_v54  ;;  %4924 = vmatpush2.bf16.msra.mxu1 %v6974_v49  ;;  %v7022_v53 = vld [vmem:[%s9912_s6 + $0x288] ss:$76 sps:$4 sm:$0xff]  }
 0x3cd   :  { %4965 = vmatpush2.bf16.msra.mxu0 %v6977_v51  ;;  %4925 = vmatprep.subr.bf16.mxu1 %v6982_v52  ;;  %v7027_v51 = vld [vmem:[%s9912_s6 + $0xc0c] ss:$76 sps:$4 sm:$0xff]   ;;  %v7025_v54 = vld [vmem:[%s9912_s6 + $0xc08] ss:$76 sps:$4 sm:$0xff]  }
 0x3ce   :  { %5601 = vst [vmem:[#allocation2] sm:$0xff] %v6347_v59  ;;  %4966 = vmatprep.subr.bf16.mxu0 %v6985_v57  ;;  %v7030_v57 = vld [vmem:[%s9912_s6 + $0x1f4] ss:$76 sps:$4 sm:$0xff]  }
 0x3cf   :  { %v7033_v59 = vld [vmem:[%s9912_s6 + $0xb74] ss:$76 sps:$4 sm:$0xff]  }
 0x3d0   :  { %4926 = vmatpush2.bf16.msra.mxu1 %v6980_v60  ;;  %v7028_v60 = vld [vmem:[%s9912_s6 + $0x1f0] ss:$76 sps:$4 sm:$0xff]  }
 0x3d1   :  { %4967 = vmatpush2.bf16.msra.mxu0 %v6983_v61  ;;  %4927 = vmatprep.subr.bf16.mxu1 %v6988_v62  ;;  %v7031_v61 = vld [vmem:[%s9912_s6 + $0xb70] ss:$76 sps:$4 sm:$0xff]  }
 0x3d2   :  { %4968 = vmatprep.subr.bf16.mxu0 %v6991_v63  ;;  %v7036_v62 = vld [vmem:[%s9912_s6 + $0x15c] ss:$76 sps:$4 sm:$0xff]  }
 0x3d3   :  { %v7039_v63 = vld [vmem:[%s9912_s6 + $0xadc] ss:$76 sps:$4 sm:$0xff]  }
 0x3d4   :  { %4928 = vmatpush2.bf16.msra.mxu1 %v6986_v0  ;;  %v7034_v0 = vld [vmem:[%s9912_s6 + $0x158] ss:$76 sps:$4 sm:$0xff]  }
 0x3d5   :  { %4969 = vmatpush2.bf16.msra.mxu0 %v6989_v2  ;;  %4929 = vmatprep.subr.bf16.mxu1 %v6994_v1  ;;  %v7037_v2 = vld [vmem:[%s9912_s6 + $0xad8] ss:$76 sps:$4 sm:$0xff]  }
 0x3d6   :  { %4970 = vmatprep.subr.bf16.mxu0 %v6997_v3  ;;  %v7042_v1 = vld [vmem:[%s9912_s6 + $0xc4] ss:$76 sps:$4 sm:$0xff]  }
 0x3d7   :  { %v7045_v3 = vld [vmem:[%s9912_s6 + $0xa44] ss:$76 sps:$4 sm:$0xff]  }
 0x3d8   :  { %4930 = vmatpush2.bf16.msra.mxu1 %v6992_v5  ;;  %v7040_v5 = vld [vmem:[%s9912_s6 + $0xc0] ss:$76 sps:$4 sm:$0xff]  }
 0x3d9   :  { %4971 = vmatpush2.bf16.msra.mxu0 %v6995_v8  ;;  %4931 = vmatprep.subr.bf16.mxu1 %v7000_v10  ;;  %v7043_v8 = vld [vmem:[%s9912_s6 + $0xa40] ss:$76 sps:$4 sm:$0xff]  }
 0x3da   :  { %4972 = vmatprep.subr.bf16.mxu0 %v7003_v11  ;;  %v7048_v10 = vld [vmem:[%s9912_s6 + $0x2c] ss:$76 sps:$4 sm:$0xff]  }
 0x3dc   :  { %4932 = vmatpush2.bf16.msra.mxu1 %v6998_v12  ;;  %v7051_v12 = vld [vmem:[%s9912_s6 + $0x9ac] ss:$76 sps:$4 sm:$0xff]  }
 0x3dd   :  { %4973 = vmatpush2.bf16.msra.mxu0 %v7001_v13  ;;  %4983 = vmatprep.subr.bf16.mxu1 %v7006_v14 }
 0x3de   :  { %5024 = vmatprep.subr.bf16.mxu0 %v7009_v15  ;;  %v7046_v15 = vld [vmem:[%s9912_s6 + $0x28] ss:$76 sps:$4 sm:$0xff]  }
 0x3df   :  { %v4689_v23 = vpop.f32.mrf.mxu1  ;;  %v4730_v24 = vpop.f32.mrf.mxu0  ;;  %4934 = vmatmul.mubr.bf16.vlgmr.msra.gmra.mxu1 %v8134_v43 }
 0x3e0   :  { %v4690_v27 = vadd.f32 %v4689_v23, %v1417_v17  ;;  %4975 = vmatmul.mubr.bf16.vlgmr.msra.gmra.mxu0 %v8136_v44  ;;  %4984 = vmatpush1.bf16.msra.mxu1 %v7004_v19  ;;  %v7049_v19 = vld [vmem:[%s9912_s6 + $0x9a8] ss:$76 sps:$4 sm:$0xff]   ;;  %v7055_v23 = vld [vmem:[%s9912_s6 + $0x1290] ss:$76 sps:$4 sm:$0xff]  }
 0x3e1   :  { %5015 = vmatprep.mubr.bf16.mxu1 %v8124_v39  ;;  %5025 = vmatpush1.bf16.msra.mxu0 %v7007_v20  ;;  %v4691_v29 = vpop.f32.mrf.mxu1  ;;  %v4732_v30 = vpop.f32.mrf.mxu0  ;;  %v7054_v20 = vld [vmem:[%s9912_s6 + $0x914] ss:$76 sps:$4 sm:$0xff]  }
 0x3e2   :  { %v4731_v33 = vadd.f32 %v4730_v24, %v4690_v27  ;;  %5056 = vmatprep.mubr.bf16.mxu0 %v8126_v40  ;;  %v4692_v34 = vadd.f32 %v4691_v29, %v1421_v21  ;;  %4985 = vmatprep.subr.bf16.mxu1 %v7012_v22  ;;  %v7057_v21 = vld [vmem:[%s9912_s6 + $0x1294] ss:$76 sps:$4 sm:$0xff]   ;;  %v7052_v22 = vld [vmem:[%s9912_s6 + $0x910] ss:$76 sps:$4 sm:$0xff]   ;;  %v7058_v27 = vld [vmem:[%s9912_s6 + $0x878] ss:$76 sps:$4 sm:$0xff]  }
 0x3e3   :  { %v4693_v36 = vpop.f32.mrf.mxu1  ;;  %v4734_v37 = vpop.f32.mrf.mxu0  ;;  %5026 = vmatprep.subr.bf16.mxu0 %v7015_v25  ;;  %v7060_v24 = vld [vmem:[%s9912_s6 + $0x87c] ss:$76 sps:$4 sm:$0xff]   ;;  %v7066_v29 = vld [vmem:[%s9912_s6 + $0x7e4] ss:$76 sps:$4 sm:$0xff]  }
 0x3e4   :  { %v5393_v38 = vpack.c.bf16 %v4731_v33, %v4731_v33  ;;  %v4733_v41 = vadd.f32 %v4732_v30, %v4692_v34  ;;  %4986 = vmatpush1.bf16.msra.mxu1 %v7010_v28  ;;  %v7063_v25 = vld [vmem:[%s9912_s6 + $0x11fc] ss:$76 sps:$4 sm:$0xff]   ;;  %v7061_v28 = vld [vmem:[%s9912_s6 + $0x11f8] ss:$76 sps:$4 sm:$0xff]  }
 0x3e5   :  { %5027 = vmatpush1.bf16.msra.mxu0 %v7013_v31  ;;  %v4694_v45 = vpop.f32.mrf.mxu1  ;;  %v4735_v46 = vpop.f32.mrf.mxu0  ;;  %4987 = vmatprep.subr.bf16.mxu1 %v7018_v32  ;;  %v7069_v30 = vld [vmem:[%s9912_s6 + $0x1164] ss:$76 sps:$4 sm:$0xff]   ;;  %v7064_v31 = vld [vmem:[%s9912_s6 + $0x7e0] ss:$76 sps:$4 sm:$0xff]   ;;  %v7070_v36 = vld [vmem:[%s9912_s6 + $0x748] ss:$76 sps:$4 sm:$0xff]  }
 0x3e6   :  { %v6330_v49 = vmul.bf16 3216621497, %v5393_v38  ;;  %v5394_v50 = vpack.c.bf16 %v4733_v41, %v4733_v41  ;;  %5028 = vmatprep.subr.bf16.mxu0 %v7021_v35  ;;  %v7067_v32 = vld [vmem:[%s9912_s6 + $0x1160] ss:$76 sps:$4 sm:$0xff]   ;;  %v7073_v38 = vld [vmem:[%s9912_s6 + $0x10c8] ss:$76 sps:$4 sm:$0xff]  }
 0x3e7   :  { %v7072_v33 = vld [vmem:[%s9912_s6 + $0x74c] ss:$76 sps:$4 sm:$0xff]   ;;  %v7078_v41 = vld [vmem:[%s9912_s6 + $0x6b4] ss:$76 sps:$4 sm:$0xff]  }
 0x3e8   :  { %7432 = vpow.bf16 %v6330_v49  ;;  %v6331_v52 = vmul.bf16 3216621497, %v5394_v50  ;;  %4988 = vmatpush1.bf16.msra.mxu1 %v7016_v42  ;;  %v7075_v34 = vld [vmem:[%s9912_s6 + $0x10cc] ss:$76 sps:$4 sm:$0xff]   ;;  %v7081_v46 = vld [vmem:[%s9912_s6 + $0x1034] ss:$76 sps:$4 sm:$0xff]  }
 0x3e9   :  { %5029 = vmatpush1.bf16.msra.mxu0 %v7019_v47  ;;  %4989 = vmatprep.subr.bf16.mxu1 %v7024_v48  ;;  %v7076_v48 = vld [vmem:[%s9912_s6 + $0x6b0] ss:$76 sps:$4 sm:$0xff]  }
 0x3ea   :  { %7434 = vpow.bf16 %v6331_v52  ;;  %5030 = vmatprep.subr.bf16.mxu0 %v7027_v51  ;;  %v7079_v49 = vld [vmem:[%s9912_s6 + $0x1030] ss:$76 sps:$4 sm:$0xff]   ;;  %v7082_v52 = vld [vmem:[%s9912_s6 + $0x618] ss:$76 sps:$4 sm:$0xff]  }
 0x3eb   :  { %v7084_v50 = vld [vmem:[%s9912_s6 + $0x61c] ss:$76 sps:$4 sm:$0xff]  }
 0x3ec   :  { %4990 = vmatpush1.bf16.msra.mxu1 %v7022_v53  ;;  %v7087_v51 = vld [vmem:[%s9912_s6 + $0xf9c] ss:$76 sps:$4 sm:$0xff]   ;;  %v7085_v53 = vld [vmem:[%s9912_s6 + $0xf98] ss:$76 sps:$4 sm:$0xff]  }
 0x3ed   :  { %5031 = vmatpush1.bf16.msra.mxu0 %v7025_v54  ;;  %4991 = vmatprep.subr.bf16.mxu1 %v7030_v57  ;;  %v7090_v54 = vld [vmem:[%s9912_s6 + $0x584] ss:$76 sps:$4 sm:$0xff]  }
 0x3ee   :  { %5032 = vmatprep.subr.bf16.mxu0 %v7033_v59  ;;  %v7093_v57 = vld [vmem:[%s9912_s6 + $0xf04] ss:$76 sps:$4 sm:$0xff]   ;;  %v7088_v59 = vld [vmem:[%s9912_s6 + $0x580] ss:$76 sps:$4 sm:$0xff]  }
 0x3f0   :  { %4992 = vmatpush1.bf16.msra.mxu1 %v7028_v60  ;;  %v7091_v60 = vld [vmem:[%s9912_s6 + $0xf00] ss:$76 sps:$4 sm:$0xff]  }
 0x3f1   :  { %5033 = vmatpush1.bf16.msra.mxu0 %v7031_v61  ;;  %4993 = vmatprep.subr.bf16.mxu1 %v7036_v62  ;;  %v7096_v61 = vld [vmem:[%s9912_s6 + $0x4ec] ss:$76 sps:$4 sm:$0xff]  }
 0x3f2   :  { %5034 = vmatprep.subr.bf16.mxu0 %v7039_v63  ;;  %v7099_v62 = vld [vmem:[%s9912_s6 + $0xe6c] ss:$76 sps:$4 sm:$0xff]   ;;  %v7094_v63 = vld [vmem:[%s9912_s6 + $0x4e8] ss:$76 sps:$4 sm:$0xff]  }
 0x3f4   :  { %4994 = vmatpush1.bf16.msra.mxu1 %v7034_v0  ;;  %v1424_v0 = vsub.s32 4, %v7906_v55 }
 0x3f5   :  { %5035 = vmatpush1.bf16.msra.mxu0 %v7037_v2  ;;  %4995 = vmatprep.subr.bf16.mxu1 %v7042_v1  ;;  %v50_v2 = vpop.xlane.xlu0 %49  ;;  %v7097_v1 = vld [vmem:[%s9912_s6 + $0xe68] ss:$76 sps:$4 sm:$0xff]  }
 0x3f6   :  { %v7433_v11 = vpop.eup %7432  ;;  %5036 = vmatprep.subr.bf16.mxu0 %v7045_v3  ;;  %v7102_v3 = vld [vmem:[%s9912_s6 + $0x45c] ss:$76 sps:$4 sm:$0xff]  }
 0x3f7   :  { %v5488_v13 = vadd.bf16 1065369472, %v7433_v11  ;;  %v54_v11 = vpop.xlane.xlu1 %53 }
 0x3f8   :  { %v7435_v14 = vpop.eup %7434  ;;  %4996 = vmatpush1.bf16.msra.mxu1 %v7040_v5  ;;  %v51_v5 = vsel %vm40_vm0, %v50_v2, 0.0  ;;  %v7130_v2 = vld [vmem:[%s9912_s6 + $0x160] ss:$76 sps:$4 sm:$0xff]  }
 0x3f9   :  { %7436 = vrcp.bf16 %v5488_v13  ;;  %v5489_v17 = vadd.bf16 1065369472, %v7435_v14  ;;  %5037 = vmatpush1.bf16.msra.mxu0 %v7043_v8  ;;  %4997 = vmatprep.subr.bf16.mxu1 %v7048_v10  ;;  %v7105_v8 = vld [vmem:[%s9912_s6 + $0xddc] ss:$76 sps:$4 sm:$0xff]   ;;  %v1428_v10 = vsub.s32 5, %v7906_v55  ;;  %v55_v14 = vsel %vm7618_vm4, %v54_v11, %v51_v5 }
 0x3fa   :  { %5038 = vmatprep.subr.bf16.mxu0 %v7051_v12  ;;  %v1425_v12 = vrot.slane %v8736_v26, %v1424_v0  ;;  %v7100_v13 = vld [vmem:[%s9912_s6 + $0x458] ss:$76 sps:$4 sm:$0xff]  }
 0x3fb   :  { %7438 = vrcp.bf16 %v5489_v17  ;;  %v7103_v17 = vld [vmem:[%s9912_s6 + $0xdd8] ss:$76 sps:$4 sm:$0xff]  }
 0x3fc   :  { %4998 = vmatpush1.bf16.msra.mxu1 %v7046_v15  ;;  %v58_v15 = vpop.xlane.xlu0 %57 }
 0x3fd   :  { %5039 = vmatpush1.bf16.msra.mxu0 %v7049_v19  ;;  %4999 = vmatprep.subr.bf16.mxu1 %v7054_v20  ;;  %v59_v19 = vsel %vm7625_vm6, %v58_v15, %v55_v14  ;;  %v1429_v20 = vrot.slane %v8736_v26, %v1428_v10  ;;  %v7106_v26 = vld [vmem:[%s9912_s6 + $0x3c0] ss:$76 sps:$4 sm:$0xff]  }
 0x3fe   :  { %5040 = vmatprep.subr.bf16.mxu0 %v7057_v21  ;;  %v7108_v21 = vld [vmem:[%s9912_s6 + $0x3c4] ss:$76 sps:$4 sm:$0xff]   ;;  %v7144_v14 = vld [vmem:[%s9912_s6 + $0x34] ss:$76 sps:$4 sm:$0xff]  }
 0x400   :  { %5000 = vmatpush2.bf16.msra.mxu1 %v7052_v22  ;;  %v60_v22 = vsub.f32 %v8689_v9, %v59_v19  ;;  %v7147_v19 = vld [vmem:[%s9912_s6 + $0x9b4] ss:$76 sps:$4 sm:$0xff]  }
 0x401   :  { %5041 = vmatpush2.bf16.msra.mxu0 %v7055_v23  ;;  %5001 = vmatprep.subr.bf16.mxu1 %v7060_v24  ;;  %v7111_v24 = vld [vmem:[%s9912_s6 + $0xd44] ss:$76 sps:$4 sm:$0xff]  }
 0x402   :  { %5042 = vmatprep.subr.bf16.mxu0 %v7063_v25 }
 0x404   :  { %5002 = vmatpush2.bf16.msra.mxu1 %v7058_v27 }
 0x405   :  { %5043 = vmatpush2.bf16.msra.mxu0 %v7061_v28  ;;  %5003 = vmatprep.subr.bf16.mxu1 %v7066_v29  ;;  %v61_v28 = vmul.f32 1.442695, %v60_v22  ;;  %v7109_v29 = vld [vmem:[%s9912_s6 + $0xd40] ss:$76 sps:$4 sm:$0xff]  }
 0x406   :  { %5044 = vmatprep.subr.bf16.mxu0 %v7069_v30  ;;  %v7114_v30 = vld [vmem:[%s9912_s6 + $0x32c] ss:$76 sps:$4 sm:$0xff]  }
 0x407   :  { %v7437_v35 = vpop.eup %7436  ;;  %7440 = vpow2.f32 %v61_v28  ;;  %v7148_v28 = vld [vmem:[%s9912_s6 + $0x918] ss:$76 sps:$4 sm:$0xff]  }
 0x408   :  { %5004 = vmatpush2.bf16.msra.mxu1 %v7064_v31  ;;  %v5510_v42 = vmul.bf16 1065369472, %v7437_v35 }
 0x409   :  { %v7439_v37 = vpop.eup %7438  ;;  %5045 = vmatpush2.bf16.msra.mxu0 %v7067_v32  ;;  %5005 = vmatprep.subr.bf16.mxu1 %v7072_v33 }
 0x40a   :  { %v5512_v45 = vmul.bf16 1065369472, %v7439_v37  ;;  %5046 = vmatprep.subr.bf16.mxu0 %v7075_v34  ;;  %v7117_v34 = vld [vmem:[%s9912_s6 + $0xcac] ss:$76 sps:$4 sm:$0xff]  }
 0x40c   :  { %v6348_v47 = vcombine.low %v5510_v42, %v5512_v45  ;;  %5006 = vmatpush2.bf16.msra.mxu1 %v7070_v36  ;;  %v7115_v45 = vld [vmem:[%s9912_s6 + $0xca8] ss:$76 sps:$4 sm:$0xff]  }
 0x40d   :  { %5047 = vmatpush2.bf16.msra.mxu0 %v7073_v38  ;;  %5007 = vmatprep.subr.bf16.mxu1 %v7078_v41  ;;  %v7112_v41 = vld [vmem:[%s9912_s6 + $0x328] ss:$76 sps:$4 sm:$0xff]  }
 0x40e   :  { %5602 = vst [vmem:[#allocation2 + $0x8] sm:$0xff] %v6348_v47  ;;  %5048 = vmatprep.subr.bf16.mxu0 %v7081_v46  ;;  %v7120_v46 = vld [vmem:[%s9912_s6 + $0x294] ss:$76 sps:$4 sm:$0xff]  }
 0x410   :  { %5008 = vmatpush2.bf16.msra.mxu1 %v7076_v48 }
 0x411   :  { %5049 = vmatpush2.bf16.msra.mxu0 %v7079_v49  ;;  %5009 = vmatprep.subr.bf16.mxu1 %v7084_v50  ;;  %v7123_v50 = vld [vmem:[%s9912_s6 + $0xc14] ss:$76 sps:$4 sm:$0xff]  }
 0x412   :  { %5050 = vmatprep.subr.bf16.mxu0 %v7087_v51 }
 0x414   :  { %5010 = vmatpush2.bf16.msra.mxu1 %v7082_v52  ;;  %v7118_v52 = vld [vmem:[%s9912_s6 + $0x290] ss:$76 sps:$4 sm:$0xff]  }
 0x415   :  { %5051 = vmatpush2.bf16.msra.mxu0 %v7085_v53  ;;  %5011 = vmatprep.subr.bf16.mxu1 %v7090_v54  ;;  %v7121_v53 = vld [vmem:[%s9912_s6 + $0xc10] ss:$76 sps:$4 sm:$0xff]  }
 0x416   :  { %5052 = vmatprep.subr.bf16.mxu0 %v7093_v57  ;;  %v7126_v54 = vld [vmem:[%s9912_s6 + $0x1fc] ss:$76 sps:$4 sm:$0xff]  }
 0x417   :  { %v7129_v57 = vld [vmem:[%s9912_s6 + $0xb7c] ss:$76 sps:$4 sm:$0xff]  }
 0x418   :  { %5012 = vmatpush2.bf16.msra.mxu1 %v7088_v59  ;;  %v7124_v59 = vld [vmem:[%s9912_s6 + $0x1f8] ss:$76 sps:$4 sm:$0xff]  }
 0x419   :  { %5053 = vmatpush2.bf16.msra.mxu0 %v7091_v60  ;;  %5013 = vmatprep.subr.bf16.mxu1 %v7096_v61  ;;  %v7127_v60 = vld [vmem:[%s9912_s6 + $0xb78] ss:$76 sps:$4 sm:$0xff]  }
 0x41a   :  { %5054 = vmatprep.subr.bf16.mxu0 %v7099_v62  ;;  %v7132_v61 = vld [vmem:[%s9912_s6 + $0x164] ss:$76 sps:$4 sm:$0xff]  }
 0x41b   :  { %v7135_v62 = vld [vmem:[%s9912_s6 + $0xae4] ss:$76 sps:$4 sm:$0xff]  }
 0x41c   :  { %5014 = vmatpush2.bf16.msra.mxu1 %v7094_v63  ;;  %v7441_v63 = vpop.eup %7440 }
 0x41d   :  { %5055 = vmatpush2.bf16.msra.mxu0 %v7097_v1  ;;  %5065 = vmatprep.subr.bf16.mxu1 %v7102_v3  ;;  %v7133_v1 = vld [vmem:[%s9912_s6 + $0xae0] ss:$76 sps:$4 sm:$0xff]   ;;  %v9231_v5 = vsel %vm46_vm5, %v7441_v63, 0.0  ;;  %v7184_v63 = vld [vmem:[%s9912_s6 + $0x588] ss:$76 sps:$4 sm:$0xff]  }
 0x41e   :  { %5106 = vmatprep.subr.bf16.mxu0 %v7105_v8  ;;  %v7138_v3 = vld [vmem:[%s9912_s6 + $0xcc] ss:$76 sps:$4 sm:$0xff]   ;;  %v64_v11 = vsel %vm40_vm0, %v9231_v5, 0.0  ;;  %v68_v15 = vsel %vm7618_vm4, %v9231_v5, 0.0 }
 0x41f   :  { %v4771_v23 = vpop.f32.mrf.mxu1  ;;  %5016 = vmatmul.mubr.bf16.vlgmr.msra.gmra.mxu1 %v8134_v43  ;;  %v7141_v8 = vld [vmem:[%s9912_s6 + $0xa4c] ss:$76 sps:$4 sm:$0xff]   ;;  %65 = vadd.xlane.f32.xlu1 %v64_v11  ;;  %v1432_v11 = vsub.s32 6, %v7906_v55 }
 0x420   :  { %v4772_v25 = vadd.f32 %v4771_v23, %v1425_v12  ;;  %v4812_v27 = vpop.f32.mrf.mxu0  ;;  %5057 = vmatmul.mubr.bf16.vlgmr.msra.gmra.mxu0 %v8136_v44  ;;  %5066 = vmatpush1.bf16.msra.mxu1 %v7100_v13  ;;  %v7136_v12 = vld [vmem:[%s9912_s6 + $0xc8] ss:$76 sps:$4 sm:$0xff]   ;;  %v7142_v23 = vld [vmem:[%s9912_s6 + $0x30] ss:$76 sps:$4 sm:$0xff]  }
 0x421   :  { %5097 = vmatprep.mubr.bf16.mxu1 %v8124_v39  ;;  %5107 = vmatpush1.bf16.msra.mxu0 %v7103_v17  ;;  %v4773_v9 = vpop.f32.mrf.mxu1  ;;  %v7139_v13 = vld [vmem:[%s9912_s6 + $0xa48] ss:$76 sps:$4 sm:$0xff]  }
 0x422   :  { %v4813_v31 = vadd.f32 %v4812_v27, %v4772_v25  ;;  %5138 = vmatprep.mubr.bf16.mxu0 %v8126_v40  ;;  %v4774_v32 = vadd.f32 %v4773_v9, %v1429_v20  ;;  %v4814_v33 = vpop.f32.mrf.mxu0  ;;  %5067 = vmatprep.subr.bf16.mxu1 %v7108_v21  ;;  %v72_v20 = vsel %vm7625_vm6, %v9231_v5, 0.0  ;;  %v7145_v25 = vld [vmem:[%s9912_s6 + $0x9b0] ss:$76 sps:$4 sm:$0xff]   ;;  %v7151_v9 = vld [vmem:[%s9912_s6 + $0x1298] ss:$76 sps:$4 sm:$0xff]  }
 0x423   :  { %v4775_v35 = vpop.f32.mrf.mxu1  ;;  %5108 = vmatprep.subr.bf16.mxu0 %v7111_v24  ;;  %69 = vadd.xlane.f32.xlu0 %v68_v15  ;;  %v7150_v27 = vld [vmem:[%s9912_s6 + $0x91c] ss:$76 sps:$4 sm:$0xff]   ;;  %v1436_v15 = vsub.s32 7, %v7906_v55 }
 0x424   :  { %v5395_v36 = vpack.c.bf16 %v4813_v31, %v4813_v31  ;;  %v4815_v37 = vadd.f32 %v4814_v33, %v4774_v32  ;;  %v4816_v38 = vpop.f32.mrf.mxu0  ;;  %5068 = vmatpush1.bf16.msra.mxu1 %v7106_v26  ;;  %73 = vadd.xlane.f32.xlu1 %v72_v20  ;;  %v7153_v26 = vld [vmem:[%s9912_s6 + $0x129c] ss:$76 sps:$4 sm:$0xff]   ;;  %v7154_v31 = vld [vmem:[%s9912_s6 + $0x880] ss:$76 sps:$4 sm:$0xff]  }
 0x425   :  { %5109 = vmatpush1.bf16.msra.mxu0 %v7109_v29  ;;  %v4776_v42 = vpop.f32.mrf.mxu1  ;;  %5069 = vmatprep.subr.bf16.mxu1 %v7114_v30  ;;  %v7156_v29 = vld [vmem:[%s9912_s6 + $0x884] ss:$76 sps:$4 sm:$0xff]   ;;  %v7157_v32 = vld [vmem:[%s9912_s6 + $0x1200] ss:$76 sps:$4 sm:$0xff]   ;;  %v7160_v35 = vld [vmem:[%s9912_s6 + $0x7e8] ss:$76 sps:$4 sm:$0xff]  }
 0x426   :  { %v6332_v47 = vmul.bf16 3216621497, %v5395_v36  ;;  %v5396_v48 = vpack.c.bf16 %v4815_v37, %v4815_v37  ;;  %v4817_v49 = vpop.f32.mrf.mxu0  ;;  %5110 = vmatprep.subr.bf16.mxu0 %v7117_v34  ;;  %v7159_v30 = vld [vmem:[%s9912_s6 + $0x1204] ss:$76 sps:$4 sm:$0xff]   ;;  %v7162_v33 = vld [vmem:[%s9912_s6 + $0x7ec] ss:$76 sps:$4 sm:$0xff]  }
 0x427   :  { %v7165_v34 = vld [vmem:[%s9912_s6 + $0x116c] ss:$76 sps:$4 sm:$0xff]   ;;  %v7163_v36 = vld [vmem:[%s9912_s6 + $0x1168] ss:$76 sps:$4 sm:$0xff]   ;;  %v7166_v42 = vld [vmem:[%s9912_s6 + $0x750] ss:$76 sps:$4 sm:$0xff]  }
 0x428   :  { %7442 = vpow.bf16 %v6332_v47  ;;  %v6333_v51 = vmul.bf16 3216621497, %v5396_v48  ;;  %5070 = vmatpush1.bf16.msra.mxu1 %v7112_v41  ;;  %v7168_v37 = vld [vmem:[%s9912_s6 + $0x754] ss:$76 sps:$4 sm:$0xff]   ;;  %v7174_v47 = vld [vmem:[%s9912_s6 + $0x6bc] ss:$76 sps:$4 sm:$0xff]  }
 0x429   :  { %5111 = vmatpush1.bf16.msra.mxu0 %v7115_v45  ;;  %5071 = vmatprep.subr.bf16.mxu1 %v7120_v46  ;;  %v7171_v38 = vld [vmem:[%s9912_s6 + $0x10d4] ss:$76 sps:$4 sm:$0xff]   ;;  %v7169_v46 = vld [vmem:[%s9912_s6 + $0x10d0] ss:$76 sps:$4 sm:$0xff]  }
 0x42a   :  { %7444 = vpow.bf16 %v6333_v51  ;;  %5112 = vmatprep.subr.bf16.mxu0 %v7123_v50  ;;  %v7177_v50 = vld [vmem:[%s9912_s6 + $0x103c] ss:$76 sps:$4 sm:$0xff]   ;;  %v7196_v20 = vld [vmem:[%s9912_s6 + $0x460] ss:$76 sps:$4 sm:$0xff]  }
 0x42c   :  { %5072 = vmatpush1.bf16.msra.mxu1 %v7118_v52  ;;  %v7172_v52 = vld [vmem:[%s9912_s6 + $0x6b8] ss:$76 sps:$4 sm:$0xff]  }
 0x42d   :  { %5113 = vmatpush1.bf16.msra.mxu0 %v7121_v53  ;;  %5073 = vmatprep.subr.bf16.mxu1 %v7126_v54  ;;  %v7175_v53 = vld [vmem:[%s9912_s6 + $0x1038] ss:$76 sps:$4 sm:$0xff]  }
 0x42e   :  { %5114 = vmatprep.subr.bf16.mxu0 %v7129_v57  ;;  %v7180_v54 = vld [vmem:[%s9912_s6 + $0x624] ss:$76 sps:$4 sm:$0xff]  }
 0x42f   :  { %v7183_v57 = vld [vmem:[%s9912_s6 + $0xfa4] ss:$76 sps:$4 sm:$0xff]  }
 0x430   :  { %5074 = vmatpush1.bf16.msra.mxu1 %v7124_v59  ;;  %v7178_v59 = vld [vmem:[%s9912_s6 + $0x620] ss:$76 sps:$4 sm:$0xff]  }
 0x431   :  { %5115 = vmatpush1.bf16.msra.mxu0 %v7127_v60  ;;  %5075 = vmatprep.subr.bf16.mxu1 %v7132_v61  ;;  %v7181_v60 = vld [vmem:[%s9912_s6 + $0xfa0] ss:$76 sps:$4 sm:$0xff]  }
 0x432   :  { %5116 = vmatprep.subr.bf16.mxu0 %v7135_v62  ;;  %v7186_v61 = vld [vmem:[%s9912_s6 + $0x58c] ss:$76 sps:$4 sm:$0xff]  }
 0x433   :  { %v7189_v62 = vld [vmem:[%s9912_s6 + $0xf0c] ss:$76 sps:$4 sm:$0xff]  }
 0x434   :  { %5076 = vmatpush1.bf16.msra.mxu1 %v7130_v2  ;;  %v7187_v2 = vld [vmem:[%s9912_s6 + $0xf08] ss:$76 sps:$4 sm:$0xff]  }
 0x435   :  { %5117 = vmatpush1.bf16.msra.mxu0 %v7133_v1  ;;  %5077 = vmatprep.subr.bf16.mxu1 %v7138_v3  ;;  %v7192_v1 = vld [vmem:[%s9912_s6 + $0x4f4] ss:$76 sps:$4 sm:$0xff]  }
 0x436   :  { %v7443_v17 = vpop.eup %7442  ;;  %5118 = vmatprep.subr.bf16.mxu0 %v7141_v8  ;;  %v7195_v3 = vld [vmem:[%s9912_s6 + $0xe74] ss:$76 sps:$4 sm:$0xff]   ;;  %v7190_v8 = vld [vmem:[%s9912_s6 + $0x4f0] ss:$76 sps:$4 sm:$0xff]  }
 0x437   :  { %v5490_v21 = vadd.bf16 1065369472, %v7443_v17  ;;  %v7505_v17 = vld [vmem:[%s9913_s7] sm:$0xff] }
 0x438   :  { %v7445_v22 = vpop.eup %7444  ;;  %5078 = vmatpush1.bf16.msra.mxu1 %v7136_v12  ;;  %v7193_v12 = vld [vmem:[%s9912_s6 + $0xe70] ss:$76 sps:$4 sm:$0xff]  }
 0x439   :  { %7446 = vrcp.bf16 %v5490_v21  ;;  %v5491_v24 = vadd.bf16 1065369472, %v7445_v22  ;;  %5119 = vmatpush1.bf16.msra.mxu0 %v7139_v13  ;;  %5079 = vmatprep.subr.bf16.mxu1 %v7144_v14  ;;  %v7198_v13 = vld [vmem:[%s9912_s6 + $0x464] ss:$76 sps:$4 sm:$0xff]   ;;  %v7199_v21 = vld [vmem:[%s9912_s6 + $0xde0] ss:$76 sps:$4 sm:$0xff]   ;;  %v1437_v22 = vrot.slane %v7505_v17, %v1436_v15 }
 0x43a   :  { %5120 = vmatprep.subr.bf16.mxu0 %v7147_v19  ;;  %v7201_v14 = vld [vmem:[%s9912_s6 + $0xde4] ss:$76 sps:$4 sm:$0xff]   ;;  %v1433_v19 = vrot.slane %v7505_v17, %v1432_v11  ;;  %v7243_v17 = vld [vmem:[%s9912_s6 + $0x9bc] ss:$76 sps:$4 sm:$0xff]  }
 0x43b   :  { %7448 = vrcp.bf16 %v5491_v24 }
 0x43c   :  { %5080 = vmatpush1.bf16.msra.mxu1 %v7142_v23  ;;  %v7204_v23 = vld [vmem:[%s9912_s6 + $0x3cc] ss:$76 sps:$4 sm:$0xff]  }
 0x43d   :  { %5121 = vmatpush1.bf16.msra.mxu0 %v7145_v25  ;;  %5081 = vmatprep.subr.bf16.mxu1 %v7150_v27  ;;  %v7207_v25 = vld [vmem:[%s9912_s6 + $0xd4c] ss:$76 sps:$4 sm:$0xff]  }
 0x43e   :  { %5122 = vmatprep.subr.bf16.mxu0 %v7153_v26 }
 0x440   :  { %5082 = vmatpush2.bf16.msra.mxu1 %v7148_v28  ;;  %v7202_v28 = vld [vmem:[%s9912_s6 + $0x3c8] ss:$76 sps:$4 sm:$0xff]  }
 0x441   :  { %5123 = vmatpush2.bf16.msra.mxu0 %v7151_v9  ;;  %5083 = vmatprep.subr.bf16.mxu1 %v7156_v29  ;;  %v7205_v29 = vld [vmem:[%s9912_s6 + $0xd48] ss:$76 sps:$4 sm:$0xff]  }
 0x442   :  { %5124 = vmatprep.subr.bf16.mxu0 %v7159_v30  ;;  %v7210_v30 = vld [vmem:[%s9912_s6 + $0x334] ss:$76 sps:$4 sm:$0xff]  }
 0x444   :  { %5084 = vmatpush2.bf16.msra.mxu1 %v7154_v31 }
 0x445   :  { %5125 = vmatpush2.bf16.msra.mxu0 %v7157_v32  ;;  %5085 = vmatprep.subr.bf16.mxu1 %v7162_v33 }
 0x446   :  { %5126 = vmatprep.subr.bf16.mxu0 %v7165_v34  ;;  %v7213_v34 = vld [vmem:[%s9912_s6 + $0xcb4] ss:$76 sps:$4 sm:$0xff]  }
 0x447   :  { %v7447_v41 = vpop.eup %7446 }
 0x448   :  { %5086 = vmatpush2.bf16.msra.mxu1 %v7160_v35  ;;  %v5514_v48 = vmul.bf16 1065369472, %v7447_v41  ;;  %v7208_v41 = vld [vmem:[%s9912_s6 + $0x330] ss:$76 sps:$4 sm:$0xff]  }
 0x449   :  { %v7449_v45 = vpop.eup %7448  ;;  %5127 = vmatpush2.bf16.msra.mxu0 %v7163_v36  ;;  %5087 = vmatprep.subr.bf16.mxu1 %v7168_v37 }
 0x44a   :  { %v5516_v49 = vmul.bf16 1065369472, %v7449_v45  ;;  %5128 = vmatprep.subr.bf16.mxu0 %v7171_v38  ;;  %v7211_v45 = vld [vmem:[%s9912_s6 + $0xcb0] ss:$76 sps:$4 sm:$0xff]  }
 0x44c   :  { %v6349_v51 = vcombine.low %v5514_v48, %v5516_v49  ;;  %5088 = vmatpush2.bf16.msra.mxu1 %v7166_v42 }
 0x44d   :  { %5129 = vmatpush2.bf16.msra.mxu0 %v7169_v46  ;;  %5089 = vmatprep.subr.bf16.mxu1 %v7174_v47  ;;  %v7216_v46 = vld [vmem:[%s9912_s6 + $0x29c] ss:$76 sps:$4 sm:$0xff]  }
 0x44e   :  { %5603 = vst [vmem:[#allocation2 + $0x10] sm:$0xff] %v6349_v51  ;;  %5130 = vmatprep.subr.bf16.mxu0 %v7177_v50  ;;  %v7219_v50 = vld [vmem:[%s9912_s6 + $0xc1c] ss:$76 sps:$4 sm:$0xff]  }
 0x450   :  { %5090 = vmatpush2.bf16.msra.mxu1 %v7172_v52  ;;  %v7214_v52 = vld [vmem:[%s9912_s6 + $0x298] ss:$76 sps:$4 sm:$0xff]  }
 0x451   :  { %5131 = vmatpush2.bf16.msra.mxu0 %v7175_v53  ;;  %5091 = vmatprep.subr.bf16.mxu1 %v7180_v54  ;;  %v7217_v53 = vld [vmem:[%s9912_s6 + $0xc18] ss:$76 sps:$4 sm:$0xff]  }
 0x452   :  { %5132 = vmatprep.subr.bf16.mxu0 %v7183_v57  ;;  %v7222_v54 = vld [vmem:[%s9912_s6 + $0x204] ss:$76 sps:$4 sm:$0xff]  }
 0x453   :  { %v7225_v57 = vld [vmem:[%s9912_s6 + $0xb84] ss:$76 sps:$4 sm:$0xff]  }
 0x454   :  { %5092 = vmatpush2.bf16.msra.mxu1 %v7178_v59  ;;  %v7220_v59 = vld [vmem:[%s9912_s6 + $0x200] ss:$76 sps:$4 sm:$0xff]  }
 0x455   :  { %5133 = vmatpush2.bf16.msra.mxu0 %v7181_v60  ;;  %5093 = vmatprep.subr.bf16.mxu1 %v7186_v61  ;;  %v7223_v60 = vld [vmem:[%s9912_s6 + $0xb80] ss:$76 sps:$4 sm:$0xff]  }
 0x456   :  { %5134 = vmatprep.subr.bf16.mxu0 %v7189_v62  ;;  %v7228_v61 = vld [vmem:[%s9912_s6 + $0x16c] ss:$76 sps:$4 sm:$0xff]  }
 0x457   :  { %v7231_v62 = vld [vmem:[%s9912_s6 + $0xaec] ss:$76 sps:$4 sm:$0xff]  }
 0x458   :  { %5094 = vmatpush2.bf16.msra.mxu1 %v7184_v63  ;;  %v7226_v63 = vld [vmem:[%s9912_s6 + $0x168] ss:$76 sps:$4 sm:$0xff]  }
 0x459   :  { %5135 = vmatpush2.bf16.msra.mxu0 %v7187_v2  ;;  %5095 = vmatprep.subr.bf16.mxu1 %v7192_v1  ;;  %v7229_v2 = vld [vmem:[%s9912_s6 + $0xae8] ss:$76 sps:$4 sm:$0xff]  }
 0x45a   :  { %5136 = vmatprep.subr.bf16.mxu0 %v7195_v3  ;;  %v7234_v1 = vld [vmem:[%s9912_s6 + $0xd4] ss:$76 sps:$4 sm:$0xff]  }
 0x45b   :  { %v7237_v3 = vld [vmem:[%s9912_s6 + $0xa54] ss:$76 sps:$4 sm:$0xff]  }
 0x45c   :  { %5096 = vmatpush2.bf16.msra.mxu1 %v7190_v8  ;;  %v7232_v8 = vld [vmem:[%s9912_s6 + $0xd0] ss:$76 sps:$4 sm:$0xff]  }
 0x45d   :  { %5137 = vmatpush2.bf16.msra.mxu0 %v7193_v12  ;;  %5147 = vmatprep.subr.bf16.mxu1 %v7198_v13  ;;  %v7235_v12 = vld [vmem:[%s9912_s6 + $0xa50] ss:$76 sps:$4 sm:$0xff]  }
 0x45e   :  { %5188 = vmatprep.subr.bf16.mxu0 %v7201_v14  ;;  %v7240_v13 = vld [vmem:[%s9912_s6 + $0x3c] ss:$76 sps:$4 sm:$0xff]  }
 0x45f   :  { %v4853_v24 = vpop.f32.mrf.mxu1  ;;  %5098 = vmatmul.mubr.bf16.vlgmr.msra.gmra.mxu1 %v8134_v43 }
 0x460   :  { %v4854_v27 = vadd.f32 %v4853_v24, %v1433_v19  ;;  %v4894_v26 = vpop.f32.mrf.mxu0  ;;  %5139 = vmatmul.mubr.bf16.vlgmr.msra.gmra.mxu0 %v8136_v44  ;;  %5148 = vmatpush1.bf16.msra.mxu1 %v7196_v20  ;;  %v7246_v24 = vld [vmem:[%s9912_s6 + $0x924] ss:$76 sps:$4 sm:$0xff]  }
 0x461   :  { %5179 = vmatprep.mubr.bf16.mxu1 %v8124_v39  ;;  %5189 = vmatpush1.bf16.msra.mxu0 %v7199_v21  ;;  %v4855_v9 = vpop.f32.mrf.mxu1  ;;  %v7238_v21 = vld [vmem:[%s9912_s6 + $0x38] ss:$76 sps:$4 sm:$0xff]  }
 0x462   :  { %v4895_v31 = vadd.f32 %v4894_v26, %v4854_v27  ;;  %5220 = vmatprep.mubr.bf16.mxu0 %v8126_v40  ;;  %v4856_v32 = vadd.f32 %v4855_v9, %v1437_v22  ;;  %v4896_v33 = vpop.f32.mrf.mxu0  ;;  %5149 = vmatprep.subr.bf16.mxu1 %v7204_v23  ;;  %v7241_v23 = vld [vmem:[%s9912_s6 + $0x9b8] ss:$76 sps:$4 sm:$0xff]   ;;  %v7244_v27 = vld [vmem:[%s9912_s6 + $0x920] ss:$76 sps:$4 sm:$0xff]  }
 0x463   :  { %v4857_v35 = vpop.f32.mrf.mxu1  ;;  %5190 = vmatprep.subr.bf16.mxu0 %v7207_v25  ;;  %v7249_v25 = vld [vmem:[%s9912_s6 + $0x12a4] ss:$76 sps:$4 sm:$0xff]   ;;  %v7247_v26 = vld [vmem:[%s9912_s6 + $0x12a0] ss:$76 sps:$4 sm:$0xff]  }
 0x464   :  { %v5397_v36 = vpack.c.bf16 %v4895_v31, %v4895_v31  ;;  %v4897_v37 = vadd.f32 %v4896_v33, %v4856_v32  ;;  %v4898_v38 = vpop.f32.mrf.mxu0  ;;  %5150 = vmatpush1.bf16.msra.mxu1 %v7202_v28  ;;  %v7252_v28 = vld [vmem:[%s9912_s6 + $0x88c] ss:$76 sps:$4 sm:$0xff]   ;;  %v7258_v31 = vld [vmem:[%s9912_s6 + $0x7f4] ss:$76 sps:$4 sm:$0xff]   ;;  %v7256_v33 = vld [vmem:[%s9912_s6 + $0x7f0] ss:$76 sps:$4 sm:$0xff]  }
 0x465   :  { %5191 = vmatpush1.bf16.msra.mxu0 %v7205_v29  ;;  %v4858_v42 = vpop.f32.mrf.mxu1  ;;  %5151 = vmatprep.subr.bf16.mxu1 %v7210_v30  ;;  %v7255_v9 = vld [vmem:[%s9912_s6 + $0x120c] ss:$76 sps:$4 sm:$0xff]   ;;  %v7250_v29 = vld [vmem:[%s9912_s6 + $0x888] ss:$76 sps:$4 sm:$0xff]  }
 0x466   :  { %v6334_v47 = vmul.bf16 3216621497, %v5397_v36  ;;  %v5398_v48 = vpack.c.bf16 %v4897_v37, %v4897_v37  ;;  %v4899_v49 = vpop.f32.mrf.mxu0  ;;  %5192 = vmatprep.subr.bf16.mxu0 %v7213_v34  ;;  %v7253_v30 = vld [vmem:[%s9912_s6 + $0x1208] ss:$76 sps:$4 sm:$0xff]   ;;  %v7259_v34 = vld [vmem:[%s9912_s6 + $0x1170] ss:$76 sps:$4 sm:$0xff]  }
 0x467   :  { %v7261_v32 = vld [vmem:[%s9912_s6 + $0x1174] ss:$76 sps:$4 sm:$0xff]   ;;  %v7264_v35 = vld [vmem:[%s9912_s6 + $0x75c] ss:$76 sps:$4 sm:$0xff]   ;;  %v7262_v38 = vld [vmem:[%s9912_s6 + $0x758] ss:$76 sps:$4 sm:$0xff]  }
 0x468   :  { %7450 = vpow.bf16 %v6334_v47  ;;  %v6335_v51 = vmul.bf16 3216621497, %v5398_v48  ;;  %5152 = vmatpush1.bf16.msra.mxu1 %v7208_v41  ;;  %v7267_v36 = vld [vmem:[%s9912_s6 + $0x10dc] ss:$76 sps:$4 sm:$0xff]   ;;  %v7265_v42 = vld [vmem:[%s9912_s6 + $0x10d8] ss:$76 sps:$4 sm:$0xff]  }
 0x469   :  { %5193 = vmatpush1.bf16.msra.mxu0 %v7211_v45  ;;  %5153 = vmatprep.subr.bf16.mxu1 %v7216_v46  ;;  %v7270_v45 = vld [vmem:[%s9912_s6 + $0x6c4] ss:$76 sps:$4 sm:$0xff]  }
 0x46a   :  { %7452 = vpow.bf16 %v6335_v51  ;;  %5194 = vmatprep.subr.bf16.mxu0 %v7219_v50  ;;  %v7273_v48 = vld [vmem:[%s9912_s6 + $0x1044] ss:$76 sps:$4 sm:$0xff]   ;;  %v7268_v50 = vld [vmem:[%s9912_s6 + $0x6c0] ss:$76 sps:$4 sm:$0xff]  }
 0x46b   :  { %v7271_v51 = vld [vmem:[%s9912_s6 + $0x1040] ss:$76 sps:$4 sm:$0xff]  }
 0x46c   :  { %5154 = vmatpush1.bf16.msra.mxu1 %v7214_v52  ;;  %v7276_v52 = vld [vmem:[%s9912_s6 + $0x62c] ss:$76 sps:$4 sm:$0xff]  }
 0x46d   :  { %5195 = vmatpush1.bf16.msra.mxu0 %v7217_v53  ;;  %5155 = vmatprep.subr.bf16.mxu1 %v7222_v54  ;;  %v7279_v53 = vld [vmem:[%s9912_s6 + $0xfac] ss:$76 sps:$4 sm:$0xff]   ;;  %v7274_v54 = vld [vmem:[%s9912_s6 + $0x628] ss:$76 sps:$4 sm:$0xff]  }
 0x46e   :  { %5196 = vmatprep.subr.bf16.mxu0 %v7225_v57  ;;  %v7277_v57 = vld [vmem:[%s9912_s6 + $0xfa8] ss:$76 sps:$4 sm:$0xff]  }
 0x470   :  { %5156 = vmatpush1.bf16.msra.mxu1 %v7220_v59  ;;  %v7282_v59 = vld [vmem:[%s9912_s6 + $0x594] ss:$76 sps:$4 sm:$0xff]  }
 0x471   :  { %5197 = vmatpush1.bf16.msra.mxu0 %v7223_v60  ;;  %5157 = vmatprep.subr.bf16.mxu1 %v7228_v61  ;;  %v7285_v60 = vld [vmem:[%s9912_s6 + $0xf14] ss:$76 sps:$4 sm:$0xff]   ;;  %v7280_v61 = vld [vmem:[%s9912_s6 + $0x590] ss:$76 sps:$4 sm:$0xff]  }
 0x472   :  { %5198 = vmatprep.subr.bf16.mxu0 %v7231_v62  ;;  %v7283_v62 = vld [vmem:[%s9912_s6 + $0xf10] ss:$76 sps:$4 sm:$0xff]  }
 0x474   :  { %5158 = vmatpush1.bf16.msra.mxu1 %v7226_v63  ;;  %v7288_v63 = vld [vmem:[%s9912_s6 + $0x4fc] ss:$76 sps:$4 sm:$0xff]  }
 0x475   :  { %5199 = vmatpush1.bf16.msra.mxu0 %v7229_v2  ;;  %5159 = vmatprep.subr.bf16.mxu1 %v7234_v1  ;;  %v7291_v2 = vld [vmem:[%s9912_s6 + $0xe7c] ss:$76 sps:$4 sm:$0xff]   ;;  %v7286_v1 = vld [vmem:[%s9912_s6 + $0x4f8] ss:$76 sps:$4 sm:$0xff]  }
 0x476   :  { %v7451_v14 = vpop.eup %7450  ;;  %5200 = vmatprep.subr.bf16.mxu0 %v7237_v3  ;;  %v7289_v3 = vld [vmem:[%s9912_s6 + $0xe78] ss:$76 sps:$4 sm:$0xff]  }
 0x477   :  { %v5492_v19 = vadd.bf16 1065369472, %v7451_v14 }
 0x478   :  { %v7453_v20 = vpop.eup %7452  ;;  %5160 = vmatpush1.bf16.msra.mxu1 %v7232_v8  ;;  %v9567_v8 = vld [vmem:[%s9913_s7 + $0x8] sm:$0xff] }
 0x479   :  { %7454 = vrcp.bf16 %v5492_v19  ;;  %v5493_v22 = vadd.bf16 1065369472, %v7453_v20  ;;  %5201 = vmatpush1.bf16.msra.mxu0 %v7235_v12  ;;  %5161 = vmatprep.subr.bf16.mxu1 %v7240_v13  ;;  %v7294_v12 = vld [vmem:[%s9912_s6 + $0x46c] ss:$76 sps:$4 sm:$0xff]   ;;  %v1441_v14 = vrot.slane %v9567_v8, %v7909_v56  ;;  %v7295_v19 = vld [vmem:[%s9912_s6 + $0xde8] ss:$76 sps:$4 sm:$0xff]   ;;  %v1445_v20 = vrot.slane %v9567_v8, %v7915_v58 }
 0x47a   :  { %5202 = vmatprep.subr.bf16.mxu0 %v7243_v17  ;;  %v7297_v13 = vld [vmem:[%s9912_s6 + $0xdec] ss:$76 sps:$4 sm:$0xff]   ;;  %v7292_v17 = vld [vmem:[%s9912_s6 + $0x468] ss:$76 sps:$4 sm:$0xff]  }
 0x47b   :  { %7456 = vrcp.bf16 %v5493_v22 }
 0x47c   :  { %5162 = vmatpush1.bf16.msra.mxu1 %v7238_v21  ;;  %v7300_v21 = vld [vmem:[%s9912_s6 + $0x3d4] ss:$76 sps:$4 sm:$0xff]  }
 0x47d   :  { %5203 = vmatpush1.bf16.msra.mxu0 %v7241_v23  ;;  %5163 = vmatprep.subr.bf16.mxu1 %v7246_v24  ;;  %v7303_v23 = vld [vmem:[%s9912_s6 + $0xd54] ss:$76 sps:$4 sm:$0xff]  }
 0x47e   :  { %5204 = vmatprep.subr.bf16.mxu0 %v7249_v25 }
 0x480   :  { %5164 = vmatpush2.bf16.msra.mxu1 %v7244_v27  ;;  %v7298_v27 = vld [vmem:[%s9912_s6 + $0x3d0] ss:$76 sps:$4 sm:$0xff]  }
 0x481   :  { %5205 = vmatpush2.bf16.msra.mxu0 %v7247_v26  ;;  %5165 = vmatprep.subr.bf16.mxu1 %v7252_v28  ;;  %v7301_v28 = vld [vmem:[%s9912_s6 + $0xd50] ss:$76 sps:$4 sm:$0xff]  }
 0x482   :  { %5206 = vmatprep.subr.bf16.mxu0 %v7255_v9  ;;  %v7306_v9 = vld [vmem:[%s9912_s6 + $0x33c] ss:$76 sps:$4 sm:$0xff]  }
 0x484   :  { %5166 = vmatpush2.bf16.msra.mxu1 %v7250_v29 }
 0x485   :  { %5207 = vmatpush2.bf16.msra.mxu0 %v7253_v30  ;;  %5167 = vmatprep.subr.bf16.mxu1 %v7258_v31 }
 0x486   :  { %5208 = vmatprep.subr.bf16.mxu0 %v7261_v32  ;;  %v7309_v32 = vld [vmem:[%s9912_s6 + $0xcbc] ss:$76 sps:$4 sm:$0xff]  }
 0x487   :  { %v7455_v37 = vpop.eup %7454 }
 0x488   :  { %5168 = vmatpush2.bf16.msra.mxu1 %v7256_v33  ;;  %v5518_v46 = vmul.bf16 1065369472, %v7455_v37  ;;  %v7304_v37 = vld [vmem:[%s9912_s6 + $0x338] ss:$76 sps:$4 sm:$0xff]  }
 0x489   :  { %v7457_v41 = vpop.eup %7456  ;;  %5209 = vmatpush2.bf16.msra.mxu0 %v7259_v34  ;;  %5169 = vmatprep.subr.bf16.mxu1 %v7264_v35 }
 0x48a   :  { %v5520_v47 = vmul.bf16 1065369472, %v7457_v41  ;;  %5210 = vmatprep.subr.bf16.mxu0 %v7267_v36  ;;  %v7307_v41 = vld [vmem:[%s9912_s6 + $0xcb8] ss:$76 sps:$4 sm:$0xff]  }
 0x48c   :  { %v6350_v49 = vcombine.low %v5518_v46, %v5520_v47  ;;  %5170 = vmatpush2.bf16.msra.mxu1 %v7262_v38 }
 0x48d   :  { %5211 = vmatpush2.bf16.msra.mxu0 %v7265_v42  ;;  %5171 = vmatprep.subr.bf16.mxu1 %v7270_v45  ;;  %v7312_v42 = vld [vmem:[%s9912_s6 + $0x2a4] ss:$76 sps:$4 sm:$0xff]  }
 0x48e   :  { %5604 = vst [vmem:[#allocation2 + $0x18] sm:$0xff] %v6350_v49  ;;  %5212 = vmatprep.subr.bf16.mxu0 %v7273_v48  ;;  %v7315_v48 = vld [vmem:[%s9912_s6 + $0xc24] ss:$76 sps:$4 sm:$0xff]  }
 0x490   :  { %5172 = vmatpush2.bf16.msra.mxu1 %v7268_v50  ;;  %v7310_v50 = vld [vmem:[%s9912_s6 + $0x2a0] ss:$76 sps:$4 sm:$0xff]  }
 0x491   :  { %5213 = vmatpush2.bf16.msra.mxu0 %v7271_v51  ;;  %5173 = vmatprep.subr.bf16.mxu1 %v7276_v52  ;;  %v7313_v51 = vld [vmem:[%s9912_s6 + $0xc20] ss:$76 sps:$4 sm:$0xff]  }
 0x492   :  { %5214 = vmatprep.subr.bf16.mxu0 %v7279_v53  ;;  %v7318_v52 = vld [vmem:[%s9912_s6 + $0x20c] ss:$76 sps:$4 sm:$0xff]  }
 0x493   :  { %v7321_v53 = vld [vmem:[%s9912_s6 + $0xb8c] ss:$76 sps:$4 sm:$0xff]  }
 0x494   :  { %5174 = vmatpush2.bf16.msra.mxu1 %v7274_v54  ;;  %v7316_v54 = vld [vmem:[%s9912_s6 + $0x208] ss:$76 sps:$4 sm:$0xff]  }
 0x495   :  { %5215 = vmatpush2.bf16.msra.mxu0 %v7277_v57  ;;  %5175 = vmatprep.subr.bf16.mxu1 %v7282_v59  ;;  %v7319_v57 = vld [vmem:[%s9912_s6 + $0xb88] ss:$76 sps:$4 sm:$0xff]  }
 0x496   :  { %5216 = vmatprep.subr.bf16.mxu0 %v7285_v60  ;;  %v7324_v59 = vld [vmem:[%s9912_s6 + $0x174] ss:$76 sps:$4 sm:$0xff]  }
 0x497   :  { %v7327_v60 = vld [vmem:[%s9912_s6 + $0xaf4] ss:$76 sps:$4 sm:$0xff]  }
 0x498   :  { %5176 = vmatpush2.bf16.msra.mxu1 %v7280_v61  ;;  %v7322_v61 = vld [vmem:[%s9912_s6 + $0x170] ss:$76 sps:$4 sm:$0xff]  }
 0x499   :  { %5217 = vmatpush2.bf16.msra.mxu0 %v7283_v62  ;;  %5177 = vmatprep.subr.bf16.mxu1 %v7288_v63  ;;  %v7325_v62 = vld [vmem:[%s9912_s6 + $0xaf0] ss:$76 sps:$4 sm:$0xff]  }
 0x49a   :  { %5218 = vmatprep.subr.bf16.mxu0 %v7291_v2  ;;  %v7330_v63 = vld [vmem:[%s9912_s6 + $0xdc] ss:$76 sps:$4 sm:$0xff]  }
 0x49b   :  { %v7333_v2 = vld [vmem:[%s9912_s6 + $0xa5c] ss:$76 sps:$4 sm:$0xff]  }
 0x49c   :  { %5178 = vmatpush2.bf16.msra.mxu1 %v7286_v1  ;;  %v7328_v1 = vld [vmem:[%s9912_s6 + $0xd8] ss:$76 sps:$4 sm:$0xff]  }
 0x49d   :  { %5219 = vmatpush2.bf16.msra.mxu0 %v7289_v3  ;;  %5229 = vmatprep.subr.bf16.mxu1 %v7294_v12  ;;  %v7331_v3 = vld [vmem:[%s9912_s6 + $0xa58] ss:$76 sps:$4 sm:$0xff]  }
 0x49e   :  { %5270 = vmatprep.subr.bf16.mxu0 %v7297_v13  ;;  %v7336_v12 = vld [vmem:[%s9912_s6 + $0x44] ss:$76 sps:$4 sm:$0xff]  }
 0x49f   :  { %v4935_v22 = vpop.f32.mrf.mxu1  ;;  %5180 = vmatmul.mubr.bf16.vlgmr.msra.gmra.mxu1 %v8134_v43 }
 0x4a0   :  { %v4936_v24 = vadd.f32 %v4935_v22, %v1441_v14  ;;  %v4976_v25 = vpop.f32.mrf.mxu0  ;;  %5221 = vmatmul.mubr.bf16.vlgmr.msra.gmra.mxu0 %v8136_v44  ;;  %5230 = vmatpush1.bf16.msra.mxu1 %v7292_v17  ;;  %v7339_v14 = vld [vmem:[%s9912_s6 + $0x9c4] ss:$76 sps:$4 sm:$0xff]   ;;  %v7337_v22 = vld [vmem:[%s9912_s6 + $0x9c0] ss:$76 sps:$4 sm:$0xff]  }
 0x4a1   :  { %5261 = vmatprep.mubr.bf16.mxu1 %v8124_v39  ;;  %5271 = vmatpush1.bf16.msra.mxu0 %v7295_v19  ;;  %v4937_v26 = vpop.f32.mrf.mxu1 }
 0x4a2   :  { %v4977_v29 = vadd.f32 %v4976_v25, %v4936_v24  ;;  %5302 = vmatprep.mubr.bf16.mxu0 %v8126_v40  ;;  %v4938_v30 = vadd.f32 %v4937_v26, %v1445_v20  ;;  %v4978_v31 = vpop.f32.mrf.mxu0  ;;  %5231 = vmatprep.subr.bf16.mxu1 %v7300_v21  ;;  %v7334_v20 = vld [vmem:[%s9912_s6 + $0x40] ss:$76 sps:$4 sm:$0xff]   ;;  %v7340_v25 = vld [vmem:[%s9912_s6 + $0x928] ss:$76 sps:$4 sm:$0xff]  }
 0x4a3   :  { %v4939_v33 = vpop.f32.mrf.mxu1  ;;  %5272 = vmatprep.subr.bf16.mxu0 %v7303_v23  ;;  %v7342_v23 = vld [vmem:[%s9912_s6 + $0x92c] ss:$76 sps:$4 sm:$0xff]   ;;  %v7343_v26 = vld [vmem:[%s9912_s6 + $0x12a8] ss:$76 sps:$4 sm:$0xff]  }
 0x4a4   :  { %v5399_v34 = vpack.c.bf16 %v4977_v29, %v4977_v29  ;;  %v4979_v35 = vadd.f32 %v4978_v31, %v4938_v30  ;;  %v4980_v36 = vpop.f32.mrf.mxu0  ;;  %5232 = vmatpush1.bf16.msra.mxu1 %v7298_v27  ;;  %v7345_v24 = vld [vmem:[%s9912_s6 + $0x12ac] ss:$76 sps:$4 sm:$0xff]   ;;  %v7346_v31 = vld [vmem:[%s9912_s6 + $0x890] ss:$76 sps:$4 sm:$0xff]  }
 0x4a5   :  { %5273 = vmatpush1.bf16.msra.mxu0 %v7301_v28  ;;  %v4940_v38 = vpop.f32.mrf.mxu1  ;;  %5233 = vmatprep.subr.bf16.mxu1 %v7306_v9  ;;  %v7348_v28 = vld [vmem:[%s9912_s6 + $0x894] ss:$76 sps:$4 sm:$0xff]   ;;  %v7352_v36 = vld [vmem:[%s9912_s6 + $0x7f8] ss:$76 sps:$4 sm:$0xff]  }
 0x4a6   :  { %v6336_v45 = vmul.bf16 3216621497, %v5399_v34  ;;  %v5400_v46 = vpack.c.bf16 %v4979_v35, %v4979_v35  ;;  %v4981_v47 = vpop.f32.mrf.mxu0  ;;  %5274 = vmatprep.subr.bf16.mxu0 %v7309_v32  ;;  %v7351_v9 = vld [vmem:[%s9912_s6 + $0x1214] ss:$76 sps:$4 sm:$0xff]   ;;  %v7349_v34 = vld [vmem:[%s9912_s6 + $0x1210] ss:$76 sps:$4 sm:$0xff]  }
 0x4a7   :  { %v7363_v38 = vld [vmem:[%s9912_s6 + $0x10e4] ss:$76 sps:$4 sm:$0xff]   ;;  %v7366_v47 = vld [vmem:[%s9912_s6 + $0x6cc] ss:$76 sps:$4 sm:$0xff]  }
 0x4a8   :  { %7458 = vpow.bf16 %v6336_v45  ;;  %v6337_v49 = vmul.bf16 3216621497, %v5400_v46  ;;  %5234 = vmatpush1.bf16.msra.mxu1 %v7304_v37  ;;  %v66_v27 = vpop.xlane.xlu1 %65  ;;  %v7355_v37 = vld [vmem:[%s9912_s6 + $0x1178] ss:$76 sps:$4 sm:$0xff]   ;;  %v7361_v46 = vld [vmem:[%s9912_s6 + $0x10e0] ss:$76 sps:$4 sm:$0xff]  }
 0x4a9   :  { %5275 = vmatpush1.bf16.msra.mxu0 %v7307_v41  ;;  %5235 = vmatprep.subr.bf16.mxu1 %v7312_v42  ;;  %v67_v29 = vsel %vm40_vm0, %v66_v27, 1.0  ;;  %v7358_v42 = vld [vmem:[%s9912_s6 + $0x760] ss:$76 sps:$4 sm:$0xff]   ;;  %v7393_v27 = vld [vmem:[%s9912_s6 + $0x1218] ss:$76 sps:$4 sm:$0xff]  }
 0x4aa   :  { %7460 = vpow.bf16 %v6337_v49  ;;  %5276 = vmatprep.subr.bf16.mxu0 %v7315_v48 }
 0x4ac   :  { %5236 = vmatpush1.bf16.msra.mxu1 %v7310_v50  ;;  %v70_v30 = vpop.xlane.xlu0 %69  ;;  %v7369_v50 = vld [vmem:[%s9912_s6 + $0x104c] ss:$76 sps:$4 sm:$0xff]  }
 0x4ad   :  { %5277 = vmatpush1.bf16.msra.mxu0 %v7313_v51  ;;  %5237 = vmatprep.subr.bf16.mxu1 %v7318_v52  ;;  %v71_v32 = vsel %vm7618_vm4, %v70_v30, %v67_v29  ;;  %v74_v33 = vpop.xlane.xlu1 %73  ;;  %v7364_v52 = vld [vmem:[%s9912_s6 + $0x6c8] ss:$76 sps:$4 sm:$0xff]   ;;  %v7395_v29 = vld [vmem:[%s9912_s6 + $0xd58] ss:$76 sps:$4 sm:$0xff]   ;;  %v7396_v30 = vld [vmem:[%s9912_s6 + $0x800] ss:$76 sps:$4 sm:$0xff]  }
 0x4ae   :  { %5278 = vmatprep.subr.bf16.mxu0 %v7321_v53  ;;  %v75_v35 = vsel %vm7625_vm6, %v74_v33, %v71_v32  ;;  %v7367_v53 = vld [vmem:[%s9912_s6 + $0x1048] ss:$76 sps:$4 sm:$0xff]  }
 0x4b0   :  { %5238 = vmatpush1.bf16.msra.mxu1 %v7316_v54  ;;  %v7372_v54 = vld [vmem:[%s9912_s6 + $0x634] ss:$76 sps:$4 sm:$0xff]  }
 0x4b1   :  { %5279 = vmatpush1.bf16.msra.mxu0 %v7319_v57  ;;  %5239 = vmatprep.subr.bf16.mxu1 %v7324_v59  ;;  %v7375_v57 = vld [vmem:[%s9912_s6 + $0xfb4] ss:$76 sps:$4 sm:$0xff]  }
 0x4b2   :  { %5280 = vmatprep.subr.bf16.mxu0 %v7327_v60  ;;  %v7370_v60 = vld [vmem:[%s9912_s6 + $0x630] ss:$76 sps:$4 sm:$0xff]  }
 0x4b4   :  { %5240 = vmatpush1.bf16.msra.mxu1 %v7322_v61 }
 0x4b5   :  { %5281 = vmatpush1.bf16.msra.mxu0 %v7325_v62  ;;  %5241 = vmatprep.subr.bf16.mxu1 %v7330_v63  ;;  %v7373_v62 = vld [vmem:[%s9912_s6 + $0xfb0] ss:$76 sps:$4 sm:$0xff]  }
 0x4b6   :  { %v7459_v13 = vpop.eup %7458  ;;  %5282 = vmatprep.subr.bf16.mxu0 %v7333_v2  ;;  %v7378_v63 = vld [vmem:[%s9912_s6 + $0x59c] ss:$76 sps:$4 sm:$0xff]  }
 0x4b7   :  { %v5494_v17 = vadd.bf16 1065369472, %v7459_v13  ;;  %v7381_v2 = vld [vmem:[%s9912_s6 + $0xf1c] ss:$76 sps:$4 sm:$0xff]   ;;  %v7382_v13 = vld [vmem:[%s9912_s6 + $0x500] ss:$76 sps:$4 sm:$0xff]  }
 0x4b8   :  { %v7461_v19 = vpop.eup %7460  ;;  %5242 = vmatpush1.bf16.msra.mxu1 %v7328_v1  ;;  %v7379_v1 = vld [vmem:[%s9912_s6 + $0xf18] ss:$76 sps:$4 sm:$0xff]  }
 0x4b9   :  { %7462 = vrcp.bf16 %v5494_v17  ;;  %v5495_v21 = vadd.bf16 1065369472, %v7461_v19  ;;  %5283 = vmatpush1.bf16.msra.mxu0 %v7331_v3  ;;  %5243 = vmatprep.subr.bf16.mxu1 %v7336_v12  ;;  %v7384_v3 = vld [vmem:[%s9912_s6 + $0x504] ss:$76 sps:$4 sm:$0xff]  }
 0x4ba   :  { %5284 = vmatprep.subr.bf16.mxu0 %v7339_v14  ;;  %v7387_v12 = vld [vmem:[%s9912_s6 + $0xe84] ss:$76 sps:$4 sm:$0xff]   ;;  %v7385_v14 = vld [vmem:[%s9912_s6 + $0xe80] ss:$76 sps:$4 sm:$0xff]  }
 0x4bb   :  { %7464 = vrcp.bf16 %v5495_v21  ;;  %v7388_v17 = vld [vmem:[%s9912_s6 + $0x930] ss:$76 sps:$4 sm:$0xff]  }
 0x4bc   :  { %5244 = vmatpush1.bf16.msra.mxu1 %v7334_v20  ;;  %7466 = vrcp.f32 %v75_v35  ;;  %v7389_v19 = vld [vmem:[%s9912_s6 + $0x12b0] ss:$76 sps:$4 sm:$0xff]   ;;  %v1449_v20 = vrot.slane %v9567_v8, %v8112_v16 }
 0x4bd   :  { %5285 = vmatpush1.bf16.msra.mxu0 %v7337_v22  ;;  %5245 = vmatprep.subr.bf16.mxu1 %v7342_v23  ;;  %v7390_v21 = vld [vmem:[%s9912_s6 + $0x470] ss:$76 sps:$4 sm:$0xff]   ;;  %v1453_v23 = vrot.slane %v9567_v8, %v8118_v18  ;;  %v7394_v18 = vld [vmem:[%s9912_s6 + $0x3d8] ss:$76 sps:$4 sm:$0xff]  }
 0x4be   :  { %5286 = vmatprep.subr.bf16.mxu0 %v7345_v24  ;;  %v7391_v22 = vld [vmem:[%s9912_s6 + $0xdf0] ss:$76 sps:$4 sm:$0xff]   ;;  %v7392_v24 = vld [vmem:[%s9912_s6 + $0x898] ss:$76 sps:$4 sm:$0xff]  }
 0x4c0   :  { %5246 = vmatpush2.bf16.msra.mxu1 %v7340_v25 }
 0x4c1   :  { %5287 = vmatpush2.bf16.msra.mxu0 %v7343_v26  ;;  %5247 = vmatprep.subr.bf16.mxu1 %v7348_v28 }
 0x4c2   :  { %5288 = vmatprep.subr.bf16.mxu0 %v7351_v9 }
 0x4c4   :  { %5248 = vmatpush2.bf16.msra.mxu1 %v7346_v31 }
 0x4c5   :  { %5289 = vmatpush2.bf16.msra.mxu0 %v7349_v34  ;;  %5249 = vmatprep.subr.bf16.mxu1 %v7354_v4 }
 0x4c6   :  { %5290 = vmatprep.subr.bf16.mxu0 %v7357_v6 }
 0x4c7   :  { %v7463_v41 = vpop.eup %7462 }
 0x4c8   :  { %5250 = vmatpush2.bf16.msra.mxu1 %v7352_v36  ;;  %v5522_v48 = vmul.bf16 1065369472, %v7463_v41  ;;  %v7398_v36 = vld [vmem:[%s9912_s6 + $0x340] ss:$76 sps:$4 sm:$0xff]  }
 0x4c9   :  { %v7465_v45 = vpop.eup %7464  ;;  %5291 = vmatpush2.bf16.msra.mxu0 %v7355_v37  ;;  %5251 = vmatprep.subr.bf16.mxu1 %v7360_v7  ;;  %v7400_v7 = vld [vmem:[%s9912_s6 + $0x768] ss:$76 sps:$4 sm:$0xff]  }
 0x4ca   :  { %v5524_v49 = vmul.bf16 1065369472, %v7465_v45  ;;  %5292 = vmatprep.subr.bf16.mxu0 %v7363_v38  ;;  %v7467_v59 = vpop.eup %7466  ;;  %v7401_v45 = vld [vmem:[%s9912_s6 + $0x10e8] ss:$76 sps:$4 sm:$0xff]  }
 0x4cb   :  { %v77_v61 = vmul.f32 %v7467_v59, %v9231_v5  ;;  %v7376_v5 = vld [vmem:[%s9912_s6 + $0x598] ss:$76 sps:$4 sm:$0xff]  }
 0x4cc   :  { %v6351_v51 = vcombine.low %v5522_v48, %v5524_v49  ;;  %5252 = vmatpush2.bf16.msra.mxu1 %v7358_v42  ;;  %v7403_v48 = vld [vmem:[%s9912_s6 + $0xc28] ss:$76 sps:$4 sm:$0xff]   ;;  %v7404_v49 = vld [vmem:[%s9912_s6 + $0x6d0] ss:$76 sps:$4 sm:$0xff]   ;;  %v7411_v59 = vld [vmem:[%s9912_s6 + $0xaf8] ss:$76 sps:$4 sm:$0xff]  }
 0x4cd   :  { %5293 = vmatpush2.bf16.msra.mxu0 %v7361_v46  ;;  %5253 = vmatprep.subr.bf16.mxu1 %v7366_v47  ;;  %78 = vst [vmem:[#allocation4] sm:$0xff] %v77_v61  ;;  %v7402_v47 = vld [vmem:[%s9912_s6 + $0x2a8] ss:$76 sps:$4 sm:$0xff]   ;;  %v7413_v61 = vld [vmem:[%s9912_s6 + $0xf20] ss:$76 sps:$4 sm:$0xff]  }
 0x4ce   :  { %5605 = vst [vmem:[#allocation2 + $0x20] sm:$0xff] %v6351_v51  ;;  %5294 = vmatprep.subr.bf16.mxu0 %v7369_v50  ;;  %v7405_v50 = vld [vmem:[%s9912_s6 + $0x1050] ss:$76 sps:$4 sm:$0xff]  }
 0x4cf   :  { %v7406_v51 = vld [vmem:[%s9912_s6 + $0x210] ss:$76 sps:$4 sm:$0xff]  }
 0x4d0   :  { %5254 = vmatpush2.bf16.msra.mxu1 %v7364_v52  ;;  %v7407_v52 = vld [vmem:[%s9912_s6 + $0xb90] ss:$76 sps:$4 sm:$0xff]  }
 0x4d1   :  { %5295 = vmatpush2.bf16.msra.mxu0 %v7367_v53  ;;  %5255 = vmatprep.subr.bf16.mxu1 %v7372_v54  ;;  %v7408_v53 = vld [vmem:[%s9912_s6 + $0x638] ss:$76 sps:$4 sm:$0xff]  }
 0x4d2   :  { %5296 = vmatprep.subr.bf16.mxu0 %v7375_v57  ;;  %v7409_v54 = vld [vmem:[%s9912_s6 + $0xfb8] ss:$76 sps:$4 sm:$0xff]  }
 0x4d3   :  { %v7410_v57 = vld [vmem:[%s9912_s6 + $0x178] ss:$76 sps:$4 sm:$0xff]  }
 0x4d4   :  { %5256 = vmatpush2.bf16.msra.mxu1 %v7370_v60  ;;  %v7412_v60 = vld [vmem:[%s9912_s6 + $0x5a0] ss:$76 sps:$4 sm:$0xff]  }
 0x4d5   :  { %5297 = vmatpush2.bf16.msra.mxu0 %v7373_v62  ;;  %5257 = vmatprep.subr.bf16.mxu1 %v7378_v63  ;;  %v7414_v62 = vld [vmem:[%s9912_s6 + $0xe0] ss:$76 sps:$4 sm:$0xff]  }
 0x4d6   :  { %5298 = vmatprep.subr.bf16.mxu0 %v7381_v2  ;;  %v7415_v63 = vld [vmem:[%s9912_s6 + $0xa60] ss:$76 sps:$4 sm:$0xff]   ;;  %v7416_v2 = vld [vmem:[%s9912_s6 + $0x508] ss:$76 sps:$4 sm:$0xff]  }
 0x4d8   :  { %5258 = vmatpush2.bf16.msra.mxu1 %v7376_v5 }
 0x4d9   :  { %5299 = vmatpush2.bf16.msra.mxu0 %v7379_v1  ;;  %5259 = vmatprep.subr.bf16.mxu1 %v7384_v3  ;;  %v7417_v1 = vld [vmem:[%s9912_s6 + $0xe88] ss:$76 sps:$4 sm:$0xff]  }
 0x4da   :  { %5300 = vmatprep.subr.bf16.mxu0 %v7387_v12 }
 0x4dc   :  { %5260 = vmatpush2.bf16.msra.mxu1 %v7382_v13  ;;  %v7418_v13 = vld [vmem:[%s9912_s6 + $0x48] ss:$76 sps:$4 sm:$0xff]  }
 0x4dd   :  { %5301 = vmatpush2.bf16.msra.mxu0 %v7385_v14  ;;  %6357 = vmatprep.subr.bf16.mxu1 %v7388_v17  ;;  %v7419_v17 = vld [vmem:[%s9912_s6 + $0x9c8] ss:$76 sps:$4 sm:$0xff]  }
 0x4de   :  { %6379 = vmatprep.subr.bf16.mxu0 %v7389_v19 }
 0x4df   :  { %v5017_v25 = vpop.f32.mrf.mxu1  ;;  %5262 = vmatmul.mubr.bf16.vlgmr.msra.gmra.mxu1 %v8134_v43 }
 0x4e0   :  { %v5018_v26 = vadd.f32 %v5017_v25, %v1449_v20  ;;  %v5058_v28 = vpop.f32.mrf.mxu0  ;;  %5303 = vmatmul.mubr.bf16.vlgmr.msra.gmra.mxu0 %v8136_v44  ;;  %6358 = vmatpush3.bf16.msra.mxu1 %v7390_v21  ;;  %v1461_v25 = vrot.slane %v9567_v8, %v1428_v10 }
 0x4e1   :  { %5343 = vmatprep.mubr.bf16.mxu1 %v8124_v39  ;;  %6380 = vmatpush3.bf16.msra.mxu0 %v7391_v22  ;;  %v5019_v9 = vpop.f32.mrf.mxu1  ;;  %v7397_v39 = vld [vmem:[%s9912_s6 + $0x1180] ss:$76 sps:$4 sm:$0xff]  }
 0x4e2   :  { %v5059_v31 = vadd.f32 %v5058_v28, %v5018_v26  ;;  %5383 = vmatprep.mubr.bf16.mxu0 %v8126_v40  ;;  %v5020_v32 = vadd.f32 %v5019_v9, %v1453_v23  ;;  %v5060_v33 = vpop.f32.mrf.mxu0  ;;  %6359 = vmatprep.subr.bf16.mxu1 %v7392_v24  ;;  %v7399_v40 = vld [vmem:[%s9912_s6 + $0xcc0] ss:$76 sps:$4 sm:$0xff]   ;;  %v1457_v24 = vrot.slane %v9567_v8, %v1424_v0  ;;  %s7551_s6 = smov [#allocation4]  }
 0x4e3   :  { %v5021_v34 = vpop.f32.mrf.mxu1  ;;  %6381 = vmatprep.subr.bf16.mxu0 %v7393_v27  ;;  %s5628_s20 = sshll.u32 %s7551_s6, 4  ;;  %s5629_s20 = int_to_ptr.vmem [resolvable:$true] %s5628_s20 }
 0x4e4   :  { %v5401_v4 = vpack.c.bf16 %v5059_v31, %v5059_v31  ;;  %v5061_v35 = vadd.f32 %v5060_v33, %v5020_v32  ;;  %v5062_v6 = vpop.f32.mrf.mxu0  ;;  %6360 = vmatpush3.bf16.msra.mxu1 %v7394_v18  ;;  %s7506_s5 = scalar_lea.vmem %s5629_s20, 128  ;;  %p7511_p1 = scmp.lt.s32.totalorder %s5629_s20, %s5629_s20 }
 0x4e5   :  { %6382 = vmatpush3.bf16.msra.mxu0 %v7395_v29  ;;  %v5022_v37 = vpop.f32.mrf.mxu1  ;;  %6361 = vmatprep.subr.bf16.mxu1 %v7396_v30  ;;  %p7507_p0 = scmp.ne.s32.totalorder %s5629_s20, %s7506_s5  ;;  %p7512_p2 = scmp.lt.s32.totalorder %s7506_s5, %s7506_s5 }
 0x4e6   :  { %v6338_v38 = vmul.bf16 3216621497, %v5401_v4  ;;  %v5402_v41 = vpack.c.bf16 %v5061_v35, %v5061_v35  ;;  %v5063_v42 = vpop.f32.mrf.mxu0  ;;  %6383 = vmatprep.subr.bf16.mxu0 %v7397_v39 }
 0x4e7   :  { %v1465_v42 = vrot.slane %v9567_v8, %v1432_v11  ;;  %p7513_p3 = por %p7512_p2, %p7511_p1 }
 0x4e8   :  { %7468 = vpow.bf16 %v6338_v38  ;;  %v6339_v46 = vmul.bf16 3216621497, %v5402_v41  ;;  %6362 = vmatpush3.bf16.msra.mxu1 %v7398_v36 }
 0x4e9   :  { %6384 = vmatpush3.bf16.msra.mxu0 %v7399_v40  ;;  %6363 = vmatprep.subr.bf16.mxu1 %v7400_v7  ;;  %p7514_p4 = pnand %p7513_p3, %p7507_p0 }
 0x4ea   :  { %7470 = vpow.bf16 %v6339_v46  ;;  %6385 = vmatprep.subr.bf16.mxu0 %v7401_v45  ;;  %v1469_v45 = vrot.slane %v9567_v8, %v1436_v15 }
 0x4ec   :  { %6364 = vmatpush3.bf16.msra.mxu1 %v7402_v47 }
 0x4ed   :  { %6386 = vmatpush3.bf16.msra.mxu0 %v7403_v48  ;;  %6365 = vmatprep.subr.bf16.mxu1 %v7404_v49 }
 0x4ee   :  { %6387 = vmatprep.subr.bf16.mxu0 %v7405_v50 }
 0x4f0   :  { %6366 = vmatpush3.bf16.msra.mxu1 %v7406_v51 }
 0x4f1   :  { %6388 = vmatpush3.bf16.msra.mxu0 %v7407_v52  ;;  %6367 = vmatprep.subr.bf16.mxu1 %v7408_v53 }
 0x4f2   :  { %6389 = vmatprep.subr.bf16.mxu0 %v7409_v54 }
 0x4f4   :  { %6368 = vmatpush3.bf16.msra.mxu1 %v7410_v57 }
 0x4f5   :  { %6390 = vmatpush3.bf16.msra.mxu0 %v7411_v59  ;;  %6369 = vmatprep.subr.bf16.mxu1 %v7412_v60 }
 0x4f6   :  { %v7469_v5 = vpop.eup %7468  ;;  %6391 = vmatprep.subr.bf16.mxu0 %v7413_v61 }
 0x4f7   :  { %v5496_v3 = vadd.bf16 1065369472, %v7469_v5 }
 0x4f8   :  { %v7471_v12 = vpop.eup %7470  ;;  %6370 = vmatpush3.bf16.msra.mxu1 %v7414_v62 }
 0x4f9   :  { %7472 = vrcp.bf16 %v5496_v3  ;;  %v5497_v14 = vadd.bf16 1065369472, %v7471_v12  ;;  %6392 = vmatpush3.bf16.msra.mxu0 %v7415_v63  ;;  %6371 = vmatprep.subr.bf16.mxu1 %v7416_v2 }
 0x4fa   :  { %6393 = vmatprep.subr.bf16.mxu0 %v7417_v1 }
 0x4fb   :  { %7474 = vrcp.bf16 %v5497_v14 }
 0x4fc   :  { %6372 = vmatpush3.bf16.msra.mxu1 %v7418_v13 }
 0x4fd   :  { %6394 = vmatpush3.bf16.msra.mxu0 %v7419_v17 }
 0x4ff   :  { %5344 = vmatmul.mubr.bf16.vlgmr.msra.gmra.mxu1 %v8134_v43 }
 0x500   :  { %5384 = vmatmul.mubr.bf16.vlgmr.msra.gmra.mxu0 %v8136_v44 }
 0x507   :  { %v7473_v19 = vpop.eup %7472 }
 0x508   :  { %v5526_v21 = vmul.bf16 1065369472, %v7473_v19 }
 0x509   :  { %v7475_v20 = vpop.eup %7474 }
 0x50a   :  { %v5528_v22 = vmul.bf16 1065369472, %v7475_v20 }
 0x50c   :  { %v6352_v23 = vcombine.low %v5526_v21, %v5528_v22 }
 0x50e   :  { %5606 = vst [vmem:[#allocation2 + $0x28] sm:$0xff] %v6352_v23 }
 0x51f   :  { %v5099_v27 = vpop.f32.mrf.mxu1 }
 0x520   :  { %v5100_v26 = vadd.f32 %v5099_v27, %v1457_v24  ;;  %v5140_v28 = vpop.f32.mrf.mxu0 }
 0x521   :  { %v5101_v43 = vpop.f32.mrf.mxu1 }
 0x522   :  { %v5141_v18 = vadd.f32 %v5140_v28, %v5100_v26  ;;  %v5102_v44 = vadd.f32 %v5101_v43, %v1461_v25  ;;  %v5142_v9 = vpop.f32.mrf.mxu0 }
 0x523   :  { %v5103_v29 = vpop.f32.mrf.mxu1 }
 0x524   :  { %v5403_v30 = vpack.c.bf16 %v5141_v18, %v5141_v18  ;;  %v5143_v31 = vadd.f32 %v5142_v9, %v5102_v44  ;;  %v5144_v32 = vpop.f32.mrf.mxu0 }
 0x525   :  { %v5104_v33 = vpop.f32.mrf.mxu1 }
 0x526   :  { %v6340_v39 = vmul.bf16 3216621497, %v5403_v30  ;;  %v5404_v34 = vpack.c.bf16 %v5143_v31, %v5143_v31  ;;  %v5145_v4 = vpop.f32.mrf.mxu0 }
 0x528   :  { %7476 = vpow.bf16 %v6340_v39  ;;  %v6341_v0 = vmul.bf16 3216621497, %v5404_v34 }
 0x52a   :  { %7478 = vpow.bf16 %v6341_v0 }
 0x536   :  { %v7477_v35 = vpop.eup %7476 }
 0x537   :  { %v5498_v10 = vadd.bf16 1065369472, %v7477_v35 }
 0x538   :  { %v7479_v6 = vpop.eup %7478 }
 0x539   :  { %7480 = vrcp.bf16 %v5498_v10  ;;  %v5499_v36 = vadd.bf16 1065369472, %v7479_v6 }
 0x53b   :  { %7482 = vrcp.bf16 %v5499_v36 }
 0x547   :  { %v7481_v37 = vpop.eup %7480 }
 0x548   :  { %v5530_v7 = vmul.bf16 1065369472, %v7481_v37 }
 0x549   :  { %v7483_v40 = vpop.eup %7482 }
 0x54a   :  { %v5532_v38 = vmul.bf16 1065369472, %v7483_v40 }
 0x54c   :  { %v6353_v41 = vcombine.low %v5530_v7, %v5532_v38 }
 0x54e   :  { %5607 = vst [vmem:[#allocation2 + $0x30] sm:$0xff] %v6353_v41 }
 0x55f   :  { %v5181_v46 = vpop.f32.mrf.mxu1 }
 0x560   :  { %v5182_v47 = vadd.f32 %v5181_v46, %v1465_v42  ;;  %v5222_v48 = vpop.f32.mrf.mxu0 }
 0x561   :  { %v5183_v49 = vpop.f32.mrf.mxu1 }
 0x562   :  { %v5223_v50 = vadd.f32 %v5222_v48, %v5182_v47  ;;  %v5184_v51 = vadd.f32 %v5183_v49, %v1469_v45  ;;  %v5224_v52 = vpop.f32.mrf.mxu0 }
 0x563   :  { %v5185_v53 = vpop.f32.mrf.mxu1 }
 0x564   :  { %v5405_v54 = vpack.c.bf16 %v5223_v50, %v5223_v50  ;;  %v5225_v57 = vadd.f32 %v5224_v52, %v5184_v51  ;;  %v5226_v59 = vpop.f32.mrf.mxu0 }
 0x565   :  { %v5186_v60 = vpop.f32.mrf.mxu1 }
 0x566   :  { %v6342_v61 = vmul.bf16 3216621497, %v5405_v54  ;;  %v5406_v62 = vpack.c.bf16 %v5225_v57, %v5225_v57  ;;  %v5227_v63 = vpop.f32.mrf.mxu0 }
 0x568   :  { %7484 = vpow.bf16 %v6342_v61  ;;  %v6343_v11 = vmul.bf16 3216621497, %v5406_v62 }
 0x56a   :  { %7486 = vpow.bf16 %v6343_v11 }
 0x56b   :  { %7517 = shalt.err (!%p7514_p4)
}
 0x56c   :  { %5631 = dma.vmem_to_hbm [thread:$0]  %s5629_s20, 128, %s9915_s9, [#allocation5]   ;;  %v1402_v14 = vld [vmem:[%s9913_s7 + $0x10] sm:$0x7]  ;;  %vm5610_vm7 = vcmask 388096  }
 0x56d   :  { %v1473_v17 = vrot.slane %v1402_v14, %v7909_v56  ;;  %v1477_v19 = vrot.slane %v1402_v14, %v7915_v58  ;;  %v1481_v4 = vrot.slane %v1402_v14, %v8112_v16  ;;  %s7552_s7 = smov [#allocation2]  }
 0x56e   :  { %s5618_s9 = sshll.u32 %s7552_s7, 4  ;;  %s5619_s9 = int_to_ptr.vmem [resolvable:$true] %s5618_s9 }
 0x56f   :  { %s7526_s24 = scalar_lea.vmem %s5619_s9, 1216  ;;  %p7531_p6 = scmp.lt.s32.totalorder %s5619_s9, %s5619_s9 }
 0x570   :  { %p7527_p5 = scmp.ne.s32.totalorder %s5619_s9, %s7526_s24  ;;  %p7532_p7 = scmp.lt.s32.totalorder %s7526_s24, %s7526_s24 }
 0x572   :  { %p7533_p8 = por %p7532_p7, %p7531_p6 }
 0x574   :  { %p7534_p9 = pnand %p7533_p8, %p7527_p5 }
 0x576   :  { %v7485_v55 = vpop.eup %7484 }
 0x577   :  { %v5500_v15 = vadd.bf16 1065369472, %v7485_v55 }
 0x578   :  { %v7487_v8 = vpop.eup %7486 }
 0x579   :  { %7488 = vrcp.bf16 %v5500_v15  ;;  %v5501_v2 = vadd.bf16 1065369472, %v7487_v8 }
 0x57b   :  { %7490 = vrcp.bf16 %v5501_v2 }
 0x587   :  { %v7489_v5 = vpop.eup %7488 }
 0x588   :  { %v5534_v3 = vmul.bf16 1065369472, %v7489_v5 }
 0x589   :  { %v7491_v1 = vpop.eup %7490 }
 0x58a   :  { %v5536_v12 = vmul.bf16 1065369472, %v7491_v1 }
 0x58c   :  { %v6354_v13 = vcombine.low %v5534_v3, %v5536_v12 }
 0x58e   :  { %5608 = vst [vmem:[#allocation2 + $0x38] sm:$0xff] %v6354_v13 }
 0x59f   :  { %v5263_v20 = vpop.f32.mrf.mxu1 }
 0x5a0   :  { %v5264_v21 = vadd.f32 %v5263_v20, %v1473_v17  ;;  %v5304_v22 = vpop.f32.mrf.mxu0 }
 0x5a1   :  { %v5265_v23 = vpop.f32.mrf.mxu1 }
 0x5a2   :  { %v5305_v24 = vadd.f32 %v5304_v22, %v5264_v21  ;;  %v5266_v25 = vadd.f32 %v5265_v23, %v1477_v19  ;;  %v5306_v27 = vpop.f32.mrf.mxu0 }
 0x5a3   :  { %v5267_v26 = vpop.f32.mrf.mxu1 }
 0x5a4   :  { %v5407_v28 = vpack.c.bf16 %v5305_v24, %v5305_v24  ;;  %v5307_v43 = vadd.f32 %v5306_v27, %v5266_v25  ;;  %v5308_v18 = vpop.f32.mrf.mxu0 }
 0x5a5   :  { %v5268_v44 = vpop.f32.mrf.mxu1 }
 0x5a6   :  { %v6344_v9 = vmul.bf16 3216621497, %v5407_v28  ;;  %v5408_v29 = vpack.c.bf16 %v5307_v43, %v5307_v43  ;;  %v5309_v30 = vpop.f32.mrf.mxu0 }
 0x5a8   :  { %7492 = vpow.bf16 %v6344_v9  ;;  %v6345_v31 = vmul.bf16 3216621497, %v5408_v29 }
 0x5aa   :  { %7494 = vpow.bf16 %v6345_v31 }
 0x5b6   :  { %v7493_v56 = vpop.eup %7492 }
 0x5b7   :  { %v5502_v58 = vadd.bf16 1065369472, %v7493_v56 }
 0x5b8   :  { %v7495_v32 = vpop.eup %7494 }
 0x5b9   :  { %7496 = vrcp.bf16 %v5502_v58  ;;  %v5503_v33 = vadd.bf16 1065369472, %v7495_v32 }
 0x5bb   :  { %7498 = vrcp.bf16 %v5503_v33 }
 0x5bf   :  { %v6373_v39 = vpop.f32.mrf.mxu1 }
 0x5c0   :  { %v6395_v34 = vpop.f32.mrf.mxu0 }
 0x5c1   :  { %v6374_v0 = vpop.f32.mrf.mxu1 }
 0x5c2   :  { %v6375_v35 = vadd.f32 %v6374_v0, %v6373_v39  ;;  %v6396_v10 = vpop.f32.mrf.mxu0 }
 0x5c3   :  { %v6376_v6 = vpop.f32.mrf.mxu1  ;;  %v6397_v37 = vadd.f32 %v6396_v10, %v6395_v34 }
 0x5c4   :  { %v5346_v36 = vadd.f32 %v6375_v35, %v1481_v4  ;;  %v6398_v40 = vpop.f32.mrf.mxu0 }
 0x5c5   :  { %v6377_v7 = vpop.f32.mrf.mxu1 }
 0x5c6   :  { %v5386_v38 = vadd.f32 %v6397_v37, %v5346_v36  ;;  %v6399_v41 = vpop.f32.mrf.mxu0 }
 0x5c7   :  { %v7497_v42 = vpop.eup %7496 }
 0x5c8   :  { %v5409_v45 = vpack.c.bf16 %v5386_v38, %v5386_v38  ;;  %v5538_v47 = vmul.bf16 1065369472, %v7497_v42 }
 0x5c9   :  { %v7499_v46 = vpop.eup %7498 }
 0x5ca   :  { %v5540_v48 = vmul.bf16 1065369472, %v7499_v46  ;;  %v6346_v49 = vmul.bf16 3216621497, %v5409_v45 }
 0x5cc   :  { %v6355_v50 = vcombine.low %v5538_v47, %v5540_v48  ;;  %7500 = vpow.bf16 %v6346_v49 }
 0x5ce   :  { %5609 = vst [vmem:[#allocation2 + $0x40] sm:$0xff] %v6355_v50 }
 0x5da   :  { %v7501_v16 = vpop.eup %7500 }
 0x5db   :  { %v5504_v51 = vadd.bf16 1065369472, %v7501_v16 }
 0x5dd   :  { %7502 = vrcp.bf16 %v5504_v51 }
 0x5eb   :  { %v7503_v52 = vpop.eup %7502 }
 0x5ec   :  { %v5542_v53 = vmul.bf16 1065369472, %v7503_v52 }
 0x5ee   :  { %v6356_v54 = vcombine.low %v5542_v53, %v5542_v53 }
 0x5f0   :  { %5611 = vst.msk [vmem:[#allocation2 + $0x48] sm:$0xf] %vm5610_vm7, %v6356_v54 }
 0x5f1   :  { %7537 = shalt.err (!%p7534_p9)
}
 0x5f2   :  { %5621 = dma.vmem_to_hbm [thread:$0]  %s5619_s9, 1216, %s9914_s8, [#allocation3]  }
 0x5f3   :  { %7546 = dma.done.wait [#allocation3], 1216  }
 0x5f4   :  { %7547 = vsyncadd [#allocation3], 4294966080 }
 0x5f5   :  { %7548 = dma.done.wait [#allocation5], 128  }
 0x5f6   :  { %7549 = vsyncadd [#allocation5], 4294967168 }
 0x5f7   :  { %5638 = vsyncpa [#allocation3], 1 }
 0x5f8   :  { %5639 = vsyncpa [#allocation5], 1 }

</bundles_post_ra>
